<compile_context>
chip_gen: v7x
topology: tpu7x:2x2x1
jax: 0.10.0
libtpu: 0.0.40
codegen_flags: <defaults>
</compile_context>

<pallas_src>
import jax
import jax.numpy as jnp
from jax.experimental import pallas as pl
from jax.experimental.pallas import tpu as pltpu


_MAX_TILE_ROWS = 8                  # row tile: 8 rows * W=128 -> ~1k matmul rows
_VMEM_LIMIT = 32 * 1024 * 1024      # explicit scoped-VMEM cap, portable v5e/v6e/v7x


def _pick_tile(h, max_rows=_MAX_TILE_ROWS):
    """Largest divisor of h that is <= max_rows (keeps the grid exact)."""
    for t in range(min(h, max_rows), 0, -1):
        if h % t == 0:
            return t
    return 1


# ----------------------------------------------------------------------------
# Kernel 1: fused ConvTranspose2d(k=2, s=2) for x1 and x2 + channel concat.
#
# Because kernel == stride, out[n, 2h+kh, 2w+kw, oc] = x[n,h,w,:] @ W[:,oc,kh,kw]
# + b[oc].  For each kh the kernel emits one lane-dense slab of width 4*Cout
# whose column order is (kw, src, c) with src=0 <- x1, src=1 <- x2; the weights
# are pre-arranged (with zero blocks) so one matmul per (input, kh) produces
# the slab directly -- no in-kernel concat / transpose, fully dense stores.
# ----------------------------------------------------------------------------
def _up_concat_kernel(x1_ref, x2_ref, wa_ref, wb_ref, b_ref, o_ref):
    # x1/x2: (1, TH, W, Cin) bf16; wa/wb: (2, Cin, 4*Cout) bf16;
    # b: (1, 4*Cout) f32; o: (1, TH, 2, W, 4*Cout).
    _, th, w, cin = x1_ref.shape
    c4 = o_ref.shape[-1]
    x1 = x1_ref[0].reshape(th * w, cin)
    x2 = x2_ref[0].reshape(th * w, cin)
    for kh in range(2):
        y = (jnp.dot(x1, wa_ref[kh], preferred_element_type=jnp.float32)
             + jnp.dot(x2, wb_ref[kh], preferred_element_type=jnp.float32)
             + b_ref[...])
        o_ref[0:1, :, kh:kh + 1, :, :] = (
            y.reshape(1, th, 1, w, c4).astype(o_ref.dtype))


def up_concat(x1_nhwc, x2_nhwc, up_w, up_b):
    """Shared ConvTranspose2d(2,2) on x1 and x2 + concat along channels.

    x1/x2: (N, H, W, Cin); up_w: (Cin, Cout, 2, 2); up_b: (Cout,)
    Returns (N, 2H, 2W, 2*Cout) bf16 NHWC.
    """
    n, h, w, cin = x1_nhwc.shape
    cout = up_w.shape[1]
    c4 = 4 * cout

    # (Cin, Cout, kh, kw) -> (kh, kw, Cin, Cout)
    wt = jnp.transpose(up_w, (2, 3, 0, 1)).astype(jnp.bfloat16)
    z = jnp.zeros((cin, cout), jnp.bfloat16)
    # Slab column order is (kw, src, c): [x1@W(kh,0), x2@W(kh,0), x1@W(kh,1), x2@W(kh,1)]
    wa = jnp.stack([jnp.concatenate([wt[kh, 0], z, wt[kh, 1], z], axis=-1)
                    for kh in range(2)])
    wb = jnp.stack([jnp.concatenate([z, wt[kh, 0], z, wt[kh, 1]], axis=-1)
                    for kh in range(2)])
    bias4 = jnp.tile(up_b, 4).reshape(1, c4).astype(jnp.float32)

    th = _pick_tile(h)
    y = pl.pallas_call(
        _up_concat_kernel,
        out_shape=jax.ShapeDtypeStruct((n, h, 2, w, c4), jnp.bfloat16),
        grid=(n, h // th),
        in_specs=[
            pl.BlockSpec((1, th, w, cin), lambda i, t: (i, t, 0, 0)),
            pl.BlockSpec((1, th, w, cin), lambda i, t: (i, t, 0, 0)),
            pl.BlockSpec((2, cin, c4), lambda i, t: (0, 0, 0)),
            pl.BlockSpec((2, cin, c4), lambda i, t: (0, 0, 0)),
            pl.BlockSpec((1, c4), lambda i, t: (0, 0)),
        ],
        out_specs=pl.BlockSpec((1, th, 2, w, c4), lambda i, t: (i, t, 0, 0, 0)),
        compiler_params=pltpu.CompilerParams(
            dimension_semantics=("parallel", "parallel"),
            vmem_limit_bytes=_VMEM_LIMIT),
    )(x1_nhwc.astype(jnp.bfloat16), x2_nhwc.astype(jnp.bfloat16), wa, wb, bias4)

    # Row-major (N, H, 2, W, 2*2*Cout) already equals the pixel-shuffled and
    # channel-concatenated NHWC tensor: this reshape is a zero-copy bitcast.
    return y.reshape(n, 2 * h, 2 * w, 2 * cout)


# ----------------------------------------------------------------------------
# Kernel 2: Conv2d(3x3, padding=1) + folded eval-BatchNorm + ReLU (NHWC).
# Grid = (batch, row tiles).  The vertical halo is fetched as two 1-row views
# of the same input with clamped index_maps and masked to zero at the image
# border; the zero-padded (TH+2, W+2, Cin) tile is assembled in VMEM scratch.
# ----------------------------------------------------------------------------
def _conv3x3_bn_relu_kernel(top_ref, cur_ref, bot_ref, w_ref, scale_ref,
                            shift_ref, o_ref, xpad_ref):
    # top/bot: (1, 1, W, Cin) halo rows; cur: (1, TH, W, Cin) bf16
    # w: (3, 3, Cin, Cout) bf16; scale/shift: (1, Cout) f32 (bias+BN folded)
    # xpad scratch: (TH+2, W+2, Cin) bf16
    _, th, w, cin = cur_ref.shape
    cout = o_ref.shape[-1]
    t = pl.program_id(1)
    nt = pl.num_programs(1)

    # ---- assemble the zero-padded tile in VMEM (in-kernel padding) ----
    zcol = jnp.zeros((th + 2, 1, cin), xpad_ref.dtype)
    xpad_ref[:, 0:1, :] = zcol
    xpad_ref[:, w + 1:w + 2, :] = zcol
    xpad_ref[0:1, 1:w + 1, :] = top_ref[0]
    xpad_ref[th + 1:th + 2, 1:w + 1, :] = bot_ref[0]
    xpad_ref[1:th + 1, 1:w + 1, :] = cur_ref[0]

    zrow = jnp.zeros((1, w, cin), xpad_ref.dtype)

    @pl.when(t == 0)
    def _():  # image top border: halo row is zero padding
        xpad_ref[0:1, 1:w + 1, :] = zrow

    @pl.when(t == nt - 1)
    def _():  # image bottom border
        xpad_ref[th + 1:th + 2, 1:w + 1, :] = zrow

    # ---- 3x3 conv: kw (sublane) shift hoisted -> 3 copies, 9 MXU matmuls ----
    acc = jnp.zeros((th * w, cout), jnp.float32)
    for kw in range(3):
        xkw = xpad_ref[:, kw:kw + w, :]            # (TH+2, W, Cin)
        for kh in range(3):
            xs = xkw[kh:kh + th].reshape(th * w, cin)
            acc = acc + jnp.dot(xs, w_ref[kh, kw],
                                preferred_element_type=jnp.float32)

    y = acc * scale_ref[...] + shift_ref[...]
    o_ref[0] = jnp.maximum(y, 0.0).reshape(th, w, cout).astype(o_ref.dtype)


def conv3x3_bn_relu(x_nhwc, w_oihw, scale, shift, out_dtype=jnp.float32):
    """Conv2d(3x3, pad=1) + folded eval-BN + ReLU, NHWC, row-tiled."""
    n, h, w, cin = x_nhwc.shape
    cout = w_oihw.shape[0]
    w_hwio = jnp.transpose(w_oihw, (2, 3, 1, 0)).astype(jnp.bfloat16)
    scale2 = scale.reshape(1, cout).astype(jnp.float32)
    shift2 = shift.reshape(1, cout).astype(jnp.float32)
    x = x_nhwc.astype(jnp.bfloat16)

    th = _pick_tile(h)
    nt = h // th

    cur_map = lambda i, t: (i, t, 0, 0)
    # 1-row halo views (block size 1 along H => block index == row index),
    # clamped at the borders; the kernel masks the clamped rows to zero.
    top_map = lambda i, t: (i, jnp.maximum(t * th - 1, 0), 0, 0)
    bot_map = lambda i, t: (i, jnp.minimum(t * th + th, h - 1), 0, 0)

    return pl.pallas_call(
        _conv3x3_bn_relu_kernel,
        out_shape=jax.ShapeDtypeStruct((n, h, w, cout), out_dtype),
        grid=(n, nt),
        in_specs=[
            pl.BlockSpec((1, 1, w, cin), top_map),     # halo row above
            pl.BlockSpec((1, th, w, cin), cur_map),    # body rows
            pl.BlockSpec((1, 1, w, cin), bot_map),     # halo row below
            pl.BlockSpec((3, 3, cin, cout), lambda i, t: (0, 0, 0, 0)),
            pl.BlockSpec((1, cout), lambda i, t: (0, 0)),
            pl.BlockSpec((1, cout), lambda i, t: (0, 0)),
        ],
        out_specs=pl.BlockSpec((1, th, w, cout), lambda i, t: (i, t, 0, 0)),
        scratch_shapes=[pltpu.VMEM((th + 2, w + 2, cin), jnp.bfloat16)],
        compiler_params=pltpu.CompilerParams(
            dimension_semantics=("parallel", "parallel"),
            vmem_limit_bytes=_VMEM_LIMIT),
    )(x, x, x, w_hwio, scale2, shift2)


# ----------------------------------------------------------------------------
# Module forward.  NHWC end-to-end; NCHW only at the PyTorch-parity boundary.
# ----------------------------------------------------------------------------
def doublewith2up_forward_nhwc(params, x1_nhwc, x2_nhwc):
    u = up_concat(x1_nhwc, x2_nhwc, params["up_w"], params["up_b"])
    y = conv3x3_bn_relu(u, params["c1_w"], params["c1_scale"],
                        params["c1_shift"], out_dtype=jnp.bfloat16)
    y = conv3x3_bn_relu(y, params["c2_w"], params["c2_scale"],
                        params["c2_shift"], out_dtype=jnp.float32)
    return y


@jax.jit
def doublewith2up_forward(params, x1_nchw, x2_nchw):
    # NCHW boundary kept only for parity with the PyTorch module; in a full
    # NHWC pipeline these two transposes disappear.
    x1 = jnp.transpose(x1_nchw, (0, 2, 3, 1))
    x2 = jnp.transpose(x2_nchw, (0, 2, 3, 1))
    y = doublewith2up_forward_nhwc(params, x1, x2)
    return jnp.transpose(y, (0, 3, 1, 2))


# ----------------------------------------------------------------------------
# Deterministic parameter init (shapes per the PyTorch __init__), with
# eval-mode BatchNorm folded into per-channel scale/shift (absorbing conv bias).
# ----------------------------------------------------------------------------
def init_params(key, in_chan, out_chan, mid_chan=None, eps=1e-5):
    if mid_chan is None:
        mid_chan = in_chan
    ks = jax.random.split(key, 16)

    def uniform(k, shape, fan_in):
        bound = 1.0 / float(fan_in) ** 0.5
        return jax.random.uniform(k, shape, jnp.float32, -bound, bound)

    # ConvTranspose2d(in_chan, out_chan, 2, 2): weight (in, out, 2, 2), bias (out,)
    up_w = uniform(ks[0], (in_chan, out_chan, 2, 2), out_chan * 4)
    up_b = uniform(ks[1], (out_chan,), out_chan * 4)

    def bn_fold(kg, kb, km, kv, conv_bias, c):
        gamma = 1.0 + 0.1 * jax.random.normal(kg, (c,), jnp.float32)
        beta = 0.1 * jax.random.normal(kb, (c,), jnp.float32)
        mean = 0.1 * jax.random.normal(km, (c,), jnp.float32)
        var = 1.0 + 0.5 * jax.random.uniform(kv, (c,), jnp.float32)
        scale = gamma / jnp.sqrt(var + eps)
        shift = (conv_bias - mean) * scale + beta
        return scale, shift

    c1_w = uniform(ks[2], (out_chan, mid_chan, 3, 3), mid_chan * 9)
    c1_b = uniform(ks[3], (out_chan,), mid_chan * 9)
    c1_scale, c1_shift = bn_fold(ks[4], ks[5], ks[6], ks[7], c1_b, out_chan)

    c2_w = uniform(ks[8], (out_chan, out_chan, 3, 3), out_chan * 9)
    c2_b = uniform(ks[9], (out_chan,), out_chan * 9)
    c2_scale, c2_shift = bn_fold(ks[10], ks[11], ks[12], ks[13], c2_b, out_chan)

    return dict(
        up_w=up_w, up_b=up_b,
        c1_w=c1_w, c1_scale=c1_scale, c1_shift=c1_shift,
        c2_w=c2_w, c2_scale=c2_scale, c2_shift=c2_shift,
    )


# ----------------------------------------------------------------------------
# Pure-JAX reference (lax convs) mirroring the kernel's bf16-in / f32-acc math.
# ----------------------------------------------------------------------------
def _q(x):
    """bf16 quantization used at the kernel boundary."""
    return x.astype(jnp.bfloat16).astype(jnp.float32)


def reference_forward(params, x1_nchw, x2_nchw):
    up_w = _q(params["up_w"])

    def upref(x):
        y = jnp.einsum("nihw,iokl->nohkwl", _q(x), up_w)
        n, co, h, _, w, _ = y.shape
        y = y.reshape(n, co, 2 * h, 2 * w)
        return y + params["up_b"][None, :, None, None]

    def convref(x, w, scale, shift):
        y = jax.lax.conv_general_dilated(
            x, _q(w), window_strides=(1, 1), padding=((1, 1), (1, 1)),
            dimension_numbers=("NCHW", "OIHW", "NCHW"))
        y = y * scale[None, :, None, None] + shift[None, :, None, None]
        return jnp.maximum(y, 0.0)

    x = _q(jnp.concatenate([upref(x1_nchw), upref(x2_nchw)], axis=1))
    y = _q(convref(x, params["c1_w"], params["c1_scale"], params["c1_shift"]))
    y = convref(y, params["c2_w"], params["c2_scale"], params["c2_shift"])
    return y


if __name__ == "__main__":
    # concat(up(x1), up(x2)) has 2*out_chan channels, which must equal mid_chan
    # (= in_chan by default), so in_chan = 2 * out_chan.
    N, IN_CHAN, OUT_CHAN, H, W = 2, 8, 4, 8, 8

    key = jax.random.PRNGKey(0)
    kp, k1, k2 = jax.random.split(key, 3)
    params = init_params(kp, IN_CHAN, OUT_CHAN)

    x1 = jax.random.normal(k1, (N, IN_CHAN, H, W), jnp.float32)
    x2 = jax.random.normal(k2, (N, IN_CHAN, H, W), jnp.float32)

    out = doublewith2up_forward(params, x1, x2)
    out = jax.block_until_ready(out)

    ref = reference_forward(params, x1, x2)
    assert out.shape == (N, OUT_CHAN, 2 * H, 2 * W), out.shape
    max_err = float(jnp.max(jnp.abs(out - ref)))
    assert jnp.allclose(out, ref, atol=1e-2, rtol=1e-2), max_err

    print("KERNEL_OK")
</pallas_src>

<mosaic_0001>
module attributes {stable_mosaic.version = 11 : i64} {
  func.func @_up_concat_kernel(%arg0: i32, %arg1: i32, %arg2: memref<1x8x8x8xbf16, #tpu.memory_space<vmem>>, %arg3: memref<1x8x8x8xbf16, #tpu.memory_space<vmem>>, %arg4: memref<2x8x16xbf16, #tpu.memory_space<vmem>>, %arg5: memref<2x8x16xbf16, #tpu.memory_space<vmem>>, %arg6: memref<1x16xf32, #tpu.memory_space<vmem>>, %arg7: memref<1x8x2x8x16xbf16, #tpu.memory_space<vmem>>) attributes {dimension_semantics = [#tpu.dimension_semantics<parallel>, #tpu.dimension_semantics<parallel>], iteration_bounds = array<i64: 2, 1>, scalar_prefetch = 0 : i64, scratch_operands = 0 : i64, tpu.core_type = #tpu.core_type<tc>, window_params = [{transform_indices = @transform_0, window_bounds = array<i64: 1, 8, 8, 8>}, {transform_indices = @transform_1, window_bounds = array<i64: 1, 8, 8, 8>}, {pipeline_mode = #tpu.pipeline_mode<synchronous>, transform_indices = @transform_2, window_bounds = array<i64: 2, 8, 16>}, {pipeline_mode = #tpu.pipeline_mode<synchronous>, transform_indices = @transform_3, window_bounds = array<i64: 2, 8, 16>}, {pipeline_mode = #tpu.pipeline_mode<synchronous>, transform_indices = @transform_4, window_bounds = array<i64: 1, 16>}, {transform_indices = @transform_5, window_bounds = array<i64: 1, 8, 2, 8, 16>}]} {
    %c0 = arith.constant 0 : index
    %c0_0 = arith.constant 0 : index
    %c0_1 = arith.constant 0 : index
    %c0_2 = arith.constant 0 : index
    %0 = vector.load %arg2[%c0, %c0_0, %c0_1, %c0_2] : memref<1x8x8x8xbf16, #tpu.memory_space<vmem>>, vector<1x8x8x8xbf16>
    %1 = vector.shape_cast %0 : vector<1x8x8x8xbf16> to vector<8x8x8xbf16>
    %2 = vector.shape_cast %1 : vector<8x8x8xbf16> to vector<64x8xbf16>
    %c0_3 = arith.constant 0 : index
    %c0_4 = arith.constant 0 : index
    %c0_5 = arith.constant 0 : index
    %c0_6 = arith.constant 0 : index
    %3 = vector.load %arg3[%c0_3, %c0_4, %c0_5, %c0_6] : memref<1x8x8x8xbf16, #tpu.memory_space<vmem>>, vector<1x8x8x8xbf16>
    %4 = vector.shape_cast %3 : vector<1x8x8x8xbf16> to vector<8x8x8xbf16>
    %5 = vector.shape_cast %4 : vector<8x8x8xbf16> to vector<64x8xbf16>
    %c0_7 = arith.constant 0 : index
    %c0_8 = arith.constant 0 : index
    %c0_9 = arith.constant 0 : index
    %6 = vector.load %arg4[%c0_7, %c0_8, %c0_9] : memref<2x8x16xbf16, #tpu.memory_space<vmem>>, vector<1x8x16xbf16>
    %7 = vector.shape_cast %6 : vector<1x8x16xbf16> to vector<8x16xbf16>
    %cst = arith.constant dense<0.000000e+00> : vector<64x16xf32>
    %8 = tpu.matmul %2, %7, %cst {dimension_numbers = #tpu.dot_dimension_numbers<[1], [0], [0], [1], [0, 0, 1, 1], [], []>} : vector<64x8xbf16>, vector<8x16xbf16>, vector<64x16xf32> -> vector<64x16xf32>
    %c0_10 = arith.constant 0 : index
    %c0_11 = arith.constant 0 : index
    %c0_12 = arith.constant 0 : index
    %9 = vector.load %arg5[%c0_10, %c0_11, %c0_12] : memref<2x8x16xbf16, #tpu.memory_space<vmem>>, vector<1x8x16xbf16>
    %10 = vector.shape_cast %9 : vector<1x8x16xbf16> to vector<8x16xbf16>
    %cst_13 = arith.constant dense<0.000000e+00> : vector<64x16xf32>
    %11 = tpu.matmul %5, %10, %cst_13 {dimension_numbers = #tpu.dot_dimension_numbers<[1], [0], [0], [1], [0, 0, 1, 1], [], []>} : vector<64x8xbf16>, vector<8x16xbf16>, vector<64x16xf32> -> vector<64x16xf32>
    %12 = arith.addf %8, %11 : vector<64x16xf32>
    %c0_14 = arith.constant 0 : index
    %c0_15 = arith.constant 0 : index
    %13 = vector.load %arg6[%c0_14, %c0_15] : memref<1x16xf32, #tpu.memory_space<vmem>>, vector<1x16xf32>
    %14 = vector.broadcast %13 : vector<1x16xf32> to vector<64x16xf32>
    %15 = arith.addf %12, %14 : vector<64x16xf32>
    %16 = vector.shape_cast %15 : vector<64x16xf32> to vector<1x8x1x8x16xf32>
    %17 = arith.truncf %16 : vector<1x8x1x8x16xf32> to vector<1x8x1x8x16xbf16>
    %c0_16 = arith.constant 0 : index
    %c0_17 = arith.constant 0 : index
    %c0_18 = arith.constant 0 : index
    %c0_19 = arith.constant 0 : index
    %c0_20 = arith.constant 0 : index
    %18 = vector.load %arg7[%c0_16, %c0_17, %c0_18, %c0_19, %c0_20] : memref<1x8x2x8x16xbf16, #tpu.memory_space<vmem>>, vector<1x8x1x8x16xbf16>
    tpu.vector_store %arg7[%c0_16, %c0_17, %c0_18, %c0_19, %c0_20], %17 {strides = array<i32>} : memref<1x8x2x8x16xbf16, #tpu.memory_space<vmem>>, vector<1x8x1x8x16xbf16>,
    %c1 = arith.constant 1 : index
    %c0_21 = arith.constant 0 : index
    %c0_22 = arith.constant 0 : index
    %19 = vector.load %arg4[%c1, %c0_21, %c0_22] : memref<2x8x16xbf16, #tpu.memory_space<vmem>>, vector<1x8x16xbf16>
    %20 = vector.shape_cast %19 : vector<1x8x16xbf16> to vector<8x16xbf16>
    %cst_23 = arith.constant dense<0.000000e+00> : vector<64x16xf32>
    %21 = tpu.matmul %2, %20, %cst_23 {dimension_numbers = #tpu.dot_dimension_numbers<[1], [0], [0], [1], [0, 0, 1, 1], [], []>} : vector<64x8xbf16>, vector<8x16xbf16>, vector<64x16xf32> -> vector<64x16xf32>
    %c1_24 = arith.constant 1 : index
    %c0_25 = arith.constant 0 : index
    %c0_26 = arith.constant 0 : index
    %22 = vector.load %arg5[%c1_24, %c0_25, %c0_26] : memref<2x8x16xbf16, #tpu.memory_space<vmem>>, vector<1x8x16xbf16>
    %23 = vector.shape_cast %22 : vector<1x8x16xbf16> to vector<8x16xbf16>
    %cst_27 = arith.constant dense<0.000000e+00> : vector<64x16xf32>
    %24 = tpu.matmul %5, %23, %cst_27 {dimension_numbers = #tpu.dot_dimension_numbers<[1], [0], [0], [1], [0, 0, 1, 1], [], []>} : vector<64x8xbf16>, vector<8x16xbf16>, vector<64x16xf32> -> vector<64x16xf32>
    %25 = arith.addf %21, %24 : vector<64x16xf32>
    %c0_28 = arith.constant 0 : index
    %c0_29 = arith.constant 0 : index
    %26 = vector.load %arg6[%c0_28, %c0_29] : memref<1x16xf32, #tpu.memory_space<vmem>>, vector<1x16xf32>
    %27 = vector.broadcast %26 : vector<1x16xf32> to vector<64x16xf32>
    %28 = arith.addf %25, %27 : vector<64x16xf32>
    %29 = vector.shape_cast %28 : vector<64x16xf32> to vector<1x8x1x8x16xf32>
    %30 = arith.truncf %29 : vector<1x8x1x8x16xf32> to vector<1x8x1x8x16xbf16>
    %c0_30 = arith.constant 0 : index
    %c0_31 = arith.constant 0 : index
    %c1_32 = arith.constant 1 : index
    %c0_33 = arith.constant 0 : index
    %c0_34 = arith.constant 0 : index
    %31 = vector.load %arg7[%c0_30, %c0_31, %c1_32, %c0_33, %c0_34] : memref<1x8x2x8x16xbf16, #tpu.memory_space<vmem>>, vector<1x8x1x8x16xbf16>
    tpu.vector_store %arg7[%c0_30, %c0_31, %c1_32, %c0_33, %c0_34], %30 {strides = array<i32>} : memref<1x8x2x8x16xbf16, #tpu.memory_space<vmem>>, vector<1x8x1x8x16xbf16>,
    return
  }
  func.func @transform_0(%arg0: i32, %arg1: i32) -> (i32, i32, i32, i32) {
    %c0_i32 = arith.constant 0 : i32
    %c0_i32_0 = arith.constant 0 : i32
    %c0_i32_1 = arith.constant 0 : i32
    return %arg0, %arg1, %c0_i32, %c0_i32_0 : i32, i32, i32, i32
  }
  func.func @transform_1(%arg0: i32, %arg1: i32) -> (i32, i32, i32, i32) {
    %c0_i32 = arith.constant 0 : i32
    %c0_i32_0 = arith.constant 0 : i32
    %c0_i32_1 = arith.constant 0 : i32
    return %arg0, %arg1, %c0_i32, %c0_i32_0 : i32, i32, i32, i32
  }
  func.func @transform_2(%arg0: i32, %arg1: i32) -> (i32, i32, i32) {
    %c0_i32 = arith.constant 0 : i32
    %c0_i32_0 = arith.constant 0 : i32
    %c0_i32_1 = arith.constant 0 : i32
    %c0_i32_2 = arith.constant 0 : i32
    return %c0_i32, %c0_i32_0, %c0_i32_1 : i32, i32, i32
  }
  func.func @transform_3(%arg0: i32, %arg1: i32) -> (i32, i32, i32) {
    %c0_i32 = arith.constant 0 : i32
    %c0_i32_0 = arith.constant 0 : i32
    %c0_i32_1 = arith.constant 0 : i32
    %c0_i32_2 = arith.constant 0 : i32
    return %c0_i32, %c0_i32_0, %c0_i32_1 : i32, i32, i32
  }
  func.func @transform_4(%arg0: i32, %arg1: i32) -> (i32, i32) {
    %c0_i32 = arith.constant 0 : i32
    %c0_i32_0 = arith.constant 0 : i32
    %c0_i32_1 = arith.constant 0 : i32
    return %c0_i32, %c0_i32_0 : i32, i32
  }
  func.func @transform_5(%arg0: i32, %arg1: i32) -> (i32, i32, i32, i32, i32) {
    %c0_i32 = arith.constant 0 : i32
    %c0_i32_0 = arith.constant 0 : i32
    %c0_i32_1 = arith.constant 0 : i32
    %c0_i32_2 = arith.constant 0 : i32
    return %arg0, %arg1, %c0_i32, %c0_i32_0, %c0_i32_1 : i32, i32, i32, i32, i32
  }
}

module attributes {stable_mosaic.version = 11 : i64} {
  func.func @_conv3x3_bn_relu_kernel(%arg0: i32, %arg1: i32, %arg2: memref<1x1x16x4xbf16, #tpu.memory_space<vmem>>, %arg3: memref<1x8x16x4xbf16, #tpu.memory_space<vmem>>, %arg4: memref<1x1x16x4xbf16, #tpu.memory_space<vmem>>, %arg5: memref<3x3x4x4xbf16, #tpu.memory_space<vmem>>, %arg6: memref<1x4xf32, #tpu.memory_space<vmem>>, %arg7: memref<1x4xf32, #tpu.memory_space<vmem>>, %arg8: memref<1x8x16x4xf32, #tpu.memory_space<vmem>>, %arg9: memref<10x18x4xbf16, #tpu.memory_space<vmem>>) attributes {dimension_semantics = [#tpu.dimension_semantics<parallel>, #tpu.dimension_semantics<parallel>], iteration_bounds = array<i64: 2, 2>, scalar_prefetch = 0 : i64, scratch_operands = 1 : i64, tpu.core_type = #tpu.core_type<tc>, window_params = [{transform_indices = @transform_0, window_bounds = array<i64: 1, 1, 16, 4>}, {transform_indices = @transform_1, window_bounds = array<i64: 1, 8, 16, 4>}, {transform_indices = @transform_2, window_bounds = array<i64: 1, 1, 16, 4>}, {pipeline_mode = #tpu.pipeline_mode<synchronous>, transform_indices = @transform_3, window_bounds = array<i64: 3, 3, 4, 4>}, {pipeline_mode = #tpu.pipeline_mode<synchronous>, transform_indices = @transform_4, window_bounds = array<i64: 1, 4>}, {pipeline_mode = #tpu.pipeline_mode<synchronous>, transform_indices = @transform_5, window_bounds = array<i64: 1, 4>}, {transform_indices = @transform_6, window_bounds = array<i64: 1, 8, 16, 4>}]} {
    %cst = arith.constant 0.000000e+00 : bf16
    %0 = vector.broadcast %cst : bf16 to vector<10x1x4xbf16>
    %c0 = arith.constant 0 : index
    %c0_0 = arith.constant 0 : index
    %c0_1 = arith.constant 0 : index
    %1 = vector.load %arg9[%c0, %c0_0, %c0_1] : memref<10x18x4xbf16, #tpu.memory_space<vmem>>, vector<10x1x4xbf16>
    tpu.vector_store %arg9[%c0, %c0_0, %c0_1], %0 {strides = array<i32>} : memref<10x18x4xbf16, #tpu.memory_space<vmem>>, vector<10x1x4xbf16>,
    %c0_2 = arith.constant 0 : index
    %c17 = arith.constant 17 : index
    %c0_3 = arith.constant 0 : index
    %2 = vector.load %arg9[%c0_2, %c17, %c0_3] : memref<10x18x4xbf16, #tpu.memory_space<vmem>>, vector<10x1x4xbf16>
    tpu.vector_store %arg9[%c0_2, %c17, %c0_3], %0 {strides = array<i32>} : memref<10x18x4xbf16, #tpu.memory_space<vmem>>, vector<10x1x4xbf16>,
    %c0_4 = arith.constant 0 : index
    %c0_5 = arith.constant 0 : index
    %c0_6 = arith.constant 0 : index
    %c0_7 = arith.constant 0 : index
    %3 = vector.load %arg2[%c0_4, %c0_5, %c0_6, %c0_7] : memref<1x1x16x4xbf16, #tpu.memory_space<vmem>>, vector<1x1x16x4xbf16>
    %4 = vector.shape_cast %3 : vector<1x1x16x4xbf16> to vector<1x16x4xbf16>
    %c0_8 = arith.constant 0 : index
    %c1 = arith.constant 1 : index
    %c0_9 = arith.constant 0 : index
    %5 = vector.load %arg9[%c0_8, %c1, %c0_9] : memref<10x18x4xbf16, #tpu.memory_space<vmem>>, vector<1x16x4xbf16>
    tpu.vector_store %arg9[%c0_8, %c1, %c0_9], %4 {strides = array<i32>} : memref<10x18x4xbf16, #tpu.memory_space<vmem>>, vector<1x16x4xbf16>,
    %c0_10 = arith.constant 0 : index
    %c0_11 = arith.constant 0 : index
    %c0_12 = arith.constant 0 : index
    %c0_13 = arith.constant 0 : index
    %6 = vector.load %arg4[%c0_10, %c0_11, %c0_12, %c0_13] : memref<1x1x16x4xbf16, #tpu.memory_space<vmem>>, vector<1x1x16x4xbf16>
    %7 = vector.shape_cast %6 : vector<1x1x16x4xbf16> to vector<1x16x4xbf16>
    %c9 = arith.constant 9 : index
    %c1_14 = arith.constant 1 : index
    %c0_15 = arith.constant 0 : index
    %8 = vector.load %arg9[%c9, %c1_14, %c0_15] : memref<10x18x4xbf16, #tpu.memory_space<vmem>>, vector<1x16x4xbf16>
    tpu.vector_store %arg9[%c9, %c1_14, %c0_15], %7 {strides = array<i32>} : memref<10x18x4xbf16, #tpu.memory_space<vmem>>, vector<1x16x4xbf16>,
    %c0_16 = arith.constant 0 : index
    %c0_17 = arith.constant 0 : index
    %c0_18 = arith.constant 0 : index
    %c0_19 = arith.constant 0 : index
    %9 = vector.load %arg3[%c0_16, %c0_17, %c0_18, %c0_19] : memref<1x8x16x4xbf16, #tpu.memory_space<vmem>>, vector<1x8x16x4xbf16>
    %10 = vector.shape_cast %9 : vector<1x8x16x4xbf16> to vector<8x16x4xbf16>
    %c1_20 = arith.constant 1 : index
    %c1_21 = arith.constant 1 : index
    %c0_22 = arith.constant 0 : index
    %11 = vector.load %arg9[%c1_20, %c1_21, %c0_22] : memref<10x18x4xbf16, #tpu.memory_space<vmem>>, vector<8x16x4xbf16>
    tpu.vector_store %arg9[%c1_20, %c1_21, %c0_22], %10 {strides = array<i32>} : memref<10x18x4xbf16, #tpu.memory_space<vmem>>, vector<8x16x4xbf16>,
    %cst_23 = arith.constant 0.000000e+00 : bf16
    %12 = vector.broadcast %cst_23 : bf16 to vector<1x16x4xbf16>
    %c0_i32 = arith.constant 0 : i32
    %13 = arith.cmpi eq, %arg1, %c0_i32 : i32
    %14 = arith.extui %13 : i1 to i32
    %c0_i32_24 = arith.constant 0 : i32
    %15 = arith.cmpi ne, %14, %c0_i32_24 : i32
    scf.if %15 {
      %c0_89 = arith.constant 0 : index
      %c1_90 = arith.constant 1 : index
      %c0_91 = arith.constant 0 : index
      %89 = vector.load %arg9[%c0_89, %c1_90, %c0_91] : memref<10x18x4xbf16, #tpu.memory_space<vmem>>, vector<1x16x4xbf16>
      tpu.vector_store %arg9[%c0_89, %c1_90, %c0_91], %12 {strides = array<i32>} : memref<10x18x4xbf16, #tpu.memory_space<vmem>>, vector<1x16x4xbf16>,
    } else {
    }
    %c1_i32 = arith.constant 1 : i32
    %16 = arith.cmpi eq, %arg1, %c1_i32 : i32
    %17 = arith.extui %16 : i1 to i32
    %c0_i32_25 = arith.constant 0 : i32
    %18 = arith.cmpi ne, %17, %c0_i32_25 : i32
    scf.if %18 {
      %c9_89 = arith.constant 9 : index
      %c1_90 = arith.constant 1 : index
      %c0_91 = arith.constant 0 : index
      %89 = vector.load %arg9[%c9_89, %c1_90, %c0_91] : memref<10x18x4xbf16, #tpu.memory_space<vmem>>, vector<1x16x4xbf16>
      tpu.vector_store %arg9[%c9_89, %c1_90, %c0_91], %12 {strides = array<i32>} : memref<10x18x4xbf16, #tpu.memory_space<vmem>>, vector<1x16x4xbf16>,
    } else {
    }
    %cst_26 = arith.constant 0.000000e+00 : f32
    %19 = vector.broadcast %cst_26 : f32 to vector<128x4xf32>
    %c0_27 = arith.constant 0 : index
    %c0_28 = arith.constant 0 : index
    %c0_29 = arith.constant 0 : index
    %20 = vector.load %arg9[%c0_27, %c0_28, %c0_29] : memref<10x18x4xbf16, #tpu.memory_space<vmem>>, vector<10x16x4xbf16>
    %21 = vector.extract_strided_slice %20 {offsets = [0, 0, 0], sizes = [8, 16, 4], strides = [1, 1, 1]} : vector<10x16x4xbf16> to vector<8x16x4xbf16>
    %22 = vector.shape_cast %21 : vector<8x16x4xbf16> to vector<128x4xbf16>
    %c0_30 = arith.constant 0 : index
    %c0_31 = arith.constant 0 : index
    %c0_32 = arith.constant 0 : index
    %c0_33 = arith.constant 0 : index
    %23 = vector.load %arg5[%c0_30, %c0_31, %c0_32, %c0_33] : memref<3x3x4x4xbf16, #tpu.memory_space<vmem>>, vector<1x1x4x4xbf16>
    %24 = vector.shape_cast %23 : vector<1x1x4x4xbf16> to vector<4x4xbf16>
    %cst_34 = arith.constant dense<0.000000e+00> : vector<128x4xf32>
    %25 = tpu.matmul %22, %24, %cst_34 {dimension_numbers = #tpu.dot_dimension_numbers<[1], [0], [0], [1], [0, 0, 1, 1], [], []>} : vector<128x4xbf16>, vector<4x4xbf16>, vector<128x4xf32> -> vector<128x4xf32>
    %26 = arith.addf %19, %25 : vector<128x4xf32>
    %27 = vector.extract_strided_slice %20 {offsets = [1, 0, 0], sizes = [8, 16, 4], strides = [1, 1, 1]} : vector<10x16x4xbf16> to vector<8x16x4xbf16>
    %28 = vector.shape_cast %27 : vector<8x16x4xbf16> to vector<128x4xbf16>
    %c1_35 = arith.constant 1 : index
    %c0_36 = arith.constant 0 : index
    %c0_37 = arith.constant 0 : index
    %c0_38 = arith.constant 0 : index
    %29 = vector.load %arg5[%c1_35, %c0_36, %c0_37, %c0_38] : memref<3x3x4x4xbf16, #tpu.memory_space<vmem>>, vector<1x1x4x4xbf16>
    %30 = vector.shape_cast %29 : vector<1x1x4x4xbf16> to vector<4x4xbf16>
    %cst_39 = arith.constant dense<0.000000e+00> : vector<128x4xf32>
    %31 = tpu.matmul %28, %30, %cst_39 {dimension_numbers = #tpu.dot_dimension_numbers<[1], [0], [0], [1], [0, 0, 1, 1], [], []>} : vector<128x4xbf16>, vector<4x4xbf16>, vector<128x4xf32> -> vector<128x4xf32>
    %32 = arith.addf %26, %31 : vector<128x4xf32>
    %33 = vector.extract_strided_slice %20 {offsets = [2, 0, 0], sizes = [8, 16, 4], strides = [1, 1, 1]} : vector<10x16x4xbf16> to vector<8x16x4xbf16>
    %34 = vector.shape_cast %33 : vector<8x16x4xbf16> to vector<128x4xbf16>
    %c2 = arith.constant 2 : index
    %c0_40 = arith.constant 0 : index
    %c0_41 = arith.constant 0 : index
    %c0_42 = arith.constant 0 : index
    %35 = vector.load %arg5[%c2, %c0_40, %c0_41, %c0_42] : memref<3x3x4x4xbf16, #tpu.memory_space<vmem>>, vector<1x1x4x4xbf16>
    %36 = vector.shape_cast %35 : vector<1x1x4x4xbf16> to vector<4x4xbf16>
    %cst_43 = arith.constant dense<0.000000e+00> : vector<128x4xf32>
    %37 = tpu.matmul %34, %36, %cst_43 {dimension_numbers = #tpu.dot_dimension_numbers<[1], [0], [0], [1], [0, 0, 1, 1], [], []>} : vector<128x4xbf16>, vector<4x4xbf16>, vector<128x4xf32> -> vector<128x4xf32>
    %38 = arith.addf %32, %37 : vector<128x4xf32>
    %c0_44 = arith.constant 0 : index
    %c1_45 = arith.constant 1 : index
    %c0_46 = arith.constant 0 : index
    %39 = vector.load %arg9[%c0_44, %c1_45, %c0_46] : memref<10x18x4xbf16, #tpu.memory_space<vmem>>, vector<10x16x4xbf16>
    %40 = vector.extract_strided_slice %39 {offsets = [0, 0, 0], sizes = [8, 16, 4], strides = [1, 1, 1]} : vector<10x16x4xbf16> to vector<8x16x4xbf16>
    %41 = vector.shape_cast %40 : vector<8x16x4xbf16> to vector<128x4xbf16>
    %c0_47 = arith.constant 0 : index
    %c1_48 = arith.constant 1 : index
    %c0_49 = arith.constant 0 : index
    %c0_50 = arith.constant 0 : index
    %42 = vector.load %arg5[%c0_47, %c1_48, %c0_49, %c0_50] : memref<3x3x4x4xbf16, #tpu.memory_space<vmem>>, vector<1x1x4x4xbf16>
    %43 = vector.shape_cast %42 : vector<1x1x4x4xbf16> to vector<4x4xbf16>
    %cst_51 = arith.constant dense<0.000000e+00> : vector<128x4xf32>
    %44 = tpu.matmul %41, %43, %cst_51 {dimension_numbers = #tpu.dot_dimension_numbers<[1], [0], [0], [1], [0, 0, 1, 1], [], []>} : vector<128x4xbf16>, vector<4x4xbf16>, vector<128x4xf32> -> vector<128x4xf32>
    %45 = arith.addf %38, %44 : vector<128x4xf32>
    %46 = vector.extract_strided_slice %39 {offsets = [1, 0, 0], sizes = [8, 16, 4], strides = [1, 1, 1]} : vector<10x16x4xbf16> to vector<8x16x4xbf16>
    %47 = vector.shape_cast %46 : vector<8x16x4xbf16> to vector<128x4xbf16>
    %c1_52 = arith.constant 1 : index
    %c1_53 = arith.constant 1 : index
    %c0_54 = arith.constant 0 : index
    %c0_55 = arith.constant 0 : index
    %48 = vector.load %arg5[%c1_52, %c1_53, %c0_54, %c0_55] : memref<3x3x4x4xbf16, #tpu.memory_space<vmem>>, vector<1x1x4x4xbf16>
    %49 = vector.shape_cast %48 : vector<1x1x4x4xbf16> to vector<4x4xbf16>
    %cst_56 = arith.constant dense<0.000000e+00> : vector<128x4xf32>
    %50 = tpu.matmul %47, %49, %cst_56 {dimension_numbers = #tpu.dot_dimension_numbers<[1], [0], [0], [1], [0, 0, 1, 1], [], []>} : vector<128x4xbf16>, vector<4x4xbf16>, vector<128x4xf32> -> vector<128x4xf32>
    %51 = arith.addf %45, %50 : vector<128x4xf32>
    %52 = vector.extract_strided_slice %39 {offsets = [2, 0, 0], sizes = [8, 16, 4], strides = [1, 1, 1]} : vector<10x16x4xbf16> to vector<8x16x4xbf16>
    %53 = vector.shape_cast %52 : vector<8x16x4xbf16> to vector<128x4xbf16>
    %c2_57 = arith.constant 2 : index
    %c1_58 = arith.constant 1 : index
    %c0_59 = arith.constant 0 : index
    %c0_60 = arith.constant 0 : index
    %54 = vector.load %arg5[%c2_57, %c1_58, %c0_59, %c0_60] : memref<3x3x4x4xbf16, #tpu.memory_space<vmem>>, vector<1x1x4x4xbf16>
    %55 = vector.shape_cast %54 : vector<1x1x4x4xbf16> to vector<4x4xbf16>
    %cst_61 = arith.constant dense<0.000000e+00> : vector<128x4xf32>
    %56 = tpu.matmul %53, %55, %cst_61 {dimension_numbers = #tpu.dot_dimension_numbers<[1], [0], [0], [1], [0, 0, 1, 1], [], []>} : vector<128x4xbf16>, vector<4x4xbf16>, vector<128x4xf32> -> vector<128x4xf32>
    %57 = arith.addf %51, %56 : vector<128x4xf32>
    %c0_62 = arith.constant 0 : index
    %c2_63 = arith.constant 2 : index
    %c0_64 = arith.constant 0 : index
    %58 = vector.load %arg9[%c0_62, %c2_63, %c0_64] : memref<10x18x4xbf16, #tpu.memory_space<vmem>>, vector<10x16x4xbf16>
    %59 = vector.extract_strided_slice %58 {offsets = [0, 0, 0], sizes = [8, 16, 4], strides = [1, 1, 1]} : vector<10x16x4xbf16> to vector<8x16x4xbf16>
    %60 = vector.shape_cast %59 : vector<8x16x4xbf16> to vector<128x4xbf16>
    %c0_65 = arith.constant 0 : index
    %c2_66 = arith.constant 2 : index
    %c0_67 = arith.constant 0 : index
    %c0_68 = arith.constant 0 : index
    %61 = vector.load %arg5[%c0_65, %c2_66, %c0_67, %c0_68] : memref<3x3x4x4xbf16, #tpu.memory_space<vmem>>, vector<1x1x4x4xbf16>
    %62 = vector.shape_cast %61 : vector<1x1x4x4xbf16> to vector<4x4xbf16>
    %cst_69 = arith.constant dense<0.000000e+00> : vector<128x4xf32>
    %63 = tpu.matmul %60, %62, %cst_69 {dimension_numbers = #tpu.dot_dimension_numbers<[1], [0], [0], [1], [0, 0, 1, 1], [], []>} : vector<128x4xbf16>, vector<4x4xbf16>, vector<128x4xf32> -> vector<128x4xf32>
    %64 = arith.addf %57, %63 : vector<128x4xf32>
    %65 = vector.extract_strided_slice %58 {offsets = [1, 0, 0], sizes = [8, 16, 4], strides = [1, 1, 1]} : vector<10x16x4xbf16> to vector<8x16x4xbf16>
    %66 = vector.shape_cast %65 : vector<8x16x4xbf16> to vector<128x4xbf16>
    %c1_70 = arith.constant 1 : index
    %c2_71 = arith.constant 2 : index
    %c0_72 = arith.constant 0 : index
    %c0_73 = arith.constant 0 : index
    %67 = vector.load %arg5[%c1_70, %c2_71, %c0_72, %c0_73] : memref<3x3x4x4xbf16, #tpu.memory_space<vmem>>, vector<1x1x4x4xbf16>
    %68 = vector.shape_cast %67 : vector<1x1x4x4xbf16> to vector<4x4xbf16>
    %cst_74 = arith.constant dense<0.000000e+00> : vector<128x4xf32>
    %69 = tpu.matmul %66, %68, %cst_74 {dimension_numbers = #tpu.dot_dimension_numbers<[1], [0], [0], [1], [0, 0, 1, 1], [], []>} : vector<128x4xbf16>, vector<4x4xbf16>, vector<128x4xf32> -> vector<128x4xf32>
    %70 = arith.addf %64, %69 : vector<128x4xf32>
    %71 = vector.extract_strided_slice %58 {offsets = [2, 0, 0], sizes = [8, 16, 4], strides = [1, 1, 1]} : vector<10x16x4xbf16> to vector<8x16x4xbf16>
    %72 = vector.shape_cast %71 : vector<8x16x4xbf16> to vector<128x4xbf16>
    %c2_75 = arith.constant 2 : index
    %c2_76 = arith.constant 2 : index
    %c0_77 = arith.constant 0 : index
    %c0_78 = arith.constant 0 : index
    %73 = vector.load %arg5[%c2_75, %c2_76, %c0_77, %c0_78] : memref<3x3x4x4xbf16, #tpu.memory_space<vmem>>, vector<1x1x4x4xbf16>
    %74 = vector.shape_cast %73 : vector<1x1x4x4xbf16> to vector<4x4xbf16>
    %cst_79 = arith.constant dense<0.000000e+00> : vector<128x4xf32>
    %75 = tpu.matmul %72, %74, %cst_79 {dimension_numbers = #tpu.dot_dimension_numbers<[1], [0], [0], [1], [0, 0, 1, 1], [], []>} : vector<128x4xbf16>, vector<4x4xbf16>, vector<128x4xf32> -> vector<128x4xf32>
    %76 = arith.addf %70, %75 : vector<128x4xf32>
    %c0_80 = arith.constant 0 : index
    %c0_81 = arith.constant 0 : index
    %77 = vector.load %arg6[%c0_80, %c0_81] : memref<1x4xf32, #tpu.memory_space<vmem>>, vector<1x4xf32>
    %78 = vector.broadcast %77 : vector<1x4xf32> to vector<128x4xf32>
    %79 = arith.mulf %76, %78 : vector<128x4xf32>
    %c0_82 = arith.constant 0 : index
    %c0_83 = arith.constant 0 : index
    %80 = vector.load %arg7[%c0_82, %c0_83] : memref<1x4xf32, #tpu.memory_space<vmem>>, vector<1x4xf32>
    %81 = vector.broadcast %80 : vector<1x4xf32> to vector<128x4xf32>
    %82 = arith.addf %79, %81 : vector<128x4xf32>
    %cst_84 = arith.constant 0.000000e+00 : f32
    %83 = vector.broadcast %cst_84 : f32 to vector<128x4xf32>
    %84 = arith.maximumf %82, %83 : vector<128x4xf32>
    %85 = vector.shape_cast %84 : vector<128x4xf32> to vector<8x16x4xf32>
    %c0_85 = arith.constant 0 : index
    %c0_86 = arith.constant 0 : index
    %c0_87 = arith.constant 0 : index
    %c0_88 = arith.constant 0 : index
    %86 = vector.load %arg8[%c0_85, %c0_86, %c0_87, %c0_88] : memref<1x8x16x4xf32, #tpu.memory_space<vmem>>, vector<1x8x16x4xf32>
    %87 = vector.shape_cast %86 : vector<1x8x16x4xf32> to vector<8x16x4xf32>
    %88 = vector.shape_cast %85 : vector<8x16x4xf32> to vector<1x8x16x4xf32>
    tpu.vector_store %arg8[%c0_85, %c0_86, %c0_87, %c0_88], %88 {strides = array<i32>} : memref<1x8x16x4xf32, #tpu.memory_space<vmem>>, vector<1x8x16x4xf32>,
    return
  }
  func.func @transform_0(%arg0: i32, %arg1: i32) -> (i32, i32, i32, i32) {
    %c8_i32 = arith.constant 8 : i32
    %0 = arith.muli %arg1, %c8_i32 : i32
    %c1_i32 = arith.constant 1 : i32
    %1 = arith.subi %0, %c1_i32 : i32
    %c0_i32 = arith.constant 0 : i32
    %2 = arith.maxsi %1, %c0_i32 : i32
    %c0_i32_0 = arith.constant 0 : i32
    %c0_i32_1 = arith.constant 0 : i32
    %c0_i32_2 = arith.constant 0 : i32
    return %arg0, %2, %c0_i32_0, %c0_i32_1 : i32, i32, i32, i32
  }
  func.func @transform_1(%arg0: i32, %arg1: i32) -> (i32, i32, i32, i32) {
    %c0_i32 = arith.constant 0 : i32
    %c0_i32_0 = arith.constant 0 : i32
    %c0_i32_1 = arith.constant 0 : i32
    return %arg0, %arg1, %c0_i32, %c0_i32_0 : i32, i32, i32, i32
  }
  func.func @transform_2(%arg0: i32, %arg1: i32) -> (i32, i32, i32, i32) {
    %c8_i32 = arith.constant 8 : i32
    %0 = arith.muli %arg1, %c8_i32 : i32
    %c8_i32_0 = arith.constant 8 : i32
    %1 = arith.addi %0, %c8_i32_0 : i32
    %c15_i32 = arith.constant 15 : i32
    %2 = arith.minsi %1, %c15_i32 : i32
    %c0_i32 = arith.constant 0 : i32
    %c0_i32_1 = arith.constant 0 : i32
    %c0_i32_2 = arith.constant 0 : i32
    return %arg0, %2, %c0_i32, %c0_i32_1 : i32, i32, i32, i32
  }
  func.func @transform_3(%arg0: i32, %arg1: i32) -> (i32, i32, i32, i32) {
    %c0_i32 = arith.constant 0 : i32
    %c0_i32_0 = arith.constant 0 : i32
    %c0_i32_1 = arith.constant 0 : i32
    %c0_i32_2 = arith.constant 0 : i32
    %c0_i32_3 = arith.constant 0 : i32
    return %c0_i32, %c0_i32_0, %c0_i32_1, %c0_i32_2 : i32, i32, i32, i32
  }
  func.func @transform_4(%arg0: i32, %arg1: i32) -> (i32, i32) {
    %c0_i32 = arith.constant 0 : i32
    %c0_i32_0 = arith.constant 0 : i32
    %c0_i32_1 = arith.constant 0 : i32
    return %c0_i32, %c0_i32_0 : i32, i32
  }
  func.func @transform_5(%arg0: i32, %arg1: i32) -> (i32, i32) {
    %c0_i32 = arith.constant 0 : i32
    %c0_i32_0 = arith.constant 0 : i32
    %c0_i32_1 = arith.constant 0 : i32
    return %c0_i32, %c0_i32_0 : i32, i32
  }
  func.func @transform_6(%arg0: i32, %arg1: i32) -> (i32, i32, i32, i32) {
    %c0_i32 = arith.constant 0 : i32
    %c0_i32_0 = arith.constant 0 : i32
    %c0_i32_1 = arith.constant 0 : i32
    return %arg0, %arg1, %c0_i32, %c0_i32_0 : i32, i32, i32, i32
  }
}

module attributes {stable_mosaic.version = 11 : i64} {
  func.func @_conv3x3_bn_relu_kernel(%arg0: i32, %arg1: i32, %arg2: memref<1x1x16x8xbf16, #tpu.memory_space<vmem>>, %arg3: memref<1x8x16x8xbf16, #tpu.memory_space<vmem>>, %arg4: memref<1x1x16x8xbf16, #tpu.memory_space<vmem>>, %arg5: memref<3x3x8x4xbf16, #tpu.memory_space<vmem>>, %arg6: memref<1x4xf32, #tpu.memory_space<vmem>>, %arg7: memref<1x4xf32, #tpu.memory_space<vmem>>, %arg8: memref<1x8x16x4xbf16, #tpu.memory_space<vmem>>, %arg9: memref<10x18x8xbf16, #tpu.memory_space<vmem>>) attributes {dimension_semantics = [#tpu.dimension_semantics<parallel>, #tpu.dimension_semantics<parallel>], iteration_bounds = array<i64: 2, 2>, scalar_prefetch = 0 : i64, scratch_operands = 1 : i64, tpu.core_type = #tpu.core_type<tc>, window_params = [{transform_indices = @transform_0, window_bounds = array<i64: 1, 1, 16, 8>}, {transform_indices = @transform_1, window_bounds = array<i64: 1, 8, 16, 8>}, {transform_indices = @transform_2, window_bounds = array<i64: 1, 1, 16, 8>}, {pipeline_mode = #tpu.pipeline_mode<synchronous>, transform_indices = @transform_3, window_bounds = array<i64: 3, 3, 8, 4>}, {pipeline_mode = #tpu.pipeline_mode<synchronous>, transform_indices = @transform_4, window_bounds = array<i64: 1, 4>}, {pipeline_mode = #tpu.pipeline_mode<synchronous>, transform_indices = @transform_5, window_bounds = array<i64: 1, 4>}, {transform_indices = @transform_6, window_bounds = array<i64: 1, 8, 16, 4>}]} {
    %cst = arith.constant 0.000000e+00 : bf16
    %0 = vector.broadcast %cst : bf16 to vector<10x1x8xbf16>
    %c0 = arith.constant 0 : index
    %c0_0 = arith.constant 0 : index
    %c0_1 = arith.constant 0 : index
    %1 = vector.load %arg9[%c0, %c0_0, %c0_1] : memref<10x18x8xbf16, #tpu.memory_space<vmem>>, vector<10x1x8xbf16>
    tpu.vector_store %arg9[%c0, %c0_0, %c0_1], %0 {strides = array<i32>} : memref<10x18x8xbf16, #tpu.memory_space<vmem>>, vector<10x1x8xbf16>,
    %c0_2 = arith.constant 0 : index
    %c17 = arith.constant 17 : index
    %c0_3 = arith.constant 0 : index
    %2 = vector.load %arg9[%c0_2, %c17, %c0_3] : memref<10x18x8xbf16, #tpu.memory_space<vmem>>, vector<10x1x8xbf16>
    tpu.vector_store %arg9[%c0_2, %c17, %c0_3], %0 {strides = array<i32>} : memref<10x18x8xbf16, #tpu.memory_space<vmem>>, vector<10x1x8xbf16>,
    %c0_4 = arith.constant 0 : index
    %c0_5 = arith.constant 0 : index
    %c0_6 = arith.constant 0 : index
    %c0_7 = arith.constant 0 : index
    %3 = vector.load %arg2[%c0_4, %c0_5, %c0_6, %c0_7] : memref<1x1x16x8xbf16, #tpu.memory_space<vmem>>, vector<1x1x16x8xbf16>
    %4 = vector.shape_cast %3 : vector<1x1x16x8xbf16> to vector<1x16x8xbf16>
    %c0_8 = arith.constant 0 : index
    %c1 = arith.constant 1 : index
    %c0_9 = arith.constant 0 : index
    %5 = vector.load %arg9[%c0_8, %c1, %c0_9] : memref<10x18x8xbf16, #tpu.memory_space<vmem>>, vector<1x16x8xbf16>
    tpu.vector_store %arg9[%c0_8, %c1, %c0_9], %4 {strides = array<i32>} : memref<10x18x8xbf16, #tpu.memory_space<vmem>>, vector<1x16x8xbf16>,
    %c0_10 = arith.constant 0 : index
    %c0_11 = arith.constant 0 : index
    %c0_12 = arith.constant 0 : index
    %c0_13 = arith.constant 0 : index
    %6 = vector.load %arg4[%c0_10, %c0_11, %c0_12, %c0_13] : memref<1x1x16x8xbf16, #tpu.memory_space<vmem>>, vector<1x1x16x8xbf16>
    %7 = vector.shape_cast %6 : vector<1x1x16x8xbf16> to vector<1x16x8xbf16>
    %c9 = arith.constant 9 : index
    %c1_14 = arith.constant 1 : index
    %c0_15 = arith.constant 0 : index
    %8 = vector.load %arg9[%c9, %c1_14, %c0_15] : memref<10x18x8xbf16, #tpu.memory_space<vmem>>, vector<1x16x8xbf16>
    tpu.vector_store %arg9[%c9, %c1_14, %c0_15], %7 {strides = array<i32>} : memref<10x18x8xbf16, #tpu.memory_space<vmem>>, vector<1x16x8xbf16>,
    %c0_16 = arith.constant 0 : index
    %c0_17 = arith.constant 0 : index
    %c0_18 = arith.constant 0 : index
    %c0_19 = arith.constant 0 : index
    %9 = vector.load %arg3[%c0_16, %c0_17, %c0_18, %c0_19] : memref<1x8x16x8xbf16, #tpu.memory_space<vmem>>, vector<1x8x16x8xbf16>
    %10 = vector.shape_cast %9 : vector<1x8x16x8xbf16> to vector<8x16x8xbf16>
    %c1_20 = arith.constant 1 : index
    %c1_21 = arith.constant 1 : index
    %c0_22 = arith.constant 0 : index
    %11 = vector.load %arg9[%c1_20, %c1_21, %c0_22] : memref<10x18x8xbf16, #tpu.memory_space<vmem>>, vector<8x16x8xbf16>
    tpu.vector_store %arg9[%c1_20, %c1_21, %c0_22], %10 {strides = array<i32>} : memref<10x18x8xbf16, #tpu.memory_space<vmem>>, vector<8x16x8xbf16>,
    %cst_23 = arith.constant 0.000000e+00 : bf16
    %12 = vector.broadcast %cst_23 : bf16 to vector<1x16x8xbf16>
    %c0_i32 = arith.constant 0 : i32
    %13 = arith.cmpi eq, %arg1, %c0_i32 : i32
    %14 = arith.extui %13 : i1 to i32
    %c0_i32_24 = arith.constant 0 : i32
    %15 = arith.cmpi ne, %14, %c0_i32_24 : i32
    scf.if %15 {
      %c0_89 = arith.constant 0 : index
      %c1_90 = arith.constant 1 : index
      %c0_91 = arith.constant 0 : index
      %90 = vector.load %arg9[%c0_89, %c1_90, %c0_91] : memref<10x18x8xbf16, #tpu.memory_space<vmem>>, vector<1x16x8xbf16>
      tpu.vector_store %arg9[%c0_89, %c1_90, %c0_91], %12 {strides = array<i32>} : memref<10x18x8xbf16, #tpu.memory_space<vmem>>, vector<1x16x8xbf16>,
    } else {
    }
    %c1_i32 = arith.constant 1 : i32
    %16 = arith.cmpi eq, %arg1, %c1_i32 : i32
    %17 = arith.extui %16 : i1 to i32
    %c0_i32_25 = arith.constant 0 : i32
    %18 = arith.cmpi ne, %17, %c0_i32_25 : i32
    scf.if %18 {
      %c9_89 = arith.constant 9 : index
      %c1_90 = arith.constant 1 : index
      %c0_91 = arith.constant 0 : index
      %90 = vector.load %arg9[%c9_89, %c1_90, %c0_91] : memref<10x18x8xbf16, #tpu.memory_space<vmem>>, vector<1x16x8xbf16>
      tpu.vector_store %arg9[%c9_89, %c1_90, %c0_91], %12 {strides = array<i32>} : memref<10x18x8xbf16, #tpu.memory_space<vmem>>, vector<1x16x8xbf16>,
    } else {
    }
    %cst_26 = arith.constant 0.000000e+00 : f32
    %19 = vector.broadcast %cst_26 : f32 to vector<128x4xf32>
    %c0_27 = arith.constant 0 : index
    %c0_28 = arith.constant 0 : index
    %c0_29 = arith.constant 0 : index
    %20 = vector.load %arg9[%c0_27, %c0_28, %c0_29] : memref<10x18x8xbf16, #tpu.memory_space<vmem>>, vector<10x16x8xbf16>
    %21 = vector.extract_strided_slice %20 {offsets = [0, 0, 0], sizes = [8, 16, 8], strides = [1, 1, 1]} : vector<10x16x8xbf16> to vector<8x16x8xbf16>
    %22 = vector.shape_cast %21 : vector<8x16x8xbf16> to vector<128x8xbf16>
    %c0_30 = arith.constant 0 : index
    %c0_31 = arith.constant 0 : index
    %c0_32 = arith.constant 0 : index
    %c0_33 = arith.constant 0 : index
    %23 = vector.load %arg5[%c0_30, %c0_31, %c0_32, %c0_33] : memref<3x3x8x4xbf16, #tpu.memory_space<vmem>>, vector<1x1x8x4xbf16>
    %24 = vector.shape_cast %23 : vector<1x1x8x4xbf16> to vector<8x4xbf16>
    %cst_34 = arith.constant dense<0.000000e+00> : vector<128x4xf32>
    %25 = tpu.matmul %22, %24, %cst_34 {dimension_numbers = #tpu.dot_dimension_numbers<[1], [0], [0], [1], [0, 0, 1, 1], [], []>} : vector<128x8xbf16>, vector<8x4xbf16>, vector<128x4xf32> -> vector<128x4xf32>
    %26 = arith.addf %19, %25 : vector<128x4xf32>
    %27 = vector.extract_strided_slice %20 {offsets = [1, 0, 0], sizes = [8, 16, 8], strides = [1, 1, 1]} : vector<10x16x8xbf16> to vector<8x16x8xbf16>
    %28 = vector.shape_cast %27 : vector<8x16x8xbf16> to vector<128x8xbf16>
    %c1_35 = arith.constant 1 : index
    %c0_36 = arith.constant 0 : index
    %c0_37 = arith.constant 0 : index
    %c0_38 = arith.constant 0 : index
    %29 = vector.load %arg5[%c1_35, %c0_36, %c0_37, %c0_38] : memref<3x3x8x4xbf16, #tpu.memory_space<vmem>>, vector<1x1x8x4xbf16>
    %30 = vector.shape_cast %29 : vector<1x1x8x4xbf16> to vector<8x4xbf16>
    %cst_39 = arith.constant dense<0.000000e+00> : vector<128x4xf32>
    %31 = tpu.matmul %28, %30, %cst_39 {dimension_numbers = #tpu.dot_dimension_numbers<[1], [0], [0], [1], [0, 0, 1, 1], [], []>} : vector<128x8xbf16>, vector<8x4xbf16>, vector<128x4xf32> -> vector<128x4xf32>
    %32 = arith.addf %26, %31 : vector<128x4xf32>
    %33 = vector.extract_strided_slice %20 {offsets = [2, 0, 0], sizes = [8, 16, 8], strides = [1, 1, 1]} : vector<10x16x8xbf16> to vector<8x16x8xbf16>
    %34 = vector.shape_cast %33 : vector<8x16x8xbf16> to vector<128x8xbf16>
    %c2 = arith.constant 2 : index
    %c0_40 = arith.constant 0 : index
    %c0_41 = arith.constant 0 : index
    %c0_42 = arith.constant 0 : index
    %35 = vector.load %arg5[%c2, %c0_40, %c0_41, %c0_42] : memref<3x3x8x4xbf16, #tpu.memory_space<vmem>>, vector<1x1x8x4xbf16>
    %36 = vector.shape_cast %35 : vector<1x1x8x4xbf16> to vector<8x4xbf16>
    %cst_43 = arith.constant dense<0.000000e+00> : vector<128x4xf32>
    %37 = tpu.matmul %34, %36, %cst_43 {dimension_numbers = #tpu.dot_dimension_numbers<[1], [0], [0], [1], [0, 0, 1, 1], [], []>} : vector<128x8xbf16>, vector<8x4xbf16>, vector<128x4xf32> -> vector<128x4xf32>
    %38 = arith.addf %32, %37 : vector<128x4xf32>
    %c0_44 = arith.constant 0 : index
    %c1_45 = arith.constant 1 : index
    %c0_46 = arith.constant 0 : index
    %39 = vector.load %arg9[%c0_44, %c1_45, %c0_46] : memref<10x18x8xbf16, #tpu.memory_space<vmem>>, vector<10x16x8xbf16>
    %40 = vector.extract_strided_slice %39 {offsets = [0, 0, 0], sizes = [8, 16, 8], strides = [1, 1, 1]} : vector<10x16x8xbf16> to vector<8x16x8xbf16>
    %41 = vector.shape_cast %40 : vector<8x16x8xbf16> to vector<128x8xbf16>
    %c0_47 = arith.constant 0 : index
    %c1_48 = arith.constant 1 : index
    %c0_49 = arith.constant 0 : index
    %c0_50 = arith.constant 0 : index
    %42 = vector.load %arg5[%c0_47, %c1_48, %c0_49, %c0_50] : memref<3x3x8x4xbf16, #tpu.memory_space<vmem>>, vector<1x1x8x4xbf16>
    %43 = vector.shape_cast %42 : vector<1x1x8x4xbf16> to vector<8x4xbf16>
    %cst_51 = arith.constant dense<0.000000e+00> : vector<128x4xf32>
    %44 = tpu.matmul %41, %43, %cst_51 {dimension_numbers = #tpu.dot_dimension_numbers<[1], [0], [0], [1], [0, 0, 1, 1], [], []>} : vector<128x8xbf16>, vector<8x4xbf16>, vector<128x4xf32> -> vector<128x4xf32>
    %45 = arith.addf %38, %44 : vector<128x4xf32>
    %46 = vector.extract_strided_slice %39 {offsets = [1, 0, 0], sizes = [8, 16, 8], strides = [1, 1, 1]} : vector<10x16x8xbf16> to vector<8x16x8xbf16>
    %47 = vector.shape_cast %46 : vector<8x16x8xbf16> to vector<128x8xbf16>
    %c1_52 = arith.constant 1 : index
    %c1_53 = arith.constant 1 : index
    %c0_54 = arith.constant 0 : index
    %c0_55 = arith.constant 0 : index
    %48 = vector.load %arg5[%c1_52, %c1_53, %c0_54, %c0_55] : memref<3x3x8x4xbf16, #tpu.memory_space<vmem>>, vector<1x1x8x4xbf16>
    %49 = vector.shape_cast %48 : vector<1x1x8x4xbf16> to vector<8x4xbf16>
    %cst_56 = arith.constant dense<0.000000e+00> : vector<128x4xf32>
    %50 = tpu.matmul %47, %49, %cst_56 {dimension_numbers = #tpu.dot_dimension_numbers<[1], [0], [0], [1], [0, 0, 1, 1], [], []>} : vector<128x8xbf16>, vector<8x4xbf16>, vector<128x4xf32> -> vector<128x4xf32>
    %51 = arith.addf %45, %50 : vector<128x4xf32>
    %52 = vector.extract_strided_slice %39 {offsets = [2, 0, 0], sizes = [8, 16, 8], strides = [1, 1, 1]} : vector<10x16x8xbf16> to vector<8x16x8xbf16>
    %53 = vector.shape_cast %52 : vector<8x16x8xbf16> to vector<128x8xbf16>
    %c2_57 = arith.constant 2 : index
    %c1_58 = arith.constant 1 : index
    %c0_59 = arith.constant 0 : index
    %c0_60 = arith.constant 0 : index
    %54 = vector.load %arg5[%c2_57, %c1_58, %c0_59, %c0_60] : memref<3x3x8x4xbf16, #tpu.memory_space<vmem>>, vector<1x1x8x4xbf16>
    %55 = vector.shape_cast %54 : vector<1x1x8x4xbf16> to vector<8x4xbf16>
    %cst_61 = arith.constant dense<0.000000e+00> : vector<128x4xf32>
    %56 = tpu.matmul %53, %55, %cst_61 {dimension_numbers = #tpu.dot_dimension_numbers<[1], [0], [0], [1], [0, 0, 1, 1], [], []>} : vector<128x8xbf16>, vector<8x4xbf16>, vector<128x4xf32> -> vector<128x4xf32>
    %57 = arith.addf %51, %56 : vector<128x4xf32>
    %c0_62 = arith.constant 0 : index
    %c2_63 = arith.constant 2 : index
    %c0_64 = arith.constant 0 : index
    %58 = vector.load %arg9[%c0_62, %c2_63, %c0_64] : memref<10x18x8xbf16, #tpu.memory_space<vmem>>, vector<10x16x8xbf16>
    %59 = vector.extract_strided_slice %58 {offsets = [0, 0, 0], sizes = [8, 16, 8], strides = [1, 1, 1]} : vector<10x16x8xbf16> to vector<8x16x8xbf16>
    %60 = vector.shape_cast %59 : vector<8x16x8xbf16> to vector<128x8xbf16>
    %c0_65 = arith.constant 0 : index
    %c2_66 = arith.constant 2 : index
    %c0_67 = arith.constant 0 : index
    %c0_68 = arith.constant 0 : index
    %61 = vector.load %arg5[%c0_65, %c2_66, %c0_67, %c0_68] : memref<3x3x8x4xbf16, #tpu.memory_space<vmem>>, vector<1x1x8x4xbf16>
    %62 = vector.shape_cast %61 : vector<1x1x8x4xbf16> to vector<8x4xbf16>
    %cst_69 = arith.constant dense<0.000000e+00> : vector<128x4xf32>
    %63 = tpu.matmul %60, %62, %cst_69 {dimension_numbers = #tpu.dot_dimension_numbers<[1], [0], [0], [1], [0, 0, 1, 1], [], []>} : vector<128x8xbf16>, vector<8x4xbf16>, vector<128x4xf32> -> vector<128x4xf32>
    %64 = arith.addf %57, %63 : vector<128x4xf32>
    %65 = vector.extract_strided_slice %58 {offsets = [1, 0, 0], sizes = [8, 16, 8], strides = [1, 1, 1]} : vector<10x16x8xbf16> to vector<8x16x8xbf16>
    %66 = vector.shape_cast %65 : vector<8x16x8xbf16> to vector<128x8xbf16>
    %c1_70 = arith.constant 1 : index
    %c2_71 = arith.constant 2 : index
    %c0_72 = arith.constant 0 : index
    %c0_73 = arith.constant 0 : index
    %67 = vector.load %arg5[%c1_70, %c2_71, %c0_72, %c0_73] : memref<3x3x8x4xbf16, #tpu.memory_space<vmem>>, vector<1x1x8x4xbf16>
    %68 = vector.shape_cast %67 : vector<1x1x8x4xbf16> to vector<8x4xbf16>
    %cst_74 = arith.constant dense<0.000000e+00> : vector<128x4xf32>
    %69 = tpu.matmul %66, %68, %cst_74 {dimension_numbers = #tpu.dot_dimension_numbers<[1], [0], [0], [1], [0, 0, 1, 1], [], []>} : vector<128x8xbf16>, vector<8x4xbf16>, vector<128x4xf32> -> vector<128x4xf32>
    %70 = arith.addf %64, %69 : vector<128x4xf32>
    %71 = vector.extract_strided_slice %58 {offsets = [2, 0, 0], sizes = [8, 16, 8], strides = [1, 1, 1]} : vector<10x16x8xbf16> to vector<8x16x8xbf16>
    %72 = vector.shape_cast %71 : vector<8x16x8xbf16> to vector<128x8xbf16>
    %c2_75 = arith.constant 2 : index
    %c2_76 = arith.constant 2 : index
    %c0_77 = arith.constant 0 : index
    %c0_78 = arith.constant 0 : index
    %73 = vector.load %arg5[%c2_75, %c2_76, %c0_77, %c0_78] : memref<3x3x8x4xbf16, #tpu.memory_space<vmem>>, vector<1x1x8x4xbf16>
    %74 = vector.shape_cast %73 : vector<1x1x8x4xbf16> to vector<8x4xbf16>
    %cst_79 = arith.constant dense<0.000000e+00> : vector<128x4xf32>
    %75 = tpu.matmul %72, %74, %cst_79 {dimension_numbers = #tpu.dot_dimension_numbers<[1], [0], [0], [1], [0, 0, 1, 1], [], []>} : vector<128x8xbf16>, vector<8x4xbf16>, vector<128x4xf32> -> vector<128x4xf32>
    %76 = arith.addf %70, %75 : vector<128x4xf32>
    %c0_80 = arith.constant 0 : index
    %c0_81 = arith.constant 0 : index
    %77 = vector.load %arg6[%c0_80, %c0_81] : memref<1x4xf32, #tpu.memory_space<vmem>>, vector<1x4xf32>
    %78 = vector.broadcast %77 : vector<1x4xf32> to vector<128x4xf32>
    %79 = arith.mulf %76, %78 : vector<128x4xf32>
    %c0_82 = arith.constant 0 : index
    %c0_83 = arith.constant 0 : index
    %80 = vector.load %arg7[%c0_82, %c0_83] : memref<1x4xf32, #tpu.memory_space<vmem>>, vector<1x4xf32>
    %81 = vector.broadcast %80 : vector<1x4xf32> to vector<128x4xf32>
    %82 = arith.addf %79, %81 : vector<128x4xf32>
    %cst_84 = arith.constant 0.000000e+00 : f32
    %83 = vector.broadcast %cst_84 : f32 to vector<128x4xf32>
    %84 = arith.maximumf %82, %83 : vector<128x4xf32>
    %85 = vector.shape_cast %84 : vector<128x4xf32> to vector<8x16x4xf32>
    %86 = arith.truncf %85 : vector<8x16x4xf32> to vector<8x16x4xbf16>
    %c0_85 = arith.constant 0 : index
    %c0_86 = arith.constant 0 : index
    %c0_87 = arith.constant 0 : index
    %c0_88 = arith.constant 0 : index
    %87 = vector.load %arg8[%c0_85, %c0_86, %c0_87, %c0_88] : memref<1x8x16x4xbf16, #tpu.memory_space<vmem>>, vector<1x8x16x4xbf16>
    %88 = vector.shape_cast %87 : vector<1x8x16x4xbf16> to vector<8x16x4xbf16>
    %89 = vector.shape_cast %86 : vector<8x16x4xbf16> to vector<1x8x16x4xbf16>
    tpu.vector_store %arg8[%c0_85, %c0_86, %c0_87, %c0_88], %89 {strides = array<i32>} : memref<1x8x16x4xbf16, #tpu.memory_space<vmem>>, vector<1x8x16x4xbf16>,
    return
  }
  func.func @transform_0(%arg0: i32, %arg1: i32) -> (i32, i32, i32, i32) {
    %c8_i32 = arith.constant 8 : i32
    %0 = arith.muli %arg1, %c8_i32 : i32
    %c1_i32 = arith.constant 1 : i32
    %1 = arith.subi %0, %c1_i32 : i32
    %c0_i32 = arith.constant 0 : i32
    %2 = arith.maxsi %1, %c0_i32 : i32
    %c0_i32_0 = arith.constant 0 : i32
    %c0_i32_1 = arith.constant 0 : i32
    %c0_i32_2 = arith.constant 0 : i32
    return %arg0, %2, %c0_i32_0, %c0_i32_1 : i32, i32, i32, i32
  }
  func.func @transform_1(%arg0: i32, %arg1: i32) -> (i32, i32, i32, i32) {
    %c0_i32 = arith.constant 0 : i32
    %c0_i32_0 = arith.constant 0 : i32
    %c0_i32_1 = arith.constant 0 : i32
    return %arg0, %arg1, %c0_i32, %c0_i32_0 : i32, i32, i32, i32
  }
  func.func @transform_2(%arg0: i32, %arg1: i32) -> (i32, i32, i32, i32) {
    %c8_i32 = arith.constant 8 : i32
    %0 = arith.muli %arg1, %c8_i32 : i32
    %c8_i32_0 = arith.constant 8 : i32
    %1 = arith.addi %0, %c8_i32_0 : i32
    %c15_i32 = arith.constant 15 : i32
    %2 = arith.minsi %1, %c15_i32 : i32
    %c0_i32 = arith.constant 0 : i32
    %c0_i32_1 = arith.constant 0 : i32
    %c0_i32_2 = arith.constant 0 : i32
    return %arg0, %2, %c0_i32, %c0_i32_1 : i32, i32, i32, i32
  }
  func.func @transform_3(%arg0: i32, %arg1: i32) -> (i32, i32, i32, i32) {
    %c0_i32 = arith.constant 0 : i32
    %c0_i32_0 = arith.constant 0 : i32
    %c0_i32_1 = arith.constant 0 : i32
    %c0_i32_2 = arith.constant 0 : i32
    %c0_i32_3 = arith.constant 0 : i32
    return %c0_i32, %c0_i32_0, %c0_i32_1, %c0_i32_2 : i32, i32, i32, i32
  }
  func.func @transform_4(%arg0: i32, %arg1: i32) -> (i32, i32) {
    %c0_i32 = arith.constant 0 : i32
    %c0_i32_0 = arith.constant 0 : i32
    %c0_i32_1 = arith.constant 0 : i32
    return %c0_i32, %c0_i32_0 : i32, i32
  }
  func.func @transform_5(%arg0: i32, %arg1: i32) -> (i32, i32) {
    %c0_i32 = arith.constant 0 : i32
    %c0_i32_0 = arith.constant 0 : i32
    %c0_i32_1 = arith.constant 0 : i32
    return %c0_i32, %c0_i32_0 : i32, i32
  }
  func.func @transform_6(%arg0: i32, %arg1: i32) -> (i32, i32, i32, i32) {
    %c0_i32 = arith.constant 0 : i32
    %c0_i32_0 = arith.constant 0 : i32
    %c0_i32_1 = arith.constant 0 : i32
    return %arg0, %arg1, %c0_i32, %c0_i32_0 : i32, i32, i32, i32
  }
}

</mosaic_0001>

<bundles_post_ra>
// kernel: tile.8
= control target key start
LH: loop header
LB: loop body
LE: loop exit
PB: predicated region body
PF: predicated region fallthrough
CT: control target
= control target key end

     0   :  { %s22_s0 = inlined_call_operand.vmem [shape: f32[4], index: 0, kind: input, shape index: {}]   ;;  %s23_s1 = inlined_call_operand.vmem [shape: f32[4,4], index: 1, kind: output, shape index: {}]  }
   0x1   :  { %v4_v0 = vld [vmem:[%s22_s0] ss:$0 sm:$0xff] }
   0x2   :  { %5 = vst [vmem:[%s23_s1] sm:$0xf] %v4_v0 }

// kernel: tile.9
= control target key start
LH: loop header
LB: loop body
LE: loop exit
PB: predicated region body
PF: predicated region fallthrough
CT: control target
= control target key end

     0   :  { %vm7_vm0 = vcmask 31744   ;;  %s37_s8 = smov 4   ;;  %s38_s9 = smov 8   ;;  %vm13_vm1 = vcmask 130144   ;;  %vm19_vm2 = vcmask 97344   ;;  %vm25_vm3 = vcmask 64544   ;;  %s55_s0 = inlined_call_operand.vmem [shape: f32[4,4], index: 0, kind: input, shape index: {}]   ;;  %s56_s1 = inlined_call_operand.vmem [shape: f32[1,16], index: 1, kind: output, shape index: {}]  }
   0x1   :  { %v4_v0 = vld [vmem:[%s55_s0] sm:$0xf]  ;;  %s36_s0 = smov 12  }
   0x2   :  { %5 = vst [vmem:[#allocation1] sm:$0xf] %v4_v0 }
   0x9   :  { %v10_v1 = vld [vmem:[#allocation1 + $0x3] sm:$0x1]   ;;  %v22_v2 = vld [vmem:[#allocation1 + $0x1] sm:$0x1]   ;;  %v6_v3 = vld [vmem:[#allocation1] sm:$0x1]  }
   0xa   :  { %11 = vrot.lane.b32.xlu0 %v10_v1, %s36_s0  ;;  %23 = vrot.lane.b32.xlu1 %v22_v2, %s37_s8  ;;  %v16_v4 = vld [vmem:[#allocation1 + $0x2] sm:$0x1]   ;;  %8 = vst.msk [vmem:[#allocation0] sm:$0x1] %vm7_vm0, %v6_v3  }
   0xe   :  { %17 = vrot.lane.b32.xlu0 %v16_v4, %s38_s9 }
  0x7c   :  { %v12_v5 = vpop.permute.xlu0 %11   ;;  %v24_v6 = vpop.permute.xlu1 %23  }
  0x7d   :  { %14 = vst.msk [vmem:[#allocation0] sm:$0x1] %vm13_vm1, %v12_v5  }
  0x80   :  { %v18_v7 = vpop.permute.xlu0 %17  }
  0x81   :  { %20 = vst.msk [vmem:[#allocation0] sm:$0x1] %vm19_vm2, %v18_v7  }
  0x82   :  { %26 = vst.msk [vmem:[#allocation0] sm:$0x1] %vm25_vm3, %v24_v6  }
  0x89   :  { %v30_v8 = vld [vmem:[#allocation0] sm:$0x1] }
  0x8a   :  { %32 = vst [vmem:[%s56_s1] sm:$0x1] %v30_v8 }

// kernel: doublewith2up_forward.3
= control target key start
LH: loop header
LB: loop body
LE: loop exit
PB: predicated region body
PF: predicated region fallthrough
CT: control target
= control target key end

     0   :  { %s1056_s18 = smov 0   ;;  %s1058_s19 = smov 0   ;;  %s1169_s0 = inlined_call_operand.vmem [shape: bf16[2,8,8,8], index: 0, kind: input, shape index: {}]   ;;  %s1170_s1 = inlined_call_operand.vmem [shape: bf16[2,8,8,8], index: 1, kind: input, shape index: {}]   ;;  %s1171_s2 = inlined_call_operand.vmem [shape: bf16[2,8,16], index: 2, kind: input, shape index: {}]   ;;  %s1172_s3 = inlined_call_operand.vmem [shape: bf16[2,8,16], index: 3, kind: input, shape index: {}]   ;;  %s1173_s4 = inlined_call_operand.vmem [shape: f32[1,16], index: 4, kind: input, shape index: {}]   ;;  %s1174_s5 = inlined_call_operand.vmem [shape: bf16[2,8,2,8,16], index: 5, kind: output, shape index: {}]  }
   0x1   :  { %s1060_s20 = smov 0  }
   0x2 LB: > { %s27_s21 = sadd.s32 1, %s1020_s19  ;;  %p842_p0 = scmp.ge.s32.totalorder %s1024_s20, 1  ;;  %s1024_s20 = sphi %s1060_s20, %s15_s20   ;;  %s1020_s19 = sphi %s1058_s19, %s1176_s19   ;;  %s1016_s18 = sphi %s1056_s18, %s1175_s18  }
   0x3   : > { %p29_p1 = scmp.ge.s32.totalorder %s27_s21, 2  ;;  %p225_p2 = scmp.lt.s32.totalorder %s1024_s20, 3 }
   0x5   : > { %s1178_s21 = smov (%p29_p1, %s27_s21), 0  ;;  %p226_p3 = pnand %p842_p0, %p225_p2 }
   0x6   : > { %v320_v0 = vld [vmem:[%s1172_s3] sm:$0xf] (!%p226_p3)  ;;  %vm354_vm0 = vcmask (!%p226_p3), 1043456   ;;  %v867_v1 = vld [vmem:[%s1172_s3 + $0x4] sm:$0xf] (!%p226_p3)  ;;  %p272_p4 = scmp.lt.s32.totalorder (!%p226_p3), %s1016_s18, 1 }
   0x7   : > { %229 = sbr.rel (%p226_p3) target bundleno = 263 (0x107), region = 40  ;;  %966 = vmatprep.subr.msk.bf16.mxu0 (!%p226_p3), %vm354_vm0, %v320_v0  ;;  %968 = vmatprep.subr.msk.bf16.mxu1 (!%p226_p3), %vm354_vm0, %v867_v1  ;;  %v356_v2 = vsel (!%p226_p3), %vm354_vm0, %v320_v0, 0  ;;  %v560_v3 = vsel (!%p226_p3), %vm354_vm0, %v867_v1, 0  ;;  %v319_v4 = vld [vmem:[%s1171_s2] sm:$0xf] (!%p226_p3)  ;;  %vm341_vm1 = vcmask (!%p226_p3), 64512  }
   0x8   : > { %911 = vmatpush3.bf16.msra.mxu0 (!%p226_p3), %v356_v2  ;;  %931 = vmatpush3.bf16.msra.mxu1 (!%p226_p3), %v560_v3  ;;  %v866_v5 = vld [vmem:[%s1171_s2 + $0x4] sm:$0xf] (!%p226_p3)  ;;  %v456_v7 = vsel (!%p226_p3), %vm354_vm0, %v319_v4, 0  ;;  %v865_v16 = vld [vmem:[%s1173_s4] ss:$0 sm:$0xff] (!%p226_p3)  ;;  %vm546_vm2 = vcmask (!%p226_p3), 125952  }
   0x9   : > { %967 = vmatprep.subr.msk.bf16.mxu0 (!%p226_p3), %vm354_vm0, %v319_v4  ;;  %969 = vmatprep.subr.msk.bf16.mxu1 (!%p226_p3), %vm354_vm0, %v866_v5  ;;  %v628_v9 = vsel (!%p226_p3), %vm354_vm0, %v866_v5, 0 }
   0xe   : > { %s1180_s18 = smov (!%p272_p4, %s1016_s18), 1 }
   0xf   : > { %s887_s30 = sshll.u32 %s1180_s18, 5  ;;  %s889_s14 = sshll.u32 %s1180_s18, 6 }
  0x10   : > { %s289_s8 = scalar_lea.vmem %s1170_s1, %s887_s30  ;;  %s279_s11 = scalar_lea.vmem %s1169_s0, %s887_s30 }
  0x11   : > { %v994_v6 = vld [vmem:[%s289_s8] sm:$0xff]   ;;  %v995_v8 = vld [vmem:[%s289_s8 + $0x8] sm:$0xff]   ;;  %v996_v10 = vld [vmem:[%s289_s8 + $0x10] sm:$0xff]   ;;  %s1126_s17 = scalar_lea.vmem %s1174_s5, %s889_s14 }
  0x12   : > { %912 = vmatprep.mubr.msk.bf16.mxu0 %vm341_vm1, %v994_v6  ;;  %932 = vmatprep.mubr.msk.bf16.mxu1 %vm341_vm1, %v994_v6  ;;  %v997_v11 = vld [vmem:[%s289_s8 + $0x18] sm:$0xff]   ;;  %v998_v12 = vld [vmem:[%s279_s11] sm:$0xff]   ;;  %v999_v13 = vld [vmem:[%s279_s11 + $0x8] sm:$0xff]  }
  0x13   : > { %913 = vmatmul.mubr.msk.bf16.vlgmr.msra.gmra.mrb[0].mxu0 %vm341_vm1, %v995_v8  ;;  %933 = vmatmul.mubr.msk.bf16.vlgmr.msra.gmra.mrb[0].mxu1 %vm341_vm1, %v995_v8  ;;  %v1000_v14 = vld [vmem:[%s279_s11 + $0x10] sm:$0xff]   ;;  %v1001_v15 = vld [vmem:[%s279_s11 + $0x18] sm:$0xff]  }
  0x14   : > { %921 = vmatpush3.bf16.msra.mxu0 %v456_v7  ;;  %941 = vmatpush3.bf16.msra.mxu1 %v628_v9 }
  0x15   : > { %916 = vmatprep.mubr.msk.bf16.mxu0 %vm341_vm1, %v996_v10  ;;  %936 = vmatprep.mubr.msk.bf16.mxu1 %vm341_vm1, %v996_v10 }
  0x1b   : > { %917 = vmatmul.mubr.msk.bf16.gmra.mrb[4].mxu0 %vm341_vm1, %v997_v11  ;;  %937 = vmatmul.mubr.msk.bf16.gmra.mrb[4].mxu1 %vm341_vm1, %v997_v11 }
  0x1c   : > { %922 = vmatprep.mubr.msk.bf16.mxu0 %vm341_vm1, %v998_v12  ;;  %942 = vmatprep.mubr.msk.bf16.mxu1 %vm341_vm1, %v998_v12 }
  0x23   : > { %923 = vmatmul.mubr.msk.bf16.vlgmr.msra.gmra.mrb[0].mxu0 %vm341_vm1, %v999_v13  ;;  %943 = vmatmul.mubr.msk.bf16.vlgmr.msra.gmra.mrb[0].mxu1 %vm341_vm1, %v999_v13 }
  0x24   : > { %926 = vmatprep.mubr.msk.bf16.mxu0 %vm341_vm1, %v1000_v14  ;;  %946 = vmatprep.mubr.msk.bf16.mxu1 %vm341_vm1, %v1000_v14 }
  0x2b   : > { %927 = vmatmul.mubr.msk.bf16.gmra.mrb[4].mxu0 %vm341_vm1, %v1001_v15  ;;  %947 = vmatmul.mubr.msk.bf16.gmra.mrb[4].mxu1 %vm341_vm1, %v1001_v15 }
  0xf6   : > { %v924_v17 = vpop.f32.mrb[0].mxu0  ;;  %v944_v18 = vpop.f32.mrb[0].mxu1 }
  0xf7   : > { %v532_v19 = vadd.f32 %v924_v17, %v865_v16  ;;  %v704_v20 = vadd.f32 %v944_v18, %v865_v16  ;;  %v492_v21 = vpop.f32.mrb[1].mxu0  ;;  %v664_v22 = vpop.f32.mrb[1].mxu1 }
  0xf8   : > { %v530_v23 = vadd.f32 %v865_v16, %v492_v21  ;;  %v702_v24 = vadd.f32 %v865_v16, %v664_v22  ;;  %v925_v25 = vpop.f32.mrb[2].mxu0  ;;  %v945_v26 = vpop.f32.mrb[2].mxu1 }
  0xf9   : > { %v540_v27 = vpack.c.bf16 %v532_v19, %v532_v19  ;;  %v712_v28 = vpack.c.bf16 %v704_v20, %v704_v20  ;;  %v533_v29 = vadd.f32 %v925_v25, %v865_v16  ;;  %v705_v30 = vadd.f32 %v945_v26, %v865_v16  ;;  %v495_v31 = vpop.f32.mrb[3].mxu0  ;;  %v667_v32 = vpop.f32.mrb[3].mxu1 }
  0xfa   : > { %v538_v33 = vpack.c.bf16 %v530_v23, %v530_v23  ;;  %v710_v34 = vpack.c.bf16 %v702_v24, %v702_v24  ;;  %v531_v35 = vadd.f32 %v865_v16, %v495_v31  ;;  %v703_v36 = vadd.f32 %v865_v16, %v667_v32 }
  0xfb   : > { %549 = vst.msk [vmem:[%s1126_s17 + $0x10] sm:$0xf] %vm546_vm2, %v540_v27  ;;  %879 = vst.msk [vmem:[%s1126_s17 + $0x14] sm:$0xf] %vm546_vm2, %v712_v28  ;;  %v541_v37 = vpack.c.bf16 %v533_v29, %v533_v29  ;;  %v713_v38 = vpack.c.bf16 %v705_v30, %v705_v30 }
  0xfc   : > { %547 = vst.msk [vmem:[%s1126_s17] sm:$0xf] %vm546_vm2, %v538_v33  ;;  %877 = vst.msk [vmem:[%s1126_s17 + $0x4] sm:$0xf] %vm546_vm2, %v710_v34  ;;  %v539_v39 = vpack.c.bf16 %v531_v35, %v531_v35  ;;  %v711_v40 = vpack.c.bf16 %v703_v36, %v703_v36 }
  0xfd   : > { %550 = vst.msk [vmem:[%s1126_s17 + $0x18] sm:$0xf] %vm546_vm2, %v541_v37  ;;  %880 = vst.msk [vmem:[%s1126_s17 + $0x1c] sm:$0xf] %vm546_vm2, %v713_v38 }
  0xfe   : > { %548 = vst.msk [vmem:[%s1126_s17 + $0x8] sm:$0xf] %vm546_vm2, %v539_v39  ;;  %878 = vst.msk [vmem:[%s1126_s17 + $0xc] sm:$0xf] %vm546_vm2, %v711_v40  ;;  %v928_v41 = vpop.f32.mrb[4].mxu0  ;;  %v948_v42 = vpop.f32.mrb[4].mxu1 }
  0xff   : > { %v536_v43 = vadd.f32 %v928_v41, %v865_v16  ;;  %v708_v44 = vadd.f32 %v948_v42, %v865_v16  ;;  %v508_v45 = vpop.f32.mrb[5].mxu0  ;;  %v680_v46 = vpop.f32.mrb[5].mxu1 }
 0x100   : > { %v534_v47 = vadd.f32 %v865_v16, %v508_v45  ;;  %v706_v48 = vadd.f32 %v865_v16, %v680_v46  ;;  %v929_v49 = vpop.f32.mrb[6].mxu0  ;;  %v949_v50 = vpop.f32.mrb[6].mxu1 }
 0x101   : > { %v544_v51 = vpack.c.bf16 %v536_v43, %v536_v43  ;;  %v716_v52 = vpack.c.bf16 %v708_v44, %v708_v44  ;;  %v537_v53 = vadd.f32 %v929_v49, %v865_v16  ;;  %v709_v54 = vadd.f32 %v949_v50, %v865_v16  ;;  %v511_v55 = vpop.f32.mrb[7].mxu0  ;;  %v683_v56 = vpop.f32.mrb[7].mxu1 }
 0x102   : > { %v542_v57 = vpack.c.bf16 %v534_v47, %v534_v47  ;;  %v714_v58 = vpack.c.bf16 %v706_v48, %v706_v48  ;;  %v535_v59 = vadd.f32 %v865_v16, %v511_v55  ;;  %v707_v60 = vadd.f32 %v865_v16, %v683_v56 }
 0x103   : > { %553 = vst.msk [vmem:[%s1126_s17 + $0x30] sm:$0xf] %vm546_vm2, %v544_v51  ;;  %883 = vst.msk [vmem:[%s1126_s17 + $0x34] sm:$0xf] %vm546_vm2, %v716_v52  ;;  %v545_v61 = vpack.c.bf16 %v537_v53, %v537_v53  ;;  %v717_v62 = vpack.c.bf16 %v709_v54, %v709_v54 }
 0x104   : > { %551 = vst.msk [vmem:[%s1126_s17 + $0x20] sm:$0xf] %vm546_vm2, %v542_v57  ;;  %881 = vst.msk [vmem:[%s1126_s17 + $0x24] sm:$0xf] %vm546_vm2, %v714_v58  ;;  %v543_v63 = vpack.c.bf16 %v535_v59, %v535_v59  ;;  %v715_v0 = vpack.c.bf16 %v707_v60, %v707_v60 }
 0x105   : > { %554 = vst.msk [vmem:[%s1126_s17 + $0x38] sm:$0xf] %vm546_vm2, %v545_v61  ;;  %884 = vst.msk [vmem:[%s1126_s17 + $0x3c] sm:$0xf] %vm546_vm2, %v717_v62 }
 0x106   : > { %552 = vst.msk [vmem:[%s1126_s17 + $0x28] sm:$0xf] %vm546_vm2, %v543_v63  ;;  %882 = vst.msk [vmem:[%s1126_s17 + $0x2c] sm:$0xf] %vm546_vm2, %v715_v0 }
 0x107 PF: > { %s15_s20 = sadd.s32 1, %s1024_s20   ;;  %s1175_s18 = smov %s1020_s19 }
 0x108   : > { %p12_p5 = scmp.ge.s32.totalorder %s15_s20, 4   ;;  %s1176_s19 = smov %s1178_s21 }
 0x10a   :  { %14 = sbr.rel (!%p12_p5) target bundleno = 2 (0x2), region = 76 }

// kernel: doublewith2up_forward.5
= control target key start
LH: loop header
LB: loop body
LE: loop exit
PB: predicated region body
PF: predicated region fallthrough
CT: control target
= control target key end

     0   :  { %s3337_s21 = smov 0   ;;  %s3339_s22 = smov 0   ;;  %s4113_s0 = inlined_call_operand.vmem [shape: bf16[2,16,16,4], index: 0, kind: input, shape index: {}, may-alias: {0,1,2}]   ;;  %s4114_s1 = inlined_call_operand.vmem [shape: bf16[2,16,16,4], index: 1, kind: input, shape index: {}, may-alias: {0,1,2}]   ;;  %s4115_s2 = inlined_call_operand.vmem [shape: bf16[2,16,16,4], index: 2, kind: input, shape index: {}, may-alias: {0,1,2}]   ;;  %s4116_s3 = inlined_call_operand.vmem [shape: bf16[3,3,4,4], index: 3, kind: input, shape index: {}]   ;;  %s4117_s4 = inlined_call_operand.vmem [shape: f32[1,4], index: 4, kind: input, shape index: {}]   ;;  %s4118_s5 = inlined_call_operand.vmem [shape: f32[1,4], index: 5, kind: input, shape index: {}]   ;;  %s4119_s6 = inlined_call_operand.vmem [shape: f32[2,16,16,4], index: 6, kind: output, shape index: {}]  }
   0x1   :  { %s3341_s23 = smov 0   ;;  %s3343_s24 = smov 0  }
   0x2   :  { %s3345_s25 = smov 0  }
   0x3 LB: > { %s25_s26 = sadd.s32 1, %s3290_s23  ;;  %s28_s27 = sadd.s32 1, %s3294_s24  ;;  %s3298_s25 = sphi %s3345_s25, %s16_s25   ;;  %s3294_s24 = sphi %s3343_s24, %s4136_s24   ;;  %s3290_s23 = sphi %s3341_s23, %s4135_s23   ;;  %s3286_s22 = sphi %s3339_s22, %s4134_s22   ;;  %s3282_s21 = sphi %s3337_s21, %s4133_s21  }
   0x4   : > { %p26_p0 = scmp.ge.s32.totalorder %s25_s26, 2  ;;  %p2671_p1 = scmp.ge.s32.totalorder %s3298_s25, 1 }
   0x5   : > { %p298_p2 = scmp.lt.s32.totalorder %s3298_s25, 5 }
   0x6   : > { %s4138_s26 = smov (%p26_p0, %s25_s26), 0  ;;  %s4140_s27 = smov (!%p26_p0, %s28_s27), %s3294_s24 }
   0x7   : > { %p299_p3 = pnand %p2671_p1, %p298_p2  ;;  %p30_p4 = scmp.ge.s32.totalorder %s4140_s27, 2 }
   0x8   : > { %vm421_vm0 = vcmask (!%p299_p3), 24576   ;;  %vm422_vm1 = vsmask.f32 (!%p299_p3), 256  ;;  %v424_v0 = vld [vmem:[#allocation2] sm:$0x1] (!%p299_p3)  ;;  %s3384_s28 = sshll.u32 (!%p299_p3), %s3282_s21, 3 }
   0x9   : > { %s4142_s27 = smov (%p30_p4, %s4140_s27), 0  ;;  %302 = sbr.rel (%p299_p3) target bundleno = 465 (0x1d1), region = 44 }
   0xa   : > { %vm3373_vm2 = vmand (!%p299_p3), %vm421_vm0, %vm422_vm1  ;;  %v427_v2 = vld [vmem:[#allocation2 + $0xc] sm:$0x1] (!%p299_p3)  ;;  %v430_v3 = vld [vmem:[#allocation2 + $0x18] sm:$0x1] (!%p299_p3)  ;;  %vm454_vm3 = vsmask.f32 (!%p299_p3), 7938 }
   0xb   : > { %v425_v4 = vsel (!%p299_p3), %vm3373_vm2, 0, %v424_v0  ;;  %v428_v5 = vsel (!%p299_p3), %vm3373_vm2, 0, %v427_v2  ;;  %v431_v6 = vsel (!%p299_p3), %vm3373_vm2, 0, %v430_v3  ;;  %v433_v7 = vld [vmem:[#allocation2 + $0x24] sm:$0x1] (!%p299_p3)  ;;  %s3389_s29 = sadd.s32 (!%p299_p3), 4294967295, %s3384_s28  ;;  %vm3397_vm4 = vmand (!%p299_p3), %vm421_vm0, %vm454_vm3 }
   0xc   : > { %426 = vst [vmem:[#allocation2] sm:$0x1] (!%p299_p3), %v425_v4  ;;  %429 = vst [vmem:[#allocation2 + $0xc] sm:$0x1] (!%p299_p3), %v428_v5  ;;  %v434_v8 = vsel (!%p299_p3), %vm3373_vm2, 0, %v433_v7  ;;  %p366_p5 = scmp.gt.s32.totalorder (!%p299_p3), %s3389_s29, 0 }
   0xd   : > { %432 = vst [vmem:[#allocation2 + $0x18] sm:$0x1] (!%p299_p3), %v431_v6  ;;  %v436_v9 = vld [vmem:[#allocation2 + $0x30] sm:$0x1] (!%p299_p3)  ;;  %v439_v10 = vld [vmem:[#allocation2 + $0x3c] sm:$0x1] (!%p299_p3) }
   0xe   : > { %435 = vst [vmem:[#allocation2 + $0x24] sm:$0x1] (!%p299_p3), %v434_v8  ;;  %v437_v11 = vsel (!%p299_p3), %vm3373_vm2, 0, %v436_v9  ;;  %v440_v12 = vsel (!%p299_p3), %vm3373_vm2, 0, %v439_v10  ;;  %v442_v13 = vld [vmem:[#allocation2 + $0x48] sm:$0x1] (!%p299_p3) }
   0xf   : > { %v445_v14 = vld [vmem:[#allocation2 + $0x54] sm:$0x1] (!%p299_p3)  ;;  %438 = vst [vmem:[#allocation2 + $0x30] sm:$0x1] (!%p299_p3), %v437_v11  ;;  %441 = vst [vmem:[#allocation2 + $0x3c] sm:$0x1] (!%p299_p3), %v440_v12 }
  0x10   : > { %v443_v16 = vsel %vm3373_vm2, 0, %v442_v13  ;;  %v446_v17 = vsel %vm3373_vm2, 0, %v445_v14  ;;  %v448_v18 = vld [vmem:[#allocation2 + $0x60] sm:$0x1]  ;;  %v451_v19 = vld [vmem:[#allocation2 + $0x6c] sm:$0x1] }
  0x11   : > { %444 = vst [vmem:[#allocation2 + $0x48] sm:$0x1] %v443_v16  ;;  %447 = vst [vmem:[#allocation2 + $0x54] sm:$0x1] %v446_v17  ;;  %v449_v20 = vsel %vm3373_vm2, 0, %v448_v18  ;;  %v452_v21 = vsel %vm3373_vm2, 0, %v451_v19 }
  0x12   : > { %v456_v22 = vld [vmem:[#allocation2 + $0x8] sm:$0x1]  ;;  %v459_v23 = vld [vmem:[#allocation2 + $0x14] sm:$0x1]  ;;  %450 = vst [vmem:[#allocation2 + $0x60] sm:$0x1] %v449_v20 }
  0x13   : > { %453 = vst [vmem:[#allocation2 + $0x6c] sm:$0x1] %v452_v21  ;;  %v457_v24 = vsel %vm3397_vm4, 0, %v456_v22  ;;  %v460_v25 = vsel %vm3397_vm4, 0, %v459_v23  ;;  %v462_v26 = vld [vmem:[#allocation2 + $0x20] sm:$0x1] }
  0x14   : > { %v465_v27 = vld [vmem:[#allocation2 + $0x2c] sm:$0x1]  ;;  %458 = vst [vmem:[#allocation2 + $0x8] sm:$0x1] %v457_v24  ;;  %461 = vst [vmem:[#allocation2 + $0x14] sm:$0x1] %v460_v25 }
  0x15   : > { %v463_v28 = vsel %vm3397_vm4, 0, %v462_v26  ;;  %v466_v29 = vsel %vm3397_vm4, 0, %v465_v27  ;;  %v468_v30 = vld [vmem:[#allocation2 + $0x38] sm:$0x1]  ;;  %v471_v31 = vld [vmem:[#allocation2 + $0x44] sm:$0x1] }
  0x16   : > { %464 = vst [vmem:[#allocation2 + $0x20] sm:$0x1] %v463_v28  ;;  %467 = vst [vmem:[#allocation2 + $0x2c] sm:$0x1] %v466_v29  ;;  %v469_v32 = vsel %vm3397_vm4, 0, %v468_v30  ;;  %v472_v33 = vsel %vm3397_vm4, 0, %v471_v31 }
  0x17   : > { %v474_v34 = vld [vmem:[#allocation2 + $0x50] sm:$0x1]  ;;  %v477_v35 = vld [vmem:[#allocation2 + $0x5c] sm:$0x1]  ;;  %470 = vst [vmem:[#allocation2 + $0x38] sm:$0x1] %v469_v32 }
  0x18   : > { %473 = vst [vmem:[#allocation2 + $0x44] sm:$0x1] %v472_v33  ;;  %v475_v36 = vsel %vm3397_vm4, 0, %v474_v34  ;;  %v478_v37 = vsel %vm3397_vm4, 0, %v477_v35  ;;  %v480_v38 = vld [vmem:[#allocation2 + $0x68] sm:$0x1] }
  0x19   : > { %v483_v39 = vld [vmem:[#allocation2 + $0x74] sm:$0x1]  ;;  %476 = vst [vmem:[#allocation2 + $0x50] sm:$0x1] %v475_v36  ;;  %479 = vst [vmem:[#allocation2 + $0x5c] sm:$0x1] %v478_v37 }
  0x1a   : > { %v481_v40 = vsel %vm3397_vm4, 0, %v480_v38  ;;  %v484_v41 = vsel %vm3397_vm4, 0, %v483_v39  ;;  %p368_p6 = scmp.lt.s32.totalorder %s3286_s22, 1  ;;  %p2674_p7 = scmp.lt.s32.totalorder %s3389_s29, 15  ;;  %vm488_vm5 = vsmask.f32 4368 }
  0x1b   : > { %482 = vst [vmem:[#allocation2 + $0x68] sm:$0x1] %v481_v40  ;;  %485 = vst [vmem:[#allocation2 + $0x74] sm:$0x1] %v484_v41  ;;  %s4144_s29 = smov (!%p366_p5, %s3389_s29), 0  ;;  %s393_s7 = sadd.s32 8, %s3384_s28 }
  0x1c   : > { %s4146_s22 = smov (!%p368_p6, %s3286_s22), 1  ;;  %s4148_s29 = smov (!%p2674_p7, %s4144_s29), 15  ;;  %vm510_vm6 = vcmask 27648   ;;  %v512_v51 = vld [vmem:[#allocation2] sm:$0xf]  ;;  %vm3460_vm8 = vmor %vm422_vm1, %vm488_vm5 }
  0x1d   : > { %s3434_s30 = sshll.u32 %s4146_s22, 5  ;;  %s2679_s8 = sshll.u32 %s4148_s29, 1  ;;  %vm3453_vm7 = vmand %vm510_vm6, %vm454_vm3  ;;  %v517_v53 = vld [vmem:[#allocation2 + $0x8] sm:$0x1]  ;;  %v727_v8 = vld [vmem:[#allocation2 + $0xc] sm:$0xf] }
  0x1e   : > { %p384_p8 = scmp.lt.s32.totalorder %s3384_s28, 15  ;;  %s374_s9 = sadd.s32 %s3434_s30, %s2679_s8  ;;  %v731_v9 = vld [vmem:[#allocation2 + $0x14] sm:$0x1]  ;;  %v734_v11 = vld [vmem:[#allocation2 + $0x18] sm:$0xf] }
  0x1f   : > { %p3439_p9 = scmp.lt.s32.totalorder %s393_s7, 15  ;;  %s2681_s11 = sshll.u32 %s374_s9, 2  ;;  %v543_v34 = vld [vmem:[#allocation2 + $0x6c] sm:$0xf] }
  0x20   : > { %s376_s14 = scalar_lea.vmem %s4113_s0, %s2681_s11  ;;  %s4150_s28 = smov (!%p384_p8, %s3384_s28), 15 }
  0x21   : > { %v486_v42 = vld [vmem:[%s376_s14] sm:$0xf]  ;;  %v487_v43 = vld [vmem:[%s376_s14 + $0x4] sm:$0xf]  ;;  %s4152_s7 = smov (!%p3439_p9, %s393_s7), 15  ;;  %s2683_s15 = sshll.u32 %s4150_s28, 1 }
  0x22   : > { %v491_v44 = vshrl.u32 %v486_v42, 16  ;;  %v494_v45 = vshll.u32 %v486_v42, 16  ;;  %v499_v46 = vshrl.u32 %v487_v43, 16  ;;  %v502_v47 = vshll.u32 %v487_v43, 16  ;;  %s388_s16 = sadd.s32 %s2683_s15, %s3434_s30  ;;  %s4154_s7 = smov (!%p3439_p9, %s4152_s7), 15 }
  0x23   : > { %s2685_s17 = sshll.u32 %s388_s16, 2  ;;  %s2696_s18 = sshll.u32 %s388_s16, 3  ;;  %v738_v43 = vld [vmem:[#allocation2 + $0x20] sm:$0x1] }
  0x24   : > { %v493_v49 = vrot.slane %v491_v44, 7  ;;  %v501_v50 = vrot.slane %v499_v46, 7  ;;  %s3467_s22 = scalar_lea.vmem %s4114_s1, %s2685_s17  ;;  %s3472_s8 = scalar_lea.vmem %s4119_s6, %s2696_s18  ;;  %v547_v44 = vld [vmem:[#allocation2 + $0x74] sm:$0x1] }
  0x25   : > { %v550_v58 = vld [vmem:[%s3467_s22] sm:$0xf]  ;;  %v551_v59 = vld [vmem:[%s3467_s22 + $0x4] sm:$0xf]  ;;  %v552_v0 = vld [vmem:[%s3467_s22 + $0x8] sm:$0xf] }
  0x26   : > { %v496_v54 = vor.u32 %v494_v45, %v493_v49  ;;  %v497_v55 = vrot.slane %v493_v49, 4  ;;  %v504_v56 = vor.u32 %v502_v47, %v501_v50  ;;  %v506_v57 = vrot.slane %v501_v50, 4  ;;  %v553_v2 = vld [vmem:[%s3467_s22 + $0xc] sm:$0xf]  ;;  %s2690_s9 = sshll.u32 %s4154_s7, 1  ;;  %p2697_p10 = scmp.ne.s32.totalorder %s3282_s21, 0 }
  0x27   : > { %v567_v63 = vshrl.u32 %v550_v58, 16  ;;  %v570_v3 = vshll.u32 %v550_v58, 16  ;;  %v575_v4 = vshrl.u32 %v551_v59, 16  ;;  %v578_v5 = vshll.u32 %v551_v59, 16  ;;  %s402_s10 = sadd.s32 %s2690_s9, %s3434_s30  ;;  %v554_v13 = vld [vmem:[%s3467_s22 + $0x10] sm:$0xf] }
  0x28   : > { %v513_v60 = vsel %vm3453_vm7, %v496_v54, %v512_v51  ;;  %v505_v61 = vsel %vm3460_vm8, %v497_v55, %v504_v56  ;;  %v518_v62 = vsel %vm3373_vm2, %v506_v57, %v517_v53  ;;  %v584_v6 = vshrl.u32 %v552_v0, 16  ;;  %s2692_s11 = sshll.u32 %s402_s10, 2  ;;  %v555_v22 = vld [vmem:[%s3467_s22 + $0x14] sm:$0xf]  ;;  %v556_v33 = vld [vmem:[%s3467_s22 + $0x18] sm:$0xf] }
  0x29   : > { %514 = vst [vmem:[#allocation2] sm:$0xf] %v513_v60  ;;  %516 = vst.msk [vmem:[#allocation2 + $0x4] sm:$0xf] %vm510_vm6, %v505_v61  ;;  %v569_v7 = vrot.slane %v567_v63, 7  ;;  %v587_v10 = vshll.u32 %v552_v0, 16  ;;  %s404_s13 = scalar_lea.vmem %s4115_s2, %s2692_s11 }
  0x2a   : > { %519 = vst [vmem:[#allocation2 + $0x8] sm:$0x1] %v518_v62  ;;  %v592_v12 = vshrl.u32 %v553_v2, 16  ;;  %v577_v14 = vrot.slane %v575_v4, 7  ;;  %v586_v15 = vrot.slane %v584_v6, 7  ;;  %v595_v16 = vshll.u32 %v553_v2, 16 }
  0x2b   : > { %v601_v17 = vshrl.u32 %v554_v13, 16  ;;  %v572_v18 = vor.u32 %v570_v3, %v569_v7  ;;  %v573_v19 = vrot.slane %v569_v7, 4  ;;  %v604_v21 = vshll.u32 %v554_v13, 16  ;;  %v520_v23 = vld [vmem:[%s404_s13] sm:$0xf] }
  0x2c   : > { %v594_v20 = vrot.slane %v592_v12, 7  ;;  %v521_v24 = vld [vmem:[%s404_s13 + $0x4] sm:$0xf]  ;;  %v580_v25 = vor.u32 %v578_v5, %v577_v14  ;;  %v582_v26 = vrot.slane %v577_v14, 4  ;;  %v589_v27 = vor.u32 %v587_v10, %v586_v15  ;;  %v557_v56 = vld [vmem:[%s3467_s22 + $0x1c] sm:$0xf] }
  0x2d   : > { %v590_v28 = vrot.slane %v586_v15, 4  ;;  %v523_v29 = vshrl.u32 %v520_v23, 16  ;;  %v526_v30 = vshll.u32 %v520_v23, 16  ;;  %v531_v31 = vshrl.u32 %v521_v24, 16  ;;  %v741_v55 = vld [vmem:[#allocation2 + $0x24] sm:$0xf] }
  0x2e   : > { %v534_v32 = vshll.u32 %v521_v24, 16  ;;  %v728_v35 = vsel %vm3453_vm7, %v572_v18, %v727_v8  ;;  %v581_v36 = vsel %vm3460_vm8, %v573_v19, %v580_v25  ;;  %v732_v37 = vsel %vm3373_vm2, %v582_v26, %v731_v9  ;;  %v558_v61 = vld [vmem:[%s3467_s22 + $0x20] sm:$0xf]  ;;  %v745_v3 = vld [vmem:[#allocation2 + $0x2c] sm:$0x1] }
  0x2f   : > { %v735_v38 = vsel %vm3453_vm7, %v589_v27, %v734_v11  ;;  %v525_v39 = vrot.slane %v523_v29, 7  ;;  %v533_v40 = vrot.slane %v531_v31, 7  ;;  %729 = vst [vmem:[#allocation2 + $0xc] sm:$0xf] %v728_v35  ;;  %730 = vst.msk [vmem:[#allocation2 + $0x10] sm:$0xf] %vm510_vm6, %v581_v36  ;;  %v597_v41 = vor.u32 %v595_v16, %v594_v20 }
  0x30   : > { %733 = vst [vmem:[#allocation2 + $0x14] sm:$0x1] %v732_v37  ;;  %736 = vst [vmem:[#allocation2 + $0x18] sm:$0xf] %v735_v38  ;;  %v599_v42 = vrot.slane %v594_v20, 4  ;;  %v603_v45 = vrot.slane %v601_v17, 7 }
  0x31   : > { %v609_v46 = vshrl.u32 %v555_v22, 16  ;;  %v612_v47 = vshll.u32 %v555_v22, 16  ;;  %v618_v49 = vshrl.u32 %v556_v33, 16  ;;  %v528_v50 = vor.u32 %v526_v30, %v525_v39  ;;  %v559_v8 = vld [vmem:[%s3467_s22 + $0x24] sm:$0xf] }
  0x32   : > { %v529_v51 = vrot.slane %v525_v39, 4  ;;  %v536_v53 = vor.u32 %v534_v32, %v533_v40  ;;  %v538_v54 = vrot.slane %v533_v40, 4  ;;  %v598_v57 = vsel %vm3460_vm8, %v590_v28, %v597_v41  ;;  %v748_v11 = vld [vmem:[#allocation2 + $0x30] sm:$0xf]  ;;  %v560_v18 = vld [vmem:[%s3467_s22 + $0x28] sm:$0xf] }
  0x33   : > { %v739_v58 = vsel %vm3373_vm2, %v599_v42, %v738_v43  ;;  %v606_v59 = vor.u32 %v604_v21, %v603_v45  ;;  %v607_v60 = vrot.slane %v603_v45, 4  ;;  %v544_v62 = vsel %vm3453_vm7, %v528_v50, %v543_v34  ;;  %737 = vst.msk [vmem:[#allocation2 + $0x1c] sm:$0xf] %vm510_vm6, %v598_v57  ;;  %v752_v21 = vld [vmem:[#allocation2 + $0x38] sm:$0x1] }
  0x34   : > { %v537_v63 = vsel %vm3460_vm8, %v529_v51, %v536_v53  ;;  %v548_v0 = vsel %vm3373_vm2, %v538_v54, %v547_v44  ;;  %740 = vst [vmem:[#allocation2 + $0x20] sm:$0x1] %v739_v58  ;;  %v611_v2 = vrot.slane %v609_v46, 7  ;;  %545 = vst [vmem:[#allocation2 + $0x6c] sm:$0xf] %v544_v62  ;;  %v620_v5 = vrot.slane %v618_v49, 7 }
  0x35   : > { %546 = vst.msk [vmem:[#allocation2 + $0x70] sm:$0xf] %vm510_vm6, %v537_v63  ;;  %549 = vst [vmem:[#allocation2 + $0x74] sm:$0x1] %v548_v0  ;;  %v742_v4 = vsel %vm3453_vm7, %v606_v59, %v741_v55  ;;  %v621_v6 = vshll.u32 %v556_v33, 16  ;;  %v626_v7 = vshrl.u32 %v557_v56, 16 }
  0x36   : > { %743 = vst [vmem:[#allocation2 + $0x24] sm:$0xf] %v742_v4  ;;  %v614_v9 = vor.u32 %v612_v47, %v611_v2  ;;  %v616_v10 = vrot.slane %v611_v2, 4  ;;  %v629_v12 = vshll.u32 %v557_v56, 16  ;;  %v635_v13 = vshrl.u32 %v558_v61, 16 }
  0x37   : > { %v623_v14 = vor.u32 %v621_v6, %v620_v5  ;;  %v624_v15 = vrot.slane %v620_v5, 4  ;;  %v628_v16 = vrot.slane %v626_v7, 7  ;;  %v638_v17 = vshll.u32 %v558_v61, 16  ;;  %v561_v24 = vld [vmem:[%s3467_s22 + $0x2c] sm:$0xf] }
  0x38   : > { %v615_v19 = vsel %vm3460_vm8, %v607_v60, %v614_v9  ;;  %v746_v20 = vsel %vm3373_vm2, %v616_v10, %v745_v3  ;;  %v637_v22 = vrot.slane %v635_v13, 7  ;;  %v643_v23 = vshrl.u32 %v559_v8, 16  ;;  %v755_v28 = vld [vmem:[#allocation2 + $0x3c] sm:$0xf]  ;;  %v562_v34 = vld [vmem:[%s3467_s22 + $0x30] sm:$0xf] }
  0x39   : > { %744 = vst.msk [vmem:[#allocation2 + $0x28] sm:$0xf] %vm510_vm6, %v615_v19  ;;  %747 = vst [vmem:[#allocation2 + $0x2c] sm:$0x1] %v746_v20  ;;  %v749_v25 = vsel %vm3453_vm7, %v623_v14, %v748_v11  ;;  %v631_v26 = vor.u32 %v629_v12, %v628_v16  ;;  %v633_v27 = vrot.slane %v628_v16, 4  ;;  %v646_v29 = vshll.u32 %v559_v8, 16 }
  0x3a   : > { %750 = vst [vmem:[#allocation2 + $0x30] sm:$0xf] %v749_v25  ;;  %v640_v30 = vor.u32 %v638_v17, %v637_v22  ;;  %v641_v31 = vrot.slane %v637_v22, 4  ;;  %v645_v32 = vrot.slane %v643_v23, 7  ;;  %v652_v33 = vshrl.u32 %v560_v18, 16 }
  0x3b   : > { %v632_v35 = vsel %vm3460_vm8, %v624_v15, %v631_v26  ;;  %v753_v36 = vsel %vm3373_vm2, %v633_v27, %v752_v21  ;;  %v759_v37 = vld [vmem:[#allocation2 + $0x44] sm:$0x1]  ;;  %v655_v38 = vshll.u32 %v560_v18, 16  ;;  %v660_v39 = vshrl.u32 %v561_v24, 16  ;;  %v762_v44 = vld [vmem:[#allocation2 + $0x48] sm:$0xf] }
  0x3c   : > { %751 = vst.msk [vmem:[#allocation2 + $0x34] sm:$0xf] %vm510_vm6, %v632_v35  ;;  %754 = vst [vmem:[#allocation2 + $0x38] sm:$0x1] %v753_v36  ;;  %v756_v40 = vsel %vm3453_vm7, %v640_v30, %v755_v28  ;;  %v648_v41 = vor.u32 %v646_v29, %v645_v32  ;;  %v650_v42 = vrot.slane %v645_v32, 4  ;;  %v654_v43 = vrot.slane %v652_v33, 7 }
  0x3d   : > { %v563_v45 = vld [vmem:[%s3467_s22 + $0x34] sm:$0xf]  ;;  %757 = vst [vmem:[#allocation2 + $0x3c] sm:$0xf] %v756_v40  ;;  %v662_v46 = vrot.slane %v660_v39, 7  ;;  %v663_v47 = vshll.u32 %v561_v24, 16 }
  0x3e   : > { %v669_v49 = vshrl.u32 %v562_v34, 16  ;;  %v672_v50 = vshll.u32 %v562_v34, 16  ;;  %v564_v51 = vld [vmem:[%s3467_s22 + $0x38] sm:$0xf]  ;;  %v649_v53 = vsel %vm3460_vm8, %v641_v31, %v648_v41  ;;  %v760_v54 = vsel %vm3373_vm2, %v650_v42, %v759_v37  ;;  %v766_v57 = vld [vmem:[#allocation2 + $0x50] sm:$0x1] }
  0x3f   : > { %v657_v55 = vor.u32 %v655_v38, %v654_v43  ;;  %v658_v56 = vrot.slane %v654_v43, 4  ;;  %758 = vst.msk [vmem:[#allocation2 + $0x40] sm:$0xf] %vm510_vm6, %v649_v53  ;;  %761 = vst [vmem:[#allocation2 + $0x44] sm:$0x1] %v760_v54  ;;  %v665_v58 = vor.u32 %v663_v47, %v662_v46  ;;  %v667_v59 = vrot.slane %v662_v46, 4 }
  0x40   : > { %v671_v60 = vrot.slane %v669_v49, 7  ;;  %v677_v61 = vshrl.u32 %v563_v45, 16  ;;  %v565_v62 = vld [vmem:[%s3467_s22 + $0x3c] sm:$0xf]  ;;  %v769_v0 = vld [vmem:[#allocation2 + $0x54] sm:$0xf] }
  0x41   : > { %v763_v63 = vsel %vm3453_vm7, %v657_v55, %v762_v44  ;;  %v680_v2 = vshll.u32 %v563_v45, 16  ;;  %v686_v3 = vshrl.u32 %v564_v51, 16  ;;  %v689_v4 = vshll.u32 %v564_v51, 16  ;;  %v773_v13 = vld [vmem:[#allocation2 + $0x5c] sm:$0x1] }
  0x42   : > { %764 = vst [vmem:[#allocation2 + $0x48] sm:$0xf] %v763_v63  ;;  %v666_v5 = vsel %vm3460_vm8, %v658_v56, %v665_v58  ;;  %v767_v6 = vsel %vm3373_vm2, %v667_v59, %v766_v57  ;;  %v674_v7 = vor.u32 %v672_v50, %v671_v60  ;;  %v675_v8 = vrot.slane %v671_v60, 4  ;;  %v776_v14 = vld [vmem:[#allocation2 + $0x60] sm:$0xf] }
  0x43   : > { %765 = vst.msk [vmem:[#allocation2 + $0x4c] sm:$0xf] %vm510_vm6, %v666_v5  ;;  %768 = vst [vmem:[#allocation2 + $0x50] sm:$0x1] %v767_v6  ;;  %v679_v9 = vrot.slane %v677_v61, 7  ;;  %v688_v10 = vrot.slane %v686_v3, 7 }
  0x44   : > { %v694_v11 = vshrl.u32 %v565_v62, 16  ;;  %v770_v12 = vsel %vm3453_vm7, %v674_v7, %v769_v0  ;;  %v697_v15 = vshll.u32 %v565_v62, 16  ;;  %v780_v24 = vld [vmem:[#allocation2 + $0x68] sm:$0x1]  ;;  %v787_v29 = vld [vmem:[#allocation2] sm:$0xf] (!%p2697_p10) }
  0x45   : > { %771 = vst [vmem:[#allocation2 + $0x54] sm:$0xf] %v770_v12  ;;  %v682_v16 = vor.u32 %v680_v2, %v679_v9  ;;  %v684_v17 = vrot.slane %v679_v9, 4  ;;  %v691_v18 = vor.u32 %v689_v4, %v688_v10  ;;  %v692_v19 = vrot.slane %v688_v10, 4  ;;  %786 = sbr.rel (%p2697_p10) target bundleno = 76 (0x4c), region = 48 }
  0x46   : > { %v696_v20 = vrot.slane %v694_v11, 7  ;;  %v791_v30 = vld [vmem:[#allocation2 + $0x8] sm:$0x1] (!%p2697_p10)  ;;  %v788_v31 = vsel (!%p2697_p10), %vm3453_vm7, 0, %v787_v29  ;;  %v3300_v32 = vmov (!%p2697_p10), 0  }
  0x47   : > { %v683_v21 = vsel %vm3460_vm8, %v675_v8, %v682_v16  ;;  %v774_v22 = vsel %vm3373_vm2, %v684_v17, %v773_v13  ;;  %v777_v23 = vsel %vm3453_vm7, %v691_v18, %v776_v14  ;;  %790 = vst.msk [vmem:[#allocation2 + $0x4] sm:$0xf] (!%p2697_p10), %vm510_vm6, %v3300_v32  ;;  %v792_v52 = vsel (!%p2697_p10), %vm3373_vm2, 0, %v791_v30  ;;  %789 = vst [vmem:[#allocation2] sm:$0xf] (!%p2697_p10), %v788_v31 }
  0x48   : > { %772 = vst.msk [vmem:[#allocation2 + $0x58] sm:$0xf] %vm510_vm6, %v683_v21  ;;  %775 = vst [vmem:[#allocation2 + $0x5c] sm:$0x1] %v774_v22  ;;  %v699_v25 = vor.u32 %v697_v15, %v696_v20  ;;  %v701_v26 = vrot.slane %v696_v20, 4 }
  0x49   : > { %778 = vst [vmem:[#allocation2 + $0x60] sm:$0xf] %v777_v23  ;;  %793 = vst [vmem:[#allocation2 + $0x8] sm:$0x1] (!%p2697_p10), %v792_v52 }
  0x4a   : > { %v700_v27 = vsel %vm3460_vm8, %v692_v19, %v699_v25  ;;  %v781_v28 = vsel %vm3373_vm2, %v701_v26, %v780_v24 }
  0x4b   : > { %779 = vst.msk [vmem:[#allocation2 + $0x64] sm:$0xf] %vm510_vm6, %v700_v27  ;;  %782 = vst [vmem:[#allocation2 + $0x68] sm:$0x1] %v781_v28 }
  0x4c PF: > { %p2698_p11 = scmp.ne.s32.totalorder %s3282_s21, 1 }
  0x4d   : > { %v798_v33 = vld [vmem:[#allocation2 + $0x6c] sm:$0xf] (!%p2698_p11)  ;;  %v802_v34 = vld [vmem:[#allocation2 + $0x74] sm:$0x1] (!%p2698_p11)  ;;  %v3301_v36 = vmov (!%p2698_p11), 0  }
  0x4e   : > { %797 = sbr.rel (%p2698_p11) target bundleno = 85 (0x55), region = 52  ;;  %v799_v35 = vsel (!%p2698_p11), %vm3453_vm7, 0, %v798_v33  ;;  %801 = vst.msk [vmem:[#allocation2 + $0x70] sm:$0xf] (!%p2698_p11), %vm510_vm6, %v3301_v36  ;;  %v803_v37 = vsel (!%p2698_p11), %vm3373_vm2, 0, %v802_v34 }
  0x4f   : > { %800 = vst [vmem:[#allocation2 + $0x6c] sm:$0xf] (!%p2698_p11), %v799_v35  ;;  %804 = vst [vmem:[#allocation2 + $0x74] sm:$0x1] (!%p2698_p11), %v803_v37 }
  0x55 PF: > { %v2699_v38 = vld [vmem:[%s4116_s3 + $0x6] sm:$0x3]  ;;  %vm893_vm9 = vcmask 1041408   ;;  %v3582_v39 = vld [vmem:[#allocation2 + $0xc] sm:$0xff]   ;;  %vm868_vm10 = vcmask 31744   ;;  %v3588_v1 = vld [vmem:[#allocation2 + $0x18] sm:$0xff]  }
  0x56   : > { %3198 = vmatprep.subr.msk.bf16.mxu1 %vm893_vm9, %v2699_v38  ;;  %v895_v48 = vsel %vm893_vm9, %v2699_v38, 0  ;;  %2908 = vmatprep.mubr.msk.bf16.mxu1 %vm868_vm10, %v3582_v39  ;;  %v3593_v40 = vld [vmem:[%s4116_s3 + $0x8] sm:$0x3]  ;;  %v825_v43 = vld [vmem:[%s4116_s3] sm:$0x3]  ;;  %v3623_v59 = vld [vmem:[#allocation2 + $0x30] sm:$0xff]  }
  0x57   : > { %2907 = vmatpush3.bf16.msra.mxu1 %v895_v48  ;;  %3202 = vmatprep.subr.msk.bf16.mxu0 %vm893_vm9, %v3593_v40  ;;  %v3599_v41 = vsel %vm893_vm9, %v3593_v40, 0  ;;  %v3601_v42 = vld [vmem:[#allocation2 + $0x24] sm:$0xff]   ;;  %v1231_v44 = vld [vmem:[#allocation2 + $0xc] sm:$0xf]  ;;  %v3607_v45 = vld [vmem:[#allocation2 + $0x10] sm:$0xf] }
  0x58   : > { %2979 = vmatpush3.bf16.msra.mxu0 %v3599_v41  ;;  %3199 = vmatprep.subr.msk.bf16.mxu1 %vm893_vm9, %v825_v43  ;;  %v3612_v46 = vld [vmem:[#allocation2 + $0x14] sm:$0x1]  ;;  %vm1258_vm11 = vsmask.f32 3328  ;;  %v1286_v47 = vshrl.u32 %v1231_v44, 16  ;;  %v1289_v49 = vshll.u32 %v1231_v44, 16 }
  0x59   : > { %v1295_v50 = vshll.u32 %v3607_v45, 16  ;;  %v1299_v51 = vshrl.u32 %v3607_v45, 16  ;;  %vm1259_vm12 = vsmask.f32 7440  ;;  %v1305_v53 = vshll.u32 %v3612_v46, 16  ;;  %v3637_v8 = vld [vmem:[#allocation2 + $0x3c] sm:$0xff]  }
  0x5a   : > { %2909 = vmatmul.mubr.msk.bf16.vlgmr.msra.gmra.mrb[0].mxu1 %vm868_vm10, %v3588_v1  ;;  %v2762_v54 = vld [vmem:[%s4116_s3 + $0xe] sm:$0x3]  ;;  %v1288_v55 = vrot.slane %v1286_v47, 4  ;;  %v1291_v56 = vrot.slane %v1289_v49, 5  ;;  %v1003_v63 = vsel %vm893_vm9, %v825_v43, 0  ;;  %vm3630_vm13 = vmor %vm1258_vm11, %vm1259_vm12  ;;  %v3663_v35 = vld [vmem:[#allocation2 + $0x54] sm:$0xff]  }
  0x5b   : > { %2912 = vmatprep.mubr.msk.bf16.mxu1 %vm868_vm10, %v3601_v42  ;;  %v1297_v57 = vrot.slane %v1295_v50, 5  ;;  %v1301_v58 = vrot.slane %v1299_v51, 4  ;;  %3204 = vmatprep.subr.msk.bf16.mxu0 %vm893_vm9, %v2762_v54  ;;  %v1307_v62 = vrot.slane %v1305_v53, 5  ;;  %v1234_v0 = vld [vmem:[#allocation2 + $0x18] sm:$0xf]  ;;  %v1800_v19 = vsel %vm893_vm9, %v2762_v54, 0 }
  0x5c   : > { %v1292_v60 = vor.u32 %v1291_v56, %v1288_v55  ;;  %v3626_v2 = vld [vmem:[#allocation2 + $0x1c] sm:$0xf]  ;;  %2925 = vmatpush3.bf16.msra.mxu1 %v1003_v63  ;;  %v3634_v4 = vld [vmem:[#allocation2 + $0x20] sm:$0x1]  ;;  %v1310_v5 = vshrl.u32 %v1234_v0, 16  ;;  %v1313_v6 = vshll.u32 %v1234_v0, 16 }
  0x5d   : > { %v1302_v61 = vor.u32 %v1301_v58, %v1297_v57  ;;  %v1319_v7 = vshll.u32 %v3626_v2, 16  ;;  %v1323_v11 = vshrl.u32 %v3626_v2, 16  ;;  %v1329_v15 = vshll.u32 %v3634_v4, 16  ;;  %v1237_v20 = vld [vmem:[#allocation2 + $0x24] sm:$0xf]  ;;  %v3658_v31 = vld [vmem:[#allocation2 + $0x48] sm:$0xff]  }
  0x5e   : > { %v1293_v9 = vrot.slane %v1292_v60, 4  ;;  %v1312_v12 = vrot.slane %v1310_v5, 4  ;;  %v1315_v13 = vrot.slane %v1313_v6, 5  ;;  %v3650_v21 = vld [vmem:[#allocation2 + $0x28] sm:$0xf]  ;;  %v1334_v26 = vshrl.u32 %v1237_v20, 16 }
  0x5f   : > { %v1303_v10 = vrot.slane %v1302_v61, 4  ;;  %v1321_v14 = vrot.slane %v1319_v7, 5  ;;  %v1325_v18 = vrot.slane %v1323_v11, 4  ;;  %v1331_v24 = vrot.slane %v1329_v15, 5  ;;  %v3654_v25 = vld [vmem:[#allocation2 + $0x2c] sm:$0x1] }
  0x60   : > { %v1298_v16 = vsel %vm3630_vm13, %v1293_v9, %v1297_v57  ;;  %v1316_v23 = vor.u32 %v1315_v13, %v1312_v12  ;;  %v1337_v28 = vshll.u32 %v1237_v20, 16  ;;  %v1343_v29 = vshll.u32 %v3650_v21, 16  ;;  %v1240_v34 = vld [vmem:[#allocation2 + $0x30] sm:$0xf]  ;;  %v3665_v43 = vld [vmem:[#allocation2 + $0x34] sm:$0xf] }
  0x61   : > { %v1308_v17 = vsel %vm3630_vm13, %v1303_v10, %v1307_v62  ;;  %v1326_v27 = vor.u32 %v1325_v18, %v1321_v14  ;;  %v1347_v30 = vshrl.u32 %v3650_v21, 16  ;;  %v1336_v52 = vrot.slane %v1334_v26, 4  ;;  %v3669_v49 = vld [vmem:[#allocation2 + $0x38] sm:$0x1]  ;;  %v2780_v62 = vld [vmem:[%s4116_s3 + $0x4] sm:$0x3] }
  0x62   : > { %2913 = vmatmul.mubr.msk.bf16.gmra.mrb[4].mxu1 %vm868_vm10, %v3623_v59  ;;  %v3652_v22 = vcombine.low %v1298_v16, %v1308_v17  ;;  %v1317_v32 = vrot.slane %v1316_v23, 4  ;;  %v1353_v33 = vshll.u32 %v3654_v25, 16  ;;  %v1339_v37 = vrot.slane %v1337_v28, 5  ;;  %v1243_v13 = vld [vmem:[#allocation2 + $0x3c] sm:$0xf]  ;;  %v3694_v17 = vld [vmem:[#allocation2 + $0x60] sm:$0xff]  }
  0x63   : > { %2916 = vmatprep.mubr.msk.bf16.mxu1 %vm868_vm10, %v3637_v8  ;;  %v1327_v36 = vrot.slane %v1326_v27, 4  ;;  %v1345_v38 = vrot.slane %v1343_v29, 5  ;;  %v1349_v48 = vrot.slane %v1347_v30, 4  ;;  %v1358_v50 = vshrl.u32 %v1240_v34, 16  ;;  %v3696_v18 = vld [vmem:[#allocation2 + $0x40] sm:$0xf] }
  0x64   : > { %2980 = vmatprep.mubr.msk.bf16.mxu0 %vm868_vm10, %v3652_v22  ;;  %v1322_v44 = vsel %vm3630_vm13, %v1317_v32, %v1321_v14  ;;  %v1355_v47 = vrot.slane %v1353_v33, 5  ;;  %v1361_v51 = vshll.u32 %v1240_v34, 16  ;;  %v1340_v54 = vor.u32 %v1339_v37, %v1336_v52  ;;  %v2725_v27 = vld [vmem:[%s4116_s3 + $0xc] sm:$0x3]  ;;  %v1246_v32 = vld [vmem:[#allocation2 + $0x48] sm:$0xf] }
  0x65   : > { %v1332_v53 = vsel %vm3630_vm13, %v1327_v36, %v1331_v24  ;;  %v1350_v55 = vor.u32 %v1349_v48, %v1345_v38  ;;  %v1367_v56 = vshll.u32 %v3665_v43, 16  ;;  %v1360_v58 = vrot.slane %v1358_v50, 4  ;;  %3200 = vmatprep.subr.msk.bf16.mxu1 %vm893_vm9, %v2725_v27  ;;  %v3708_v52 = vld [vmem:[#allocation2 + $0x4c] sm:$0xf]  ;;  %v3710_v33 = vld [vmem:[#allocation2 + $0x44] sm:$0x1] }
  0x66   : > { %v3674_v57 = vcombine.low %v1322_v44, %v1332_v53  ;;  %v1363_v60 = vrot.slane %v1361_v51, 5  ;;  %v1371_v61 = vshrl.u32 %v3665_v43, 16  ;;  %v1341_v63 = vrot.slane %v1340_v54, 4  ;;  %v3718_v48 = vld [vmem:[#allocation2 + $0x50] sm:$0x1] }
  0x67   : > { %v1351_v0 = vrot.slane %v1350_v55, 4  ;;  %v1369_v5 = vrot.slane %v1367_v56, 5  ;;  %v1377_v6 = vshll.u32 %v3669_v49, 16  ;;  %v1382_v20 = vshrl.u32 %v1243_v13, 16  ;;  %v1249_v55 = vld [vmem:[#allocation2 + $0x54] sm:$0xf] }
  0x68   : > { %2981 = vmatmul.mubr.msk.bf16.vlgmr.msra.gmra.mrb[0].mxu0 %vm868_vm10, %v3674_v57  ;;  %v1364_v7 = vor.u32 %v1363_v60, %v1360_v58  ;;  %v1373_v9 = vrot.slane %v1371_v61, 4  ;;  %v1346_v10 = vsel %vm3630_vm13, %v1341_v63, %v1345_v38  ;;  %v1385_v23 = vshll.u32 %v1243_v13, 16  ;;  %v3728_v63 = vld [vmem:[#allocation2 + $0x58] sm:$0xf] }
  0x69   : > { %2997 = vmatpush3.bf16.msra.mxu0 %v1800_v19  ;;  %v1356_v11 = vsel %vm3630_vm13, %v1351_v0, %v1355_v47  ;;  %v1379_v12 = vrot.slane %v1377_v6, 5  ;;  %v3258_v19 = vld [vmem:[#allocation2] sm:$0xff]   ;;  %v1391_v24 = vshll.u32 %v3696_v18, 16  ;;  %v1395_v26 = vshrl.u32 %v3696_v18, 16 }
  0x6a   : > { %2917 = vmatmul.mubr.msk.bf16.gmra.mrb[8].mxu1 %vm868_vm10, %v3658_v31  ;;  %v3691_v14 = vcombine.low %v1346_v10, %v1356_v11  ;;  %v1365_v15 = vrot.slane %v1364_v7, 4  ;;  %v1374_v16 = vor.u32 %v1373_v9, %v1369_v5  ;;  %3205 = vmatprep.subr.msk.bf16.mxu0 %vm893_vm9, %v2780_v62  ;;  %v1384_v30 = vrot.slane %v1382_v20, 4 }
  0x6b   : > { %2920 = vmatprep.mubr.msk.bf16.mxu1 %vm868_vm10, %v3663_v35  ;;  %v1387_v34 = vrot.slane %v1385_v23, 5  ;;  %v3712_v36 = vrot.slane %v1391_v24, 5  ;;  %v1397_v37 = vrot.slane %v1395_v26, 4  ;;  %v1406_v44 = vshrl.u32 %v1246_v32, 16  ;;  %v3740_v26 = vld [vmem:[#allocation2 + $0x64] sm:$0xf] }
  0x6c   : > { %2984 = vmatprep.mubr.msk.bf16.mxu0 %vm868_vm10, %v3691_v14  ;;  %v1370_v28 = vsel %vm3630_vm13, %v1365_v15, %v1369_v5  ;;  %v1375_v29 = vrot.slane %v1374_v16, 4  ;;  %v1409_v47 = vshll.u32 %v1246_v32, 16  ;;  %v1415_v50 = vshll.u32 %v3708_v52, 16  ;;  %v1252_v16 = vld [vmem:[#allocation2 + $0x60] sm:$0xf] }
  0x6d   : > { %v1388_v53 = vor.u32 %v1387_v34, %v1384_v30  ;;  %v1419_v54 = vshrl.u32 %v3708_v52, 16  ;;  %v1401_v56 = vshll.u32 %v3710_v33, 16  ;;  %v1408_v58 = vrot.slane %v1406_v44, 4  ;;  %v3742_v30 = vld [vmem:[#allocation2 + $0x5c] sm:$0x1] }
  0x6e   : > { %v1380_v38 = vsel %vm3630_vm13, %v1375_v29, %v1379_v12  ;;  %v1411_v60 = vrot.slane %v1409_v47, 5  ;;  %v3726_v61 = vrot.slane %v1415_v50, 5  ;;  %v1398_v0 = vor.u32 %v1397_v37, %v3712_v36 }
  0x6f   : > { %v3721_v51 = vcombine.low %v1370_v28, %v1380_v38  ;;  %v1421_v5 = vrot.slane %v1419_v54, 4  ;;  %v1425_v6 = vshll.u32 %v3718_v48, 16  ;;  %v1430_v9 = vshrl.u32 %v1249_v55, 16  ;;  %v3749_v38 = vld [vmem:[#allocation2 + $0x68] sm:$0x1] }
  0x70   : > { %v1412_v7 = vor.u32 %v1411_v60, %v1408_v58  ;;  %v1433_v10 = vshll.u32 %v1249_v55, 16  ;;  %v2059_v11 = vsel %vm893_vm9, %v2780_v62, 0  ;;  %v1389_v12 = vrot.slane %v1388_v53, 4  ;;  %v1255_v54 = vld [vmem:[#allocation2 + $0x6c] sm:$0xf] }
  0x71   : > { %2985 = vmatmul.mubr.msk.bf16.gmra.mrb[4].mxu0 %vm868_vm10, %v3721_v51  ;;  %v1422_v13 = vor.u32 %v1421_v5, %v3726_v61  ;;  %v1439_v15 = vshll.u32 %v3728_v63, 16  ;;  %v1403_v20 = vrot.slane %v1401_v56, 5  ;;  %v1432_v23 = vrot.slane %v1430_v9, 4  ;;  %v3757_v55 = vld [vmem:[#allocation2 + $0x70] sm:$0xf] }
  0x72   : > { %2921 = vmatmul.mubr.msk.bf16.gmra.mrb[12].mxu1 %vm868_vm10, %v3694_v17  ;;  %2998 = vmatprep.mubr.msk.bf16.mxu0 %vm868_vm10, %v3674_v57  ;;  %v1435_v24 = vrot.slane %v1433_v10, 5  ;;  %v1399_v28 = vrot.slane %v1398_v0, 4  ;;  %v1427_v29 = vrot.slane %v1425_v6, 5  ;;  %v1443_v62 = vshrl.u32 %v3728_v63, 16  ;;  %v3763_v0 = vld [vmem:[%s4116_s3 + $0xa] sm:$0x3] }
  0x73   : > { %2926 = vmatprep.mubr.msk.bf16.mxu1 %vm868_vm10, %v3258_v19  ;;  %v1113_v19 = vsel %vm893_vm9, %v2725_v27, 0  ;;  %v3744_v32 = vrot.slane %v1439_v15, 5  ;;  %v1413_v34 = vrot.slane %v1412_v7, 4  ;;  %v1423_v37 = vrot.slane %v1422_v13, 4  ;;  %v3781_v15 = vld [vmem:[%s4116_s3 + $0x2] sm:$0x3] }
  0x74   : > { %v1620_v27 = vshrl.u32 %v1252_v16, 16  ;;  %v1623_v44 = vshll.u32 %v1252_v16, 16  ;;  %v1394_v47 = vsel %vm3630_vm13, %v1389_v12, %v3712_v36  ;;  %v1445_v50 = vrot.slane %v1443_v62, 4 }
  0x75   : > { %v1629_v53 = vshll.u32 %v3740_v26, 16  ;;  %v1449_v56 = vshll.u32 %v3742_v30, 16  ;;  %v1404_v36 = vsel %vm3630_vm13, %v1399_v28, %v1403_v20  ;;  %v1633_v7 = vshrl.u32 %v3740_v26, 16 }
  0x76   : > { %v1622_v58 = vrot.slane %v1620_v27, 4  ;;  %v1625_v60 = vrot.slane %v1623_v44, 5  ;;  %v1446_v5 = vor.u32 %v1445_v50, %v3744_v32  ;;  %v1418_v9 = vsel %vm3630_vm13, %v1413_v34, %v3726_v61 }
  0x77   : > { %v1631_v6 = vrot.slane %v1629_v53, 5  ;;  %v1428_v10 = vsel %vm3630_vm13, %v1423_v37, %v1427_v29  ;;  %v1768_v12 = vshrl.u32 %v1255_v54, 16  ;;  %v1771_v13 = vshll.u32 %v1255_v54, 16 }
  0x78   : > { %v1626_v16 = vor.u32 %v1625_v60, %v1622_v58  ;;  %v1635_v20 = vrot.slane %v1633_v7, 4  ;;  %v3789_v61 = vcombine.low %v1394_v47, %v1404_v36  ;;  %v1781_v28 = vshrl.u32 %v3757_v55, 16 }
  0x79   : > { %2999 = vmatmul.mubr.msk.bf16.vlgmr.msra.gmra.mrb[0].mxu0 %vm868_vm10, %v3691_v14  ;;  %v1447_v29 = vrot.slane %v1446_v5, 4  ;;  %v1770_v34 = vrot.slane %v1768_v12, 4  ;;  %v1773_v37 = vrot.slane %v1771_v13, 5  ;;  %v3792_v27 = vcombine.low %v1418_v9, %v1428_v10  ;;  %v3817_v13 = vld [vmem:[#allocation2 + $0x8] sm:$0x1] }
  0x7a   : > { %2927 = vmatmul.mubr.msk.bf16.vlgmr.msra.gmra.mrb[0].mxu1 %vm868_vm10, %v3582_v39  ;;  %v1436_v39 = vor.u32 %v1435_v24, %v1432_v23  ;;  %3015 = vmatpush3.bf16.msra.mxu0 %v2059_v11  ;;  %v1639_v11 = vshll.u32 %v3749_v38, 16  ;;  %v1451_v24 = vrot.slane %v1449_v56, 5  ;;  %v1636_v62 = vor.u32 %v1635_v20, %v1631_v6  ;;  %v3800_v56 = vld [vmem:[#allocation2 + $0x4] sm:$0xf] }
  0x7b   : > { %2930 = vmatprep.mubr.msk.bf16.mxu1 %vm868_vm10, %v3588_v1  ;;  %2943 = vmatpush3.bf16.msra.mxu1 %v1113_v19  ;;  %v1777_v19 = vshll.u32 %v3757_v55, 16  ;;  %v1783_v50 = vrot.slane %v1781_v28, 4  ;;  %v1627_v47 = vrot.slane %v1626_v16, 4  ;;  %v1774_v36 = vor.u32 %v1773_v37, %v1770_v34  ;;  %v1916_v34 = vld [vmem:[#allocation2 + $0xc] sm:$0xe] }
  0x7c   : > { %3002 = vmatprep.mubr.msk.bf16.mxu0 %vm868_vm10, %v3721_v51  ;;  %3206 = vmatprep.subr.msk.bf16.mxu0 %vm893_vm9, %v3763_v0  ;;  %v1437_v23 = vrot.slane %v1436_v39, 4  ;;  %v1637_v53 = vrot.slane %v1636_v62, 4  ;;  %v1641_v54 = vrot.slane %v1639_v11, 5  ;;  %v3798_v39 = vld [vmem:[#allocation2 + $0x74] sm:$0x1]  ;;  %v1452_v60 = vsel %vm3630_vm13, %v1447_v29, %v1451_v24 }
  0x7d   : > { %3201 = vmatprep.subr.msk.bf16.mxu1 %vm893_vm9, %v3781_v15  ;;  %v1779_v44 = vrot.slane %v1777_v19, 5  ;;  %v1787_v7 = vshll.u32 %v3798_v39, 16  ;;  %v1632_v9 = vsel %vm3630_vm13, %v1627_v47, %v1631_v6  ;;  %v1954_v12 = vrot.slane %v3800_v56, 5 }
  0x7e   : > { %v1442_v58 = vsel %vm3630_vm13, %v1437_v23, %v3744_v32  ;;  %v1642_v10 = vsel %vm3630_vm13, %v1637_v53, %v1641_v54  ;;  %v1915_v32 = vld [vmem:[#allocation2] sm:$0xe]  ;;  %vm1949_vm14 = vcmask 1042432   ;;  %vm1950_vm15 = vcmask 1046532   ;;  %v1917_v54 = vld [vmem:[#allocation2 + $0x18] sm:$0xe] }
  0x7f   : > { %v1784_v5 = vor.u32 %v1783_v50, %v1779_v44  ;;  %v3819_v16 = vcombine.low %v1442_v58, %v1452_v60  ;;  %v3821_v20 = vcombine.low %v1632_v9, %v1642_v10  ;;  %v1775_v11 = vrot.slane %v1774_v36, 4  ;;  %vm3828_vm0 = vmor %vm1949_vm14, %vm1950_vm15  ;;  %v1923_v58 = vld [vmem:[#allocation2 + $0x60] sm:$0xe] }
  0x80   : > { %v1789_v6 = vrot.slane %v1787_v7, 5  ;;  %v2772_v23 = vrot.slane %v1915_v32, 9  ;;  %v1956_v24 = vrot.slane %v1954_v12, 4  ;;  %v1957_v28 = vrot.slane %v3817_v13, 5 }
  0x81   : > { %3003 = vmatmul.mubr.msk.bf16.gmra.mrb[4].mxu0 %vm868_vm10, %v3789_v61  ;;  %v1785_v19 = vrot.slane %v1784_v5, 4  ;;  %v1961_v62 = vrot.slane %v3607_v45, 5  ;;  %v1780_v37 = vsel %vm3630_vm13, %v1775_v11, %v1779_v44  ;;  %v1968_v45 = vrot.slane %v3626_v2, 5  ;;  %v1924_v44 = vld [vmem:[#allocation2 + $0x6c] sm:$0xe] }
  0x82   : > { %2931 = vmatmul.mubr.msk.bf16.gmra.mrb[4].mxu1 %vm868_vm10, %v3601_v42  ;;  %3006 = vmatprep.mubr.msk.bf16.mxu0 %vm868_vm10, %v3792_v27  ;;  %v1955_v47 = vsel %vm3828_vm0, %v2772_v23, %v1954_v12  ;;  %v1958_v53 = vsel %vm3828_vm0, %v1956_v24, %v1957_v28  ;;  %v2773_v60 = vrot.slane %v1916_v34, 9  ;;  %v1964_v5 = vrot.slane %v3612_v46, 5 }
  0x83   : > { %2934 = vmatprep.mubr.msk.bf16.mxu1 %vm868_vm10, %v3623_v59  ;;  %v1790_v50 = vsel %vm3630_vm13, %v1785_v19, %v1789_v6  ;;  %v1963_v36 = vrot.slane %v1961_v62, 4  ;;  %v2781_v9 = vcombine.low %v1955_v47, %v1958_v53  ;;  %v2774_v10 = vrot.slane %v1917_v54, 9 }
  0x84   : > { %v2763_v7 = vcombine.low %v1780_v37, %v1790_v50  ;;  %v1970_v12 = vrot.slane %v1968_v45, 4  ;;  %v1971_v32 = vrot.slane %v3634_v4, 5  ;;  %v2797_v2 = vrot.slane %v1923_v58, 9  ;;  %v1919_v50 = vld [vmem:[#allocation2 + $0x30] sm:$0xe] }
  0x85   : > { %v2179_v11 = vrot.slane %v3740_v26, 5  ;;  %v1962_v19 = vsel %vm3828_vm0, %v2773_v60, %v1961_v62  ;;  %v1965_v46 = vsel %vm3828_vm0, %v1963_v36, %v1964_v5  ;;  %v2182_v6 = vrot.slane %v3749_v38, 5  ;;  %v1228_v58 = vld [vmem:[#allocation2] sm:$0xf] }
  0x86   : > { %v2808_v23 = vrot.slane %v1924_v44, 9  ;;  %v1975_v24 = vrot.slane %v3650_v21, 5  ;;  %v2313_v28 = vrot.slane %v3757_v55, 5  ;;  %v1969_v62 = vsel %vm3828_vm0, %v2774_v10, %v1968_v45 }
  0x87   : > { %v2180_v4 = vsel %vm3828_vm0, %v2797_v2, %v2179_v11  ;;  %v2181_v26 = vrot.slane %v2179_v11, 4  ;;  %v1972_v34 = vsel %vm3828_vm0, %v1970_v12, %v1971_v32  ;;  %v1982_v38 = vrot.slane %v3665_v43, 5  ;;  %v1920_v11 = vld [vmem:[#allocation2 + $0x3c] sm:$0xe] }
  0x88   : > { %v2316_v37 = vrot.slane %v3798_v39, 5  ;;  %v1504_v21 = vsel %vm893_vm9, %v3781_v15, 0  ;;  %v3876_v55 = vsel %vm3828_vm0, %v2808_v23, %v2313_v28  ;;  %v2315_v53 = vrot.slane %v2313_v28, 4 }
  0x89   : > { %3007 = vmatmul.mubr.msk.bf16.gmra.mrb[8].mxu0 %vm868_vm10, %v3819_v16  ;;  %v2183_v47 = vsel %vm3828_vm0, %v2181_v26, %v2182_v6  ;;  %v3878_v45 = vcombine.low %v1962_v19, %v1965_v46  ;;  %v2193_v54 = vsel %vm893_vm9, %v3763_v0, 0  ;;  %v3884_v60 = vcombine.low %v1969_v62, %v1972_v34  ;;  %v1921_v46 = vld [vmem:[#allocation2 + $0x48] sm:$0xe] }
  0x8a   : > { %2935 = vmatmul.mubr.msk.bf16.gmra.mrb[8].mxu1 %vm868_vm10, %v3637_v8  ;;  %3010 = vmatprep.mubr.msk.bf16.mxu0 %vm868_vm10, %v3821_v20  ;;  %v3882_v39 = vcombine.low %v2180_v4, %v2183_v47  ;;  %v1977_v15 = vrot.slane %v1975_v24, 4  ;;  %v1978_v36 = vrot.slane %v3654_v25, 5  ;;  %v3891_v5 = vsel %vm3828_vm0, %v2315_v53, %v2316_v37  ;;  %v1922_v47 = vld [vmem:[#allocation2 + $0x54] sm:$0xe] }
  0x8b   : > { %2938 = vmatprep.mubr.msk.bf16.mxu1 %vm868_vm10, %v3658_v31  ;;  %v2776_v0 = vrot.slane %v1919_v50, 9  ;;  %v2810_v44 = vcombine.low %v3876_v55, %v3891_v5  ;;  %v1262_v25 = vshrl.u32 %v1228_v58, 16  ;;  %v1265_v10 = vshll.u32 %v1228_v58, 16 }
  0x8c   : > { %v1271_v12 = vshll.u32 %v3800_v56, 16  ;;  %v1275_v32 = vshrl.u32 %v3800_v56, 16  ;;  %v1989_v2 = vrot.slane %v3696_v18, 5  ;;  %v1996_v19 = vrot.slane %v3708_v52, 5 }
  0x8d   : > { %v1983_v56 = vsel %vm3828_vm0, %v2776_v0, %v1982_v38  ;;  %v1264_v6 = vrot.slane %v1262_v25, 4  ;;  %v1267_v23 = vrot.slane %v1265_v10, 5  ;;  %v2777_v26 = vrot.slane %v1920_v11, 9 }
  0x8e   : > { %v1991_v28 = vrot.slane %v1989_v2, 4  ;;  %v1992_v62 = vrot.slane %v3710_v33, 5  ;;  %v2778_v52 = vrot.slane %v1921_v46, 9  ;;  %v1998_v34 = vrot.slane %v1996_v19, 4 }
  0x8f   : > { %v1268_v37 = vor.u32 %v1267_v23, %v1264_v6  ;;  %v2003_v33 = vrot.slane %v3728_v63, 5 }
  0x91   : > { %3011 = vmatmul.mubr.msk.bf16.gmra.mrb[12].mxu0 %vm868_vm10, %v2763_v7  ;;  %v1984_v7 = vrot.slane %v1982_v38, 4  ;;  %v1999_v38 = vrot.slane %v3718_v48, 5  ;;  %v1997_v48 = vsel %vm3828_vm0, %v2778_v52, %v1996_v19  ;;  %v1269_v53 = vrot.slane %v1268_v37, 4 }
  0x92   : > { %2939 = vmatmul.mubr.msk.bf16.gmra.mrb[12].mxu1 %vm868_vm10, %v3663_v35  ;;  %3016 = vmatprep.mubr.msk.bf16.mxu0 %vm868_vm10, %v2781_v9  ;;  %v1985_v9 = vrot.slane %v3669_v49, 5  ;;  %v1979_v49 = vsel %vm3828_vm0, %v1977_v15, %v1978_v36  ;;  %v2779_v36 = vrot.slane %v1922_v47, 9  ;;  %v2005_v0 = vrot.slane %v2003_v33, 4 }
  0x93   : > { %2944 = vmatprep.mubr.msk.bf16.mxu1 %vm868_vm10, %v3588_v1  ;;  %v1918_v1 = vld [vmem:[#allocation2 + $0x24] sm:$0xe] }
  0x94   : > { %v2775_v43 = vrot.slane %v1918_v1, 9  ;;  %v1273_v1 = vrot.slane %v1271_v12, 5 }
  0x96   : > { %v1274_v63 = vsel %vm3630_vm13, %v1269_v53, %v1273_v1 }
  0x99   : > { %3017 = vmatmul.mubr.msk.bf16.vlgmr.msra.gmra.mrb[0].mxu0 %vm868_vm10, %v3878_v45 }
  0x9a   : > { %2945 = vmatmul.mubr.msk.bf16.vlgmr.msra.gmra.mrb[0].mxu1 %vm868_vm10, %v3601_v42  ;;  %v3901_v42 = vld [vmem:[%s4116_s3 + $0x10] sm:$0x3]  ;;  %3033 = vmatpush3.bf16.msra.mxu0 %v2193_v54 }
  0x9b   : > { %2948 = vmatprep.mubr.msk.bf16.mxu1 %vm868_vm10, %v3623_v59  ;;  %2961 = vmatpush3.bf16.msra.mxu1 %v1504_v21  ;;  %v1976_v59 = vsel %vm3828_vm0, %v2775_v43, %v1975_v24  ;;  %v1277_v24 = vrot.slane %v1275_v32, 4  ;;  %v1281_v21 = vshll.u32 %v3817_v13, 16  ;;  %v2000_v13 = vsel %vm3828_vm0, %v1998_v34, %v1999_v38 }
  0x9c   : > { %3203 = vmatprep.subr.msk.bf16.mxu1 %vm893_vm9, %v3593_v40  ;;  %3020 = vmatprep.mubr.msk.bf16.mxu0 %vm868_vm10, %v3884_v60  ;;  %v1986_v40 = vsel %vm3828_vm0, %v1984_v7, %v1985_v9  ;;  %v3923_v4 = vcombine.low %v1976_v59, %v1979_v49  ;;  %v2787_v15 = vcombine.low %v1997_v48, %v2000_v13  ;;  %v2006_v7 = vrot.slane %v3742_v30, 5  ;;  %v3259_v30 = vld [vmem:[#allocation2 + $0x6c] sm:$0xff]  }
  0x9d   : > { %3207 = vmatprep.subr.msk.bf16.mxu0 %vm893_vm9, %v3901_v42  ;;  %v3925_v18 = vcombine.low %v1983_v56, %v1986_v40  ;;  %v1278_v50 = vor.u32 %v1277_v24, %v1273_v1  ;;  %v1283_v43 = vrot.slane %v1281_v21, 5  ;;  %v2327_v3 = vsel %vm893_vm9, %v3901_v42, 0 }
  0x9e   : > { %v2007_v25 = vsel %vm3828_vm0, %v2005_v0, %v2006_v7 }
  0x9f   : > { %v1279_v54 = vrot.slane %v1278_v50, 4 }
  0xa1   : > { %3021 = vmatmul.mubr.msk.bf16.gmra.mrb[4].mxu0 %vm868_vm10, %v3923_v4  ;;  %v1284_v9 = vsel %vm3630_vm13, %v1279_v54, %v1283_v43 }
  0xa2   : > { %2949 = vmatmul.mubr.msk.bf16.gmra.mrb[4].mxu1 %vm868_vm10, %v3637_v8  ;;  %3024 = vmatprep.mubr.msk.bf16.mxu0 %vm868_vm10, %v3925_v18  ;;  %v1990_v8 = vsel %vm3828_vm0, %v2777_v26, %v1989_v2  ;;  %v2736_v10 = vcombine.low %v1274_v63, %v1284_v9 }
  0xa3   : > { %2952 = vmatprep.mubr.msk.bf16.mxu1 %vm868_vm10, %v3658_v31  ;;  %v1993_v31 = vsel %vm3828_vm0, %v1991_v28, %v1992_v62 }
  0xa4   : > { %v2786_v58 = vcombine.low %v1990_v8, %v1993_v31 }
  0xa9   : > { %3025 = vmatmul.mubr.msk.bf16.gmra.mrb[8].mxu0 %vm868_vm10, %v2786_v58 }
  0xaa   : > { %2953 = vmatmul.mubr.msk.bf16.gmra.mrb[8].mxu1 %vm868_vm10, %v3663_v35  ;;  %3028 = vmatprep.mubr.msk.bf16.mxu0 %vm868_vm10, %v2787_v15  ;;  %v2004_v35 = vsel %vm3828_vm0, %v2779_v36, %v2003_v33 }
  0xab   : > { %2956 = vmatprep.mubr.msk.bf16.mxu1 %vm868_vm10, %v3694_v17  ;;  %v2788_v12 = vcombine.low %v2004_v35, %v2007_v25 }
  0xb1   : > { %3029 = vmatmul.mubr.msk.bf16.gmra.mrb[12].mxu0 %vm868_vm10, %v2788_v12 }
  0xb2   : > { %2957 = vmatmul.mubr.msk.bf16.gmra.mrb[12].mxu1 %vm868_vm10, %v3259_v30  ;;  %3034 = vmatprep.mubr.msk.bf16.mxu0 %vm868_vm10, %v3878_v45 }
  0xb3   : > { %2962 = vmatprep.mubr.msk.bf16.mxu1 %vm868_vm10, %v2736_v10 }
  0xb9   : > { %3035 = vmatmul.mubr.msk.bf16.vlgmr.msra.gmra.mrb[0].mxu0 %vm868_vm10, %v3884_v60 }
  0xba   : > { %2963 = vmatmul.mubr.msk.bf16.vlgmr.msra.gmra.mrb[0].mxu1 %vm868_vm10, %v3652_v22  ;;  %3051 = vmatpush3.bf16.msra.mxu0 %v2327_v3 }
  0xbb   : > { %2966 = vmatprep.mubr.msk.bf16.mxu1 %vm868_vm10, %v3674_v57  ;;  %3069 = vmatpush3.bf16.msra.mxu1 %v3599_v41 }
  0xbc   : > { %3038 = vmatprep.mubr.msk.bf16.mxu0 %vm868_vm10, %v3923_v4 }
  0xc1   : > { %3039 = vmatmul.mubr.msk.bf16.gmra.mrb[4].mxu0 %vm868_vm10, %v3925_v18 }
  0xc2   : > { %2967 = vmatmul.mubr.msk.bf16.gmra.mrb[4].mxu1 %vm868_vm10, %v3691_v14  ;;  %3042 = vmatprep.mubr.msk.bf16.mxu0 %vm868_vm10, %v2786_v58 }
  0xc3   : > { %2970 = vmatprep.mubr.msk.bf16.mxu1 %vm868_vm10, %v3721_v51 }
  0xc9   : > { %3043 = vmatmul.mubr.msk.bf16.gmra.mrb[8].mxu0 %vm868_vm10, %v2787_v15 }
  0xca   : > { %2971 = vmatmul.mubr.msk.bf16.gmra.mrb[8].mxu1 %vm868_vm10, %v3789_v61  ;;  %3046 = vmatprep.mubr.msk.bf16.mxu0 %vm868_vm10, %v2788_v12 }
  0xcb   : > { %2974 = vmatprep.mubr.msk.bf16.mxu1 %vm868_vm10, %v3792_v27 }
  0xd1   : > { %3047 = vmatmul.mubr.msk.bf16.gmra.mrb[12].mxu0 %vm868_vm10, %v3882_v39 }
  0xd2   : > { %2975 = vmatmul.mubr.msk.bf16.gmra.mrb[12].mxu1 %vm868_vm10, %v3819_v16  ;;  %3052 = vmatprep.mubr.msk.bf16.mxu0 %vm868_vm10, %v3884_v60 }
  0xd3   : > { %2988 = vmatprep.mubr.msk.bf16.mxu1 %vm868_vm10, %v3789_v61 }
  0xd9   : > { %3053 = vmatmul.mubr.msk.bf16.vlgmr.msra.gmra.mrb[0].mxu0 %vm868_vm10, %v3923_v4 }
  0xda   : > { %2989 = vmatmul.mubr.msk.bf16.vlgmr.msra.gmra.mrb[8].mxu1 %vm868_vm10, %v3792_v27  ;;  %3056 = vmatprep.mubr.msk.bf16.mxu0 %vm868_vm10, %v3925_v18 }
  0xdb   : > { %2992 = vmatprep.mubr.msk.bf16.mxu1 %vm868_vm10, %v3819_v16 }
  0xe1   : > { %3057 = vmatmul.mubr.msk.bf16.gmra.mrb[4].mxu0 %vm868_vm10, %v2786_v58 }
  0xe2   : > { %2993 = vmatmul.mubr.msk.bf16.gmra.mrb[12].mxu1 %vm868_vm10, %v3821_v20  ;;  %3060 = vmatprep.mubr.msk.bf16.mxu0 %vm868_vm10, %v2787_v15 }
  0xe9   : > { %3061 = vmatmul.mubr.msk.bf16.gmra.mrb[8].mxu0 %vm868_vm10, %v2788_v12 }
  0xea   : > { %3064 = vmatprep.mubr.msk.bf16.mxu0 %vm868_vm10, %v3882_v39  ;;  %v4021_v39 = vld [vmem:[%s4117_s4] ss:$0 sm:$0xff] }
  0xf1   : > { %3065 = vmatmul.mubr.msk.bf16.gmra.mrb[12].mxu0 %vm868_vm10, %v2810_v44  ;;  %v4026_v44 = vld [vmem:[%s4118_s5] ss:$0 sm:$0xff] }
 0x18d   : > { %v2964_v41 = vpop.f32.mrb[0].mxu1 }
 0x18e   : > { %v1540_v22 = vpop.f32.mrb[1].mxu1 }
 0x18f   : > { %v2965_v57 = vpop.f32.mrb[2].mxu1 }
 0x190   : > { %v1543_v14 = vpop.f32.mrb[3].mxu1 }
 0x195   : > { %v2968_v17 = vpop.f32.mrb[4].mxu1 }
 0x196   : > { %v1556_v51 = vpop.f32.mrb[5].mxu1 }
 0x197   : > { %v2969_v61 = vpop.f32.mrb[6].mxu1 }
 0x198   : > { %v1559_v27 = vpop.f32.mrb[7].mxu1 }
 0x1ac   : > { %v3054_v45 = vpop.f32.mrb[0].mxu0 }
 0x1ad   : > { %v2990_v16 = vpop.f32.mrb[8].mxu1  ;;  %v3070_v60 = vadd.f32 %v3054_v45, %v2964_v41  ;;  %v2363_v5 = vpop.f32.mrb[1].mxu0 }
 0x1ae   : > { %v1720_v20 = vpop.f32.mrb[9].mxu1  ;;  %v3071_v42 = vadd.f32 %v2363_v5, %v1540_v22  ;;  %v3055_v32 = vpop.f32.mrb[2].mxu0 }
 0x1af   : > { %v2991_v29 = vpop.f32.mrb[10].mxu1  ;;  %v2451_v59 = vmul.f32 %v3070_v60, %v4021_v39  ;;  %v3072_v49 = vadd.f32 %v3055_v32, %v2965_v57  ;;  %v2366_v2 = vpop.f32.mrb[3].mxu0 }
 0x1b0   : > { %v1723_v55 = vpop.f32.mrb[11].mxu1  ;;  %v2449_v56 = vmul.f32 %v3071_v42, %v4021_v39  ;;  %v3073_v40 = vadd.f32 %v2366_v2, %v1543_v14 }
 0x1b1   : > { %v2474_v11 = vadd.f32 %v4026_v44, %v2451_v59  ;;  %v2452_v19 = vmul.f32 %v3072_v49, %v4021_v39 }
 0x1b2   : > { %v2472_v6 = vadd.f32 %v4026_v44, %v2449_v56  ;;  %v2450_v23 = vmul.f32 %v3073_v40, %v4021_v39 }
 0x1b3   : > { %v2490_v24 = vmax.f32 %v2474_v11, 0.0  ;;  %v2475_v4 = vadd.f32 %v4026_v44, %v2452_v19 }
 0x1b4   : > { %v2488_v26 = vmax.f32 %v2472_v6, 0.0  ;;  %v2473_v28 = vadd.f32 %v4026_v44, %v2450_v23  ;;  %v3058_v62 = vpop.f32.mrb[4].mxu0 }
 0x1b5   : > { %v2994_v46 = vpop.f32.mrb[12].mxu1  ;;  %2506 = vst.msk [vmem:[%s3472_s8 + $0x10] sm:$0xff] %vm868_vm10, %v2490_v24  ;;  %v2491_v34 = vmax.f32 %v2475_v4, 0.0  ;;  %v3074_v38 = vadd.f32 %v3058_v62, %v2968_v17  ;;  %v2379_v37 = vpop.f32.mrb[5].mxu0 }
 0x1b6   : > { %v1736_v1 = vpop.f32.mrb[13].mxu1  ;;  %2504 = vst.msk [vmem:[%s3472_s8] sm:$0xff] %vm868_vm10, %v2488_v26  ;;  %v2489_v50 = vmax.f32 %v2473_v28, 0.0  ;;  %v3075_v21 = vadd.f32 %v2379_v37, %v1556_v51  ;;  %v3059_v8 = vpop.f32.mrb[6].mxu0 }
 0x1b7   : > { %v4035_v18 = vpop.f32.mrb[14].mxu1  ;;  %2507 = vst.msk [vmem:[%s3472_s8 + $0x18] sm:$0xff] %vm868_vm10, %v2491_v34  ;;  %v2455_v31 = vmul.f32 %v3074_v38, %v4021_v39  ;;  %v3076_v33 = vadd.f32 %v3059_v8, %v2969_v61  ;;  %v2382_v48 = vpop.f32.mrb[7].mxu0 }
 0x1b8   : > { %v4038_v52 = vpop.f32.mrb[15].mxu1  ;;  %2505 = vst.msk [vmem:[%s3472_s8 + $0x8] sm:$0xff] %vm868_vm10, %v2489_v50  ;;  %v2453_v13 = vmul.f32 %v3075_v21, %v4021_v39  ;;  %v3077_v47 = vadd.f32 %v2382_v48, %v1559_v27 }
 0x1b9   : > { %v2478_v53 = vadd.f32 %v4026_v44, %v2455_v31  ;;  %v2456_v54 = vmul.f32 %v3076_v33, %v4021_v39 }
 0x1ba   : > { %v2476_v43 = vadd.f32 %v4026_v44, %v2453_v13  ;;  %v2454_v58 = vmul.f32 %v3077_v47, %v4021_v39 }
 0x1bb   : > { %v2494_v15 = vmax.f32 %v2478_v53, 0.0  ;;  %v2479_v36 = vadd.f32 %v4026_v44, %v2456_v54 }
 0x1bc   : > { %v2492_v0 = vmax.f32 %v2476_v43, 0.0  ;;  %v2477_v7 = vadd.f32 %v4026_v44, %v2454_v58  ;;  %v3062_v63 = vpop.f32.mrb[8].mxu0 }
 0x1bd   : > { %2510 = vst.msk [vmem:[%s3472_s8 + $0x30] sm:$0xff] %vm868_vm10, %v2494_v15  ;;  %v2495_v9 = vmax.f32 %v2479_v36, 0.0  ;;  %v3078_v35 = vadd.f32 %v3062_v63, %v2990_v16  ;;  %v2395_v25 = vpop.f32.mrb[9].mxu0 }
 0x1be   : > { %2508 = vst.msk [vmem:[%s3472_s8 + $0x20] sm:$0xff] %vm868_vm10, %v2492_v0  ;;  %v2493_v30 = vmax.f32 %v2477_v7, 0.0  ;;  %v3079_v10 = vadd.f32 %v2395_v25, %v1720_v20  ;;  %v3063_v12 = vpop.f32.mrb[10].mxu0 }
 0x1bf   : > { %2511 = vst.msk [vmem:[%s3472_s8 + $0x38] sm:$0xff] %vm868_vm10, %v2495_v9  ;;  %v2459_v3 = vmul.f32 %v3078_v35, %v4021_v39  ;;  %v3080_v41 = vadd.f32 %v3063_v12, %v2991_v29  ;;  %v2398_v22 = vpop.f32.mrb[11].mxu0 }
 0x1c0   : > { %2509 = vst.msk [vmem:[%s3472_s8 + $0x28] sm:$0xff] %vm868_vm10, %v2493_v30  ;;  %v2457_v57 = vmul.f32 %v3079_v10, %v4021_v39  ;;  %v3081_v14 = vadd.f32 %v2398_v22, %v1723_v55 }
 0x1c1   : > { %v2482_v17 = vadd.f32 %v4026_v44, %v2459_v3  ;;  %v2460_v51 = vmul.f32 %v3080_v41, %v4021_v39 }
 0x1c2   : > { %v2480_v61 = vadd.f32 %v4026_v44, %v2457_v57  ;;  %v2458_v27 = vmul.f32 %v3081_v14, %v4021_v39 }
 0x1c3   : > { %v2498_v16 = vmax.f32 %v2482_v17, 0.0  ;;  %v2483_v20 = vadd.f32 %v4026_v44, %v2460_v51 }
 0x1c4   : > { %v2496_v29 = vmax.f32 %v2480_v61, 0.0  ;;  %v2481_v45 = vadd.f32 %v4026_v44, %v2458_v27  ;;  %v3066_v60 = vpop.f32.mrb[12].mxu0 }
 0x1c5   : > { %2514 = vst.msk [vmem:[%s3472_s8 + $0x50] sm:$0xff] %vm868_vm10, %v2498_v16  ;;  %v2499_v55 = vmax.f32 %v2483_v20, 0.0  ;;  %v3082_v5 = vadd.f32 %v3066_v60, %v2994_v46  ;;  %v2411_v42 = vpop.f32.mrb[13].mxu0 }
 0x1c6   : > { %2512 = vst.msk [vmem:[%s3472_s8 + $0x40] sm:$0xff] %vm868_vm10, %v2496_v29  ;;  %v2497_v32 = vmax.f32 %v2481_v45, 0.0  ;;  %v3083_v59 = vadd.f32 %v2411_v42, %v1736_v1  ;;  %v3067_v49 = vpop.f32.mrb[14].mxu0 }
 0x1c7   : > { %2515 = vst.msk [vmem:[%s3472_s8 + $0x58] sm:$0xff] %vm868_vm10, %v2499_v55  ;;  %v2463_v2 = vmul.f32 %v3082_v5, %v4021_v39  ;;  %v3084_v56 = vadd.f32 %v3067_v49, %v4035_v18  ;;  %v2414_v40 = vpop.f32.mrb[15].mxu0 }
 0x1c8   : > { %2513 = vst.msk [vmem:[%s3472_s8 + $0x48] sm:$0xff] %vm868_vm10, %v2497_v32  ;;  %v2461_v11 = vmul.f32 %v3083_v59, %v4021_v39  ;;  %v3085_v19 = vadd.f32 %v2414_v40, %v4038_v52 }
 0x1c9   : > { %v2486_v46 = vadd.f32 %v4026_v44, %v2463_v2  ;;  %v2464_v6 = vmul.f32 %v3084_v56, %v4021_v39 }
 0x1ca   : > { %v2484_v23 = vadd.f32 %v4026_v44, %v2461_v11  ;;  %v2462_v1 = vmul.f32 %v3085_v19, %v4021_v39 }
 0x1cb   : > { %v2502_v24 = vmax.f32 %v2486_v46, 0.0  ;;  %v2487_v4 = vadd.f32 %v4026_v44, %v2464_v6 }
 0x1cc   : > { %v2500_v18 = vmax.f32 %v2484_v23, 0.0  ;;  %v2485_v26 = vadd.f32 %v4026_v44, %v2462_v1 }
 0x1cd   : > { %2518 = vst.msk [vmem:[%s3472_s8 + $0x70] sm:$0xff] %vm868_vm10, %v2502_v24  ;;  %v2503_v28 = vmax.f32 %v2487_v4, 0.0 }
 0x1ce   : > { %2516 = vst.msk [vmem:[%s3472_s8 + $0x60] sm:$0xff] %vm868_vm10, %v2500_v18  ;;  %v2501_v62 = vmax.f32 %v2485_v26, 0.0 }
 0x1cf   : > { %2519 = vst.msk [vmem:[%s3472_s8 + $0x78] sm:$0xff] %vm868_vm10, %v2503_v28 }
 0x1d0   : > { %2517 = vst.msk [vmem:[%s3472_s8 + $0x68] sm:$0xff] %vm868_vm10, %v2501_v62 }
 0x1d1 PF: > { %s16_s25 = sadd.s32 1, %s3298_s25   ;;  %s4133_s21 = smov %s3290_s23 }
 0x1d2   : > { %p13_p12 = scmp.ge.s32.totalorder %s16_s25, 6   ;;  %s4134_s22 = smov %s3294_s24 }
 0x1d3   : > { %s4135_s23 = smov %s4138_s26  ;;  %s4136_s24 = smov %s4142_s27 }
 0x1d4   :  { %15 = sbr.rel (!%p13_p12) target bundleno = 3 (0x3), region = 98 }

// kernel: doublewith2up_forward.4
= control target key start
LH: loop header
LB: loop body
LE: loop exit
PB: predicated region body
PF: predicated region fallthrough
CT: control target
= control target key end

     0   :  { %s3434_s21 = smov 0   ;;  %s3436_s22 = smov 0   ;;  %s4222_s0 = inlined_call_operand.vmem [shape: bf16[2,16,16,8], index: 0, kind: input, shape index: {}, may-alias: {0,1,2}]   ;;  %s4223_s1 = inlined_call_operand.vmem [shape: bf16[2,16,16,8], index: 1, kind: input, shape index: {}, may-alias: {0,1,2}]   ;;  %s4224_s2 = inlined_call_operand.vmem [shape: bf16[2,16,16,8], index: 2, kind: input, shape index: {}, may-alias: {0,1,2}]   ;;  %s4225_s3 = inlined_call_operand.vmem [shape: bf16[3,3,8,4], index: 3, kind: input, shape index: {}]   ;;  %s4226_s4 = inlined_call_operand.vmem [shape: f32[1,4], index: 4, kind: input, shape index: {}]   ;;  %s4227_s5 = inlined_call_operand.vmem [shape: f32[1,4], index: 5, kind: input, shape index: {}]   ;;  %s4228_s6 = inlined_call_operand.vmem [shape: bf16[2,16,16,4], index: 6, kind: output, shape index: {}]  }
   0x1   :  { %s3438_s23 = smov 0   ;;  %s3440_s24 = smov 0  }
   0x2   :  { %s3442_s25 = smov 0  }
   0x3 LB: > { %s25_s26 = sadd.s32 1, %s3387_s23  ;;  %s28_s27 = sadd.s32 1, %s3391_s24  ;;  %s3395_s25 = sphi %s3442_s25, %s16_s25   ;;  %s3391_s24 = sphi %s3440_s24, %s4245_s24   ;;  %s3387_s23 = sphi %s3438_s23, %s4244_s23   ;;  %s3383_s22 = sphi %s3436_s22, %s4243_s22   ;;  %s3379_s21 = sphi %s3434_s21, %s4242_s21  }
   0x4   : > { %p26_p0 = scmp.ge.s32.totalorder %s25_s26, 2  ;;  %p2736_p1 = scmp.ge.s32.totalorder %s3395_s25, 1 }
   0x5   : > { %p298_p2 = scmp.lt.s32.totalorder %s3395_s25, 5 }
   0x6   : > { %s4247_s26 = smov (%p26_p0, %s25_s26), 0  ;;  %s4249_s27 = smov (!%p26_p0, %s28_s27), %s3391_s24 }
   0x7   : > { %p299_p3 = pnand %p2736_p1, %p298_p2  ;;  %p30_p4 = scmp.ge.s32.totalorder %s4249_s27, 2 }
   0x8   : > { %vm421_vm0 = vcmask (!%p299_p3), 57344   ;;  %vm422_vm1 = vsmask.f32 (!%p299_p3), 256  ;;  %v424_v0 = vld [vmem:[#allocation2] sm:$0x1] (!%p299_p3)  ;;  %s3481_s28 = sshll.u32 (!%p299_p3), %s3379_s21, 3 }
   0x9   : > { %s4251_s27 = smov (%p30_p4, %s4249_s27), 0  ;;  %302 = sbr.rel (%p299_p3) target bundleno = 467 (0x1d3), region = 44 }
   0xa   : > { %vm3470_vm2 = vmand (!%p299_p3), %vm421_vm0, %vm422_vm1  ;;  %v427_v2 = vld [vmem:[#allocation2 + $0xc] sm:$0x1] (!%p299_p3)  ;;  %v430_v3 = vld [vmem:[#allocation2 + $0x18] sm:$0x1] (!%p299_p3)  ;;  %vm454_vm3 = vsmask.f32 (!%p299_p3), 7938 }
   0xb   : > { %v425_v4 = vsel (!%p299_p3), %vm3470_vm2, 0, %v424_v0  ;;  %v428_v5 = vsel (!%p299_p3), %vm3470_vm2, 0, %v427_v2  ;;  %v431_v6 = vsel (!%p299_p3), %vm3470_vm2, 0, %v430_v3  ;;  %v433_v7 = vld [vmem:[#allocation2 + $0x24] sm:$0x1] (!%p299_p3)  ;;  %s3486_s29 = sadd.s32 (!%p299_p3), 4294967295, %s3481_s28  ;;  %vm3494_vm4 = vmand (!%p299_p3), %vm421_vm0, %vm454_vm3 }
   0xc   : > { %426 = vst [vmem:[#allocation2] sm:$0x1] (!%p299_p3), %v425_v4  ;;  %429 = vst [vmem:[#allocation2 + $0xc] sm:$0x1] (!%p299_p3), %v428_v5  ;;  %v434_v8 = vsel (!%p299_p3), %vm3470_vm2, 0, %v433_v7  ;;  %p366_p5 = scmp.gt.s32.totalorder (!%p299_p3), %s3486_s29, 0 }
   0xd   : > { %432 = vst [vmem:[#allocation2 + $0x18] sm:$0x1] (!%p299_p3), %v431_v6  ;;  %v436_v9 = vld [vmem:[#allocation2 + $0x30] sm:$0x1] (!%p299_p3)  ;;  %v439_v10 = vld [vmem:[#allocation2 + $0x3c] sm:$0x1] (!%p299_p3) }
   0xe   : > { %435 = vst [vmem:[#allocation2 + $0x24] sm:$0x1] (!%p299_p3), %v434_v8  ;;  %v437_v11 = vsel (!%p299_p3), %vm3470_vm2, 0, %v436_v9  ;;  %v440_v12 = vsel (!%p299_p3), %vm3470_vm2, 0, %v439_v10  ;;  %v442_v13 = vld [vmem:[#allocation2 + $0x48] sm:$0x1] (!%p299_p3) }
   0xf   : > { %v445_v14 = vld [vmem:[#allocation2 + $0x54] sm:$0x1] (!%p299_p3)  ;;  %438 = vst [vmem:[#allocation2 + $0x30] sm:$0x1] (!%p299_p3), %v437_v11  ;;  %441 = vst [vmem:[#allocation2 + $0x3c] sm:$0x1] (!%p299_p3), %v440_v12 }
  0x10   : > { %v443_v16 = vsel %vm3470_vm2, 0, %v442_v13  ;;  %v446_v17 = vsel %vm3470_vm2, 0, %v445_v14  ;;  %v448_v18 = vld [vmem:[#allocation2 + $0x60] sm:$0x1]  ;;  %v451_v19 = vld [vmem:[#allocation2 + $0x6c] sm:$0x1] }
  0x11   : > { %444 = vst [vmem:[#allocation2 + $0x48] sm:$0x1] %v443_v16  ;;  %447 = vst [vmem:[#allocation2 + $0x54] sm:$0x1] %v446_v17  ;;  %v449_v20 = vsel %vm3470_vm2, 0, %v448_v18  ;;  %v452_v21 = vsel %vm3470_vm2, 0, %v451_v19 }
  0x12   : > { %v456_v22 = vld [vmem:[#allocation2 + $0x8] sm:$0x1]  ;;  %v459_v23 = vld [vmem:[#allocation2 + $0x14] sm:$0x1]  ;;  %450 = vst [vmem:[#allocation2 + $0x60] sm:$0x1] %v449_v20 }
  0x13   : > { %453 = vst [vmem:[#allocation2 + $0x6c] sm:$0x1] %v452_v21  ;;  %v457_v24 = vsel %vm3494_vm4, 0, %v456_v22  ;;  %v460_v25 = vsel %vm3494_vm4, 0, %v459_v23  ;;  %v462_v26 = vld [vmem:[#allocation2 + $0x20] sm:$0x1] }
  0x14   : > { %v465_v27 = vld [vmem:[#allocation2 + $0x2c] sm:$0x1]  ;;  %458 = vst [vmem:[#allocation2 + $0x8] sm:$0x1] %v457_v24  ;;  %461 = vst [vmem:[#allocation2 + $0x14] sm:$0x1] %v460_v25 }
  0x15   : > { %v463_v28 = vsel %vm3494_vm4, 0, %v462_v26  ;;  %v466_v29 = vsel %vm3494_vm4, 0, %v465_v27  ;;  %v468_v30 = vld [vmem:[#allocation2 + $0x38] sm:$0x1]  ;;  %v471_v31 = vld [vmem:[#allocation2 + $0x44] sm:$0x1] }
  0x16   : > { %464 = vst [vmem:[#allocation2 + $0x20] sm:$0x1] %v463_v28  ;;  %467 = vst [vmem:[#allocation2 + $0x2c] sm:$0x1] %v466_v29  ;;  %v469_v32 = vsel %vm3494_vm4, 0, %v468_v30  ;;  %v472_v33 = vsel %vm3494_vm4, 0, %v471_v31 }
  0x17   : > { %v474_v34 = vld [vmem:[#allocation2 + $0x50] sm:$0x1]  ;;  %v477_v35 = vld [vmem:[#allocation2 + $0x5c] sm:$0x1]  ;;  %470 = vst [vmem:[#allocation2 + $0x38] sm:$0x1] %v469_v32 }
  0x18   : > { %473 = vst [vmem:[#allocation2 + $0x44] sm:$0x1] %v472_v33  ;;  %v475_v36 = vsel %vm3494_vm4, 0, %v474_v34  ;;  %v478_v37 = vsel %vm3494_vm4, 0, %v477_v35  ;;  %v480_v38 = vld [vmem:[#allocation2 + $0x68] sm:$0x1] }
  0x19   : > { %v483_v39 = vld [vmem:[#allocation2 + $0x74] sm:$0x1]  ;;  %476 = vst [vmem:[#allocation2 + $0x50] sm:$0x1] %v475_v36  ;;  %479 = vst [vmem:[#allocation2 + $0x5c] sm:$0x1] %v478_v37 }
  0x1a   : > { %v481_v40 = vsel %vm3494_vm4, 0, %v480_v38  ;;  %v484_v41 = vsel %vm3494_vm4, 0, %v483_v39  ;;  %p368_p6 = scmp.lt.s32.totalorder %s3383_s22, 1  ;;  %p2739_p7 = scmp.lt.s32.totalorder %s3486_s29, 15  ;;  %vm488_vm5 = vsmask.f32 4368 }
  0x1b   : > { %482 = vst [vmem:[#allocation2 + $0x68] sm:$0x1] %v481_v40  ;;  %485 = vst [vmem:[#allocation2 + $0x74] sm:$0x1] %v484_v41  ;;  %s4253_s29 = smov (!%p366_p5, %s3486_s29), 0  ;;  %s393_s7 = sadd.s32 8, %s3481_s28 }
  0x1c   : > { %s4255_s22 = smov (!%p368_p6, %s3383_s22), 1  ;;  %s4257_s29 = smov (!%p2739_p7, %s4253_s29), 15  ;;  %vm510_vm6 = vcmask 60416   ;;  %v512_v51 = vld [vmem:[#allocation2] sm:$0xf]  ;;  %vm3555_vm8 = vmor %vm422_vm1, %vm488_vm5 }
  0x1d   : > { %s3531_s30 = sshll.u32 %s4255_s22, 5  ;;  %s2744_s8 = sshll.u32 %s4257_s29, 1  ;;  %vm3548_vm7 = vmand %vm510_vm6, %vm454_vm3  ;;  %v517_v53 = vld [vmem:[#allocation2 + $0x8] sm:$0x1]  ;;  %v727_v8 = vld [vmem:[#allocation2 + $0xc] sm:$0xf] }
  0x1e   : > { %p384_p8 = scmp.lt.s32.totalorder %s3481_s28, 15  ;;  %s374_s9 = sadd.s32 %s3531_s30, %s2744_s8  ;;  %v731_v9 = vld [vmem:[#allocation2 + $0x14] sm:$0x1]  ;;  %v734_v11 = vld [vmem:[#allocation2 + $0x18] sm:$0xf] }
  0x1f   : > { %p3536_p9 = scmp.lt.s32.totalorder %s393_s7, 15  ;;  %s2746_s11 = sshll.u32 %s374_s9, 2  ;;  %v543_v34 = vld [vmem:[#allocation2 + $0x6c] sm:$0xf] }
  0x20   : > { %s376_s14 = scalar_lea.vmem %s4222_s0, %s2746_s11  ;;  %s4259_s28 = smov (!%p384_p8, %s3481_s28), 15 }
  0x21   : > { %v486_v42 = vld [vmem:[%s376_s14] sm:$0xf]  ;;  %v487_v43 = vld [vmem:[%s376_s14 + $0x4] sm:$0xf]  ;;  %s4261_s7 = smov (!%p3536_p9, %s393_s7), 15  ;;  %s2748_s15 = sshll.u32 %s4259_s28, 1 }
  0x22   : > { %v491_v44 = vshrl.u32 %v486_v42, 16  ;;  %v494_v45 = vshll.u32 %v486_v42, 16  ;;  %v499_v46 = vshrl.u32 %v487_v43, 16  ;;  %v502_v47 = vshll.u32 %v487_v43, 16  ;;  %s388_s16 = sadd.s32 %s2748_s15, %s3531_s30  ;;  %s4263_s7 = smov (!%p3536_p9, %s4261_s7), 15 }
  0x23   : > { %s2750_s17 = sshll.u32 %s388_s16, 2  ;;  %s2755_s8 = sshll.u32 %s4263_s7, 1  ;;  %v738_v43 = vld [vmem:[#allocation2 + $0x20] sm:$0x1] }
  0x24   : > { %v493_v49 = vrot.slane %v491_v44, 7  ;;  %v501_v50 = vrot.slane %v499_v46, 7  ;;  %s3562_s20 = scalar_lea.vmem %s4223_s1, %s2750_s17  ;;  %s3567_s29 = scalar_lea.vmem %s4228_s6, %s2750_s17  ;;  %v547_v44 = vld [vmem:[#allocation2 + $0x74] sm:$0x1] }
  0x25   : > { %v550_v58 = vld [vmem:[%s3562_s20] sm:$0xf]  ;;  %v551_v59 = vld [vmem:[%s3562_s20 + $0x4] sm:$0xf]  ;;  %v552_v0 = vld [vmem:[%s3562_s20 + $0x8] sm:$0xf]  ;;  %s402_s9 = sadd.s32 %s2755_s8, %s3531_s30 }
  0x26   : > { %v496_v54 = vor.u32 %v494_v45, %v493_v49  ;;  %v497_v55 = vrot.slane %v493_v49, 4  ;;  %v504_v56 = vor.u32 %v502_v47, %v501_v50  ;;  %v506_v57 = vrot.slane %v501_v50, 4  ;;  %v553_v2 = vld [vmem:[%s3562_s20 + $0xc] sm:$0xf]  ;;  %v554_v13 = vld [vmem:[%s3562_s20 + $0x10] sm:$0xf] }
  0x27   : > { %v567_v63 = vshrl.u32 %v550_v58, 16  ;;  %v570_v3 = vshll.u32 %v550_v58, 16  ;;  %v575_v4 = vshrl.u32 %v551_v59, 16  ;;  %v578_v5 = vshll.u32 %v551_v59, 16  ;;  %s2757_s10 = sshll.u32 %s402_s9, 2  ;;  %p2762_p10 = scmp.ne.s32.totalorder %s3379_s21, 0 }
  0x28   : > { %v513_v60 = vsel %vm3548_vm7, %v496_v54, %v512_v51  ;;  %v505_v61 = vsel %vm3555_vm8, %v497_v55, %v504_v56  ;;  %v518_v62 = vsel %vm3470_vm2, %v506_v57, %v517_v53  ;;  %v584_v6 = vshrl.u32 %v552_v0, 16  ;;  %s404_s12 = scalar_lea.vmem %s4224_s2, %s2757_s10  ;;  %v555_v22 = vld [vmem:[%s3562_s20 + $0x14] sm:$0xf]  ;;  %v556_v33 = vld [vmem:[%s3562_s20 + $0x18] sm:$0xf] }
  0x29   : > { %514 = vst [vmem:[#allocation2] sm:$0xf] %v513_v60  ;;  %516 = vst.msk [vmem:[#allocation2 + $0x4] sm:$0xf] %vm510_vm6, %v505_v61  ;;  %v569_v7 = vrot.slane %v567_v63, 7  ;;  %v587_v10 = vshll.u32 %v552_v0, 16 }
  0x2a   : > { %519 = vst [vmem:[#allocation2 + $0x8] sm:$0x1] %v518_v62  ;;  %v592_v12 = vshrl.u32 %v553_v2, 16  ;;  %v577_v14 = vrot.slane %v575_v4, 7  ;;  %v586_v15 = vrot.slane %v584_v6, 7  ;;  %v595_v16 = vshll.u32 %v553_v2, 16 }
  0x2b   : > { %v601_v17 = vshrl.u32 %v554_v13, 16  ;;  %v572_v18 = vor.u32 %v570_v3, %v569_v7  ;;  %v573_v19 = vrot.slane %v569_v7, 4  ;;  %v604_v21 = vshll.u32 %v554_v13, 16  ;;  %v520_v23 = vld [vmem:[%s404_s12] sm:$0xf] }
  0x2c   : > { %v594_v20 = vrot.slane %v592_v12, 7  ;;  %v521_v24 = vld [vmem:[%s404_s12 + $0x4] sm:$0xf]  ;;  %v580_v25 = vor.u32 %v578_v5, %v577_v14  ;;  %v582_v26 = vrot.slane %v577_v14, 4  ;;  %v589_v27 = vor.u32 %v587_v10, %v586_v15  ;;  %v557_v56 = vld [vmem:[%s3562_s20 + $0x1c] sm:$0xf] }
  0x2d   : > { %v590_v28 = vrot.slane %v586_v15, 4  ;;  %v523_v29 = vshrl.u32 %v520_v23, 16  ;;  %v526_v30 = vshll.u32 %v520_v23, 16  ;;  %v531_v31 = vshrl.u32 %v521_v24, 16  ;;  %v741_v55 = vld [vmem:[#allocation2 + $0x24] sm:$0xf] }
  0x2e   : > { %v534_v32 = vshll.u32 %v521_v24, 16  ;;  %v728_v35 = vsel %vm3548_vm7, %v572_v18, %v727_v8  ;;  %v581_v36 = vsel %vm3555_vm8, %v573_v19, %v580_v25  ;;  %v732_v37 = vsel %vm3470_vm2, %v582_v26, %v731_v9  ;;  %v558_v61 = vld [vmem:[%s3562_s20 + $0x20] sm:$0xf]  ;;  %v745_v3 = vld [vmem:[#allocation2 + $0x2c] sm:$0x1] }
  0x2f   : > { %v735_v38 = vsel %vm3548_vm7, %v589_v27, %v734_v11  ;;  %v525_v39 = vrot.slane %v523_v29, 7  ;;  %v533_v40 = vrot.slane %v531_v31, 7  ;;  %729 = vst [vmem:[#allocation2 + $0xc] sm:$0xf] %v728_v35  ;;  %730 = vst.msk [vmem:[#allocation2 + $0x10] sm:$0xf] %vm510_vm6, %v581_v36  ;;  %v597_v41 = vor.u32 %v595_v16, %v594_v20 }
  0x30   : > { %733 = vst [vmem:[#allocation2 + $0x14] sm:$0x1] %v732_v37  ;;  %736 = vst [vmem:[#allocation2 + $0x18] sm:$0xf] %v735_v38  ;;  %v599_v42 = vrot.slane %v594_v20, 4  ;;  %v603_v45 = vrot.slane %v601_v17, 7 }
  0x31   : > { %v609_v46 = vshrl.u32 %v555_v22, 16  ;;  %v612_v47 = vshll.u32 %v555_v22, 16  ;;  %v618_v49 = vshrl.u32 %v556_v33, 16  ;;  %v528_v50 = vor.u32 %v526_v30, %v525_v39  ;;  %v559_v8 = vld [vmem:[%s3562_s20 + $0x24] sm:$0xf] }
  0x32   : > { %v529_v51 = vrot.slane %v525_v39, 4  ;;  %v536_v53 = vor.u32 %v534_v32, %v533_v40  ;;  %v538_v54 = vrot.slane %v533_v40, 4  ;;  %v598_v57 = vsel %vm3555_vm8, %v590_v28, %v597_v41  ;;  %v748_v11 = vld [vmem:[#allocation2 + $0x30] sm:$0xf]  ;;  %v560_v18 = vld [vmem:[%s3562_s20 + $0x28] sm:$0xf] }
  0x33   : > { %v739_v58 = vsel %vm3470_vm2, %v599_v42, %v738_v43  ;;  %v606_v59 = vor.u32 %v604_v21, %v603_v45  ;;  %v607_v60 = vrot.slane %v603_v45, 4  ;;  %v544_v62 = vsel %vm3548_vm7, %v528_v50, %v543_v34  ;;  %737 = vst.msk [vmem:[#allocation2 + $0x1c] sm:$0xf] %vm510_vm6, %v598_v57  ;;  %v752_v21 = vld [vmem:[#allocation2 + $0x38] sm:$0x1] }
  0x34   : > { %v537_v63 = vsel %vm3555_vm8, %v529_v51, %v536_v53  ;;  %v548_v0 = vsel %vm3470_vm2, %v538_v54, %v547_v44  ;;  %740 = vst [vmem:[#allocation2 + $0x20] sm:$0x1] %v739_v58  ;;  %v611_v2 = vrot.slane %v609_v46, 7  ;;  %545 = vst [vmem:[#allocation2 + $0x6c] sm:$0xf] %v544_v62  ;;  %v620_v5 = vrot.slane %v618_v49, 7 }
  0x35   : > { %546 = vst.msk [vmem:[#allocation2 + $0x70] sm:$0xf] %vm510_vm6, %v537_v63  ;;  %549 = vst [vmem:[#allocation2 + $0x74] sm:$0x1] %v548_v0  ;;  %v742_v4 = vsel %vm3548_vm7, %v606_v59, %v741_v55  ;;  %v621_v6 = vshll.u32 %v556_v33, 16  ;;  %v626_v7 = vshrl.u32 %v557_v56, 16 }
  0x36   : > { %743 = vst [vmem:[#allocation2 + $0x24] sm:$0xf] %v742_v4  ;;  %v614_v9 = vor.u32 %v612_v47, %v611_v2  ;;  %v616_v10 = vrot.slane %v611_v2, 4  ;;  %v629_v12 = vshll.u32 %v557_v56, 16  ;;  %v635_v13 = vshrl.u32 %v558_v61, 16 }
  0x37   : > { %v623_v14 = vor.u32 %v621_v6, %v620_v5  ;;  %v624_v15 = vrot.slane %v620_v5, 4  ;;  %v628_v16 = vrot.slane %v626_v7, 7  ;;  %v638_v17 = vshll.u32 %v558_v61, 16  ;;  %v561_v24 = vld [vmem:[%s3562_s20 + $0x2c] sm:$0xf] }
  0x38   : > { %v615_v19 = vsel %vm3555_vm8, %v607_v60, %v614_v9  ;;  %v746_v20 = vsel %vm3470_vm2, %v616_v10, %v745_v3  ;;  %v637_v22 = vrot.slane %v635_v13, 7  ;;  %v643_v23 = vshrl.u32 %v559_v8, 16  ;;  %v755_v28 = vld [vmem:[#allocation2 + $0x3c] sm:$0xf]  ;;  %v562_v34 = vld [vmem:[%s3562_s20 + $0x30] sm:$0xf] }
  0x39   : > { %744 = vst.msk [vmem:[#allocation2 + $0x28] sm:$0xf] %vm510_vm6, %v615_v19  ;;  %747 = vst [vmem:[#allocation2 + $0x2c] sm:$0x1] %v746_v20  ;;  %v749_v25 = vsel %vm3548_vm7, %v623_v14, %v748_v11  ;;  %v631_v26 = vor.u32 %v629_v12, %v628_v16  ;;  %v633_v27 = vrot.slane %v628_v16, 4  ;;  %v646_v29 = vshll.u32 %v559_v8, 16 }
  0x3a   : > { %750 = vst [vmem:[#allocation2 + $0x30] sm:$0xf] %v749_v25  ;;  %v640_v30 = vor.u32 %v638_v17, %v637_v22  ;;  %v641_v31 = vrot.slane %v637_v22, 4  ;;  %v645_v32 = vrot.slane %v643_v23, 7  ;;  %v652_v33 = vshrl.u32 %v560_v18, 16 }
  0x3b   : > { %v632_v35 = vsel %vm3555_vm8, %v624_v15, %v631_v26  ;;  %v753_v36 = vsel %vm3470_vm2, %v633_v27, %v752_v21  ;;  %v759_v37 = vld [vmem:[#allocation2 + $0x44] sm:$0x1]  ;;  %v655_v38 = vshll.u32 %v560_v18, 16  ;;  %v660_v39 = vshrl.u32 %v561_v24, 16  ;;  %v762_v44 = vld [vmem:[#allocation2 + $0x48] sm:$0xf] }
  0x3c   : > { %751 = vst.msk [vmem:[#allocation2 + $0x34] sm:$0xf] %vm510_vm6, %v632_v35  ;;  %754 = vst [vmem:[#allocation2 + $0x38] sm:$0x1] %v753_v36  ;;  %v756_v40 = vsel %vm3548_vm7, %v640_v30, %v755_v28  ;;  %v648_v41 = vor.u32 %v646_v29, %v645_v32  ;;  %v650_v42 = vrot.slane %v645_v32, 4  ;;  %v654_v43 = vrot.slane %v652_v33, 7 }
  0x3d   : > { %v563_v45 = vld [vmem:[%s3562_s20 + $0x34] sm:$0xf]  ;;  %757 = vst [vmem:[#allocation2 + $0x3c] sm:$0xf] %v756_v40  ;;  %v662_v46 = vrot.slane %v660_v39, 7  ;;  %v663_v47 = vshll.u32 %v561_v24, 16 }
  0x3e   : > { %v669_v49 = vshrl.u32 %v562_v34, 16  ;;  %v672_v50 = vshll.u32 %v562_v34, 16  ;;  %v564_v51 = vld [vmem:[%s3562_s20 + $0x38] sm:$0xf]  ;;  %v649_v53 = vsel %vm3555_vm8, %v641_v31, %v648_v41  ;;  %v760_v54 = vsel %vm3470_vm2, %v650_v42, %v759_v37  ;;  %v766_v57 = vld [vmem:[#allocation2 + $0x50] sm:$0x1] }
  0x3f   : > { %v657_v55 = vor.u32 %v655_v38, %v654_v43  ;;  %v658_v56 = vrot.slane %v654_v43, 4  ;;  %758 = vst.msk [vmem:[#allocation2 + $0x40] sm:$0xf] %vm510_vm6, %v649_v53  ;;  %761 = vst [vmem:[#allocation2 + $0x44] sm:$0x1] %v760_v54  ;;  %v665_v58 = vor.u32 %v663_v47, %v662_v46  ;;  %v667_v59 = vrot.slane %v662_v46, 4 }
  0x40   : > { %v671_v60 = vrot.slane %v669_v49, 7  ;;  %v677_v61 = vshrl.u32 %v563_v45, 16  ;;  %v565_v62 = vld [vmem:[%s3562_s20 + $0x3c] sm:$0xf]  ;;  %v769_v0 = vld [vmem:[#allocation2 + $0x54] sm:$0xf] }
  0x41   : > { %v763_v63 = vsel %vm3548_vm7, %v657_v55, %v762_v44  ;;  %v680_v2 = vshll.u32 %v563_v45, 16  ;;  %v686_v3 = vshrl.u32 %v564_v51, 16  ;;  %v689_v4 = vshll.u32 %v564_v51, 16  ;;  %v773_v13 = vld [vmem:[#allocation2 + $0x5c] sm:$0x1] }
  0x42   : > { %764 = vst [vmem:[#allocation2 + $0x48] sm:$0xf] %v763_v63  ;;  %v666_v5 = vsel %vm3555_vm8, %v658_v56, %v665_v58  ;;  %v767_v6 = vsel %vm3470_vm2, %v667_v59, %v766_v57  ;;  %v674_v7 = vor.u32 %v672_v50, %v671_v60  ;;  %v675_v8 = vrot.slane %v671_v60, 4  ;;  %v776_v14 = vld [vmem:[#allocation2 + $0x60] sm:$0xf] }
  0x43   : > { %765 = vst.msk [vmem:[#allocation2 + $0x4c] sm:$0xf] %vm510_vm6, %v666_v5  ;;  %768 = vst [vmem:[#allocation2 + $0x50] sm:$0x1] %v767_v6  ;;  %v679_v9 = vrot.slane %v677_v61, 7  ;;  %v688_v10 = vrot.slane %v686_v3, 7 }
  0x44   : > { %v694_v11 = vshrl.u32 %v565_v62, 16  ;;  %v770_v12 = vsel %vm3548_vm7, %v674_v7, %v769_v0  ;;  %v697_v15 = vshll.u32 %v565_v62, 16  ;;  %v780_v24 = vld [vmem:[#allocation2 + $0x68] sm:$0x1]  ;;  %v787_v29 = vld [vmem:[#allocation2] sm:$0xf] (!%p2762_p10) }
  0x45   : > { %771 = vst [vmem:[#allocation2 + $0x54] sm:$0xf] %v770_v12  ;;  %v682_v16 = vor.u32 %v680_v2, %v679_v9  ;;  %v684_v17 = vrot.slane %v679_v9, 4  ;;  %v691_v18 = vor.u32 %v689_v4, %v688_v10  ;;  %v692_v19 = vrot.slane %v688_v10, 4  ;;  %786 = sbr.rel (%p2762_p10) target bundleno = 76 (0x4c), region = 48 }
  0x46   : > { %v696_v20 = vrot.slane %v694_v11, 7  ;;  %v791_v30 = vld [vmem:[#allocation2 + $0x8] sm:$0x1] (!%p2762_p10)  ;;  %v788_v31 = vsel (!%p2762_p10), %vm3548_vm7, 0, %v787_v29  ;;  %v3397_v32 = vmov (!%p2762_p10), 0  }
  0x47   : > { %v683_v21 = vsel %vm3555_vm8, %v675_v8, %v682_v16  ;;  %v774_v22 = vsel %vm3470_vm2, %v684_v17, %v773_v13  ;;  %v777_v23 = vsel %vm3548_vm7, %v691_v18, %v776_v14  ;;  %790 = vst.msk [vmem:[#allocation2 + $0x4] sm:$0xf] (!%p2762_p10), %vm510_vm6, %v3397_v32  ;;  %v792_v52 = vsel (!%p2762_p10), %vm3470_vm2, 0, %v791_v30  ;;  %789 = vst [vmem:[#allocation2] sm:$0xf] (!%p2762_p10), %v788_v31 }
  0x48   : > { %772 = vst.msk [vmem:[#allocation2 + $0x58] sm:$0xf] %vm510_vm6, %v683_v21  ;;  %775 = vst [vmem:[#allocation2 + $0x5c] sm:$0x1] %v774_v22  ;;  %v699_v25 = vor.u32 %v697_v15, %v696_v20  ;;  %v701_v26 = vrot.slane %v696_v20, 4 }
  0x49   : > { %778 = vst [vmem:[#allocation2 + $0x60] sm:$0xf] %v777_v23  ;;  %793 = vst [vmem:[#allocation2 + $0x8] sm:$0x1] (!%p2762_p10), %v792_v52 }
  0x4a   : > { %v700_v27 = vsel %vm3555_vm8, %v692_v19, %v699_v25  ;;  %v781_v28 = vsel %vm3470_vm2, %v701_v26, %v780_v24 }
  0x4b   : > { %779 = vst.msk [vmem:[#allocation2 + $0x64] sm:$0xf] %vm510_vm6, %v700_v27  ;;  %782 = vst [vmem:[#allocation2 + $0x68] sm:$0x1] %v781_v28 }
  0x4c PF: > { %p2763_p11 = scmp.ne.s32.totalorder %s3379_s21, 1 }
  0x4d   : > { %v798_v33 = vld [vmem:[#allocation2 + $0x6c] sm:$0xf] (!%p2763_p11)  ;;  %v802_v34 = vld [vmem:[#allocation2 + $0x74] sm:$0x1] (!%p2763_p11)  ;;  %v3398_v36 = vmov (!%p2763_p11), 0  }
  0x4e   : > { %797 = sbr.rel (%p2763_p11) target bundleno = 85 (0x55), region = 52  ;;  %v799_v35 = vsel (!%p2763_p11), %vm3548_vm7, 0, %v798_v33  ;;  %801 = vst.msk [vmem:[#allocation2 + $0x70] sm:$0xf] (!%p2763_p11), %vm510_vm6, %v3398_v36  ;;  %v803_v37 = vsel (!%p2763_p11), %vm3470_vm2, 0, %v802_v34 }
  0x4f   : > { %800 = vst [vmem:[#allocation2 + $0x6c] sm:$0xf] (!%p2763_p11), %v799_v35  ;;  %804 = vst [vmem:[#allocation2 + $0x74] sm:$0x1] (!%p2763_p11), %v803_v37 }
  0x55 PF: > { %v2764_v38 = vld [vmem:[%s4225_s3 + $0xc] sm:$0xf]  ;;  %vm893_vm9 = vcmask 1043456   ;;  %vm868_vm10 = vcmask 64512   ;;  %v3682_v1 = vld [vmem:[#allocation2 + $0x18] sm:$0xff]   ;;  %v3695_v42 = vld [vmem:[#allocation2 + $0x24] sm:$0xff]  }
  0x56   : > { %v3676_v39 = vld [vmem:[#allocation2 + $0xc] sm:$0xff]   ;;  %3295 = vmatprep.subr.msk.bf16.mxu1 %vm893_vm9, %v2764_v38  ;;  %v895_v48 = vsel %vm893_vm9, %v2764_v38, 0  ;;  %v825_v43 = vld [vmem:[%s4225_s3] sm:$0xf]  ;;  %v3706_v46 = vld [vmem:[#allocation2 + $0x14] sm:$0x1] }
  0x57   : > { %3004 = vmatpush3.bf16.msra.mxu1 %v895_v48  ;;  %3005 = vmatprep.mubr.msk.bf16.mxu1 %vm868_vm10, %v3676_v39  ;;  %v3687_v40 = vld [vmem:[%s4225_s3 + $0x10] sm:$0xf]  ;;  %v1231_v44 = vld [vmem:[#allocation2 + $0xc] sm:$0xf]  ;;  %vm1258_vm11 = vsmask.f32 3328 }
  0x58   : > { %3299 = vmatprep.subr.msk.bf16.mxu0 %vm893_vm9, %v3687_v40  ;;  %v3693_v41 = vsel %vm893_vm9, %v3687_v40, 0  ;;  %v3701_v45 = vld [vmem:[#allocation2 + $0x10] sm:$0xf]  ;;  %3296 = vmatprep.subr.msk.bf16.mxu1 %vm893_vm9, %v825_v43  ;;  %v1286_v47 = vshrl.u32 %v1231_v44, 16  ;;  %v1289_v49 = vshll.u32 %v1231_v44, 16  ;;  %v1305_v53 = vshll.u32 %v3706_v46, 16 }
  0x59   : > { %3076 = vmatpush3.bf16.msra.mxu0 %v3693_v41  ;;  %v1295_v50 = vshll.u32 %v3701_v45, 16  ;;  %v1299_v51 = vshrl.u32 %v3701_v45, 16  ;;  %vm1259_vm12 = vsmask.f32 7440  ;;  %v2827_v54 = vld [vmem:[%s4225_s3 + $0x1c] sm:$0xf] }
  0x5a   : > { %3006 = vmatmul.mubr.msk.bf16.vlgmr.msra.gmra.mrb[0].mxu1 %vm868_vm10, %v3682_v1  ;;  %v1288_v55 = vrot.slane %v1286_v47, 4  ;;  %v1291_v56 = vrot.slane %v1289_v49, 5  ;;  %3301 = vmatprep.subr.msk.bf16.mxu0 %vm893_vm9, %v2827_v54  ;;  %v3717_v59 = vld [vmem:[#allocation2 + $0x30] sm:$0xff]   ;;  %v1307_v62 = vrot.slane %v1305_v53, 5  ;;  %v1003_v63 = vsel %vm893_vm9, %v825_v43, 0  ;;  %vm3724_vm13 = vmor %vm1258_vm11, %vm1259_vm12  ;;  %v3731_v8 = vld [vmem:[#allocation2 + $0x3c] sm:$0xff]  }
  0x5b   : > { %3009 = vmatprep.mubr.msk.bf16.mxu1 %vm868_vm10, %v3695_v42  ;;  %v1297_v57 = vrot.slane %v1295_v50, 5  ;;  %v1301_v58 = vrot.slane %v1299_v51, 4  ;;  %v1234_v0 = vld [vmem:[#allocation2 + $0x18] sm:$0xf]  ;;  %v3720_v2 = vld [vmem:[#allocation2 + $0x1c] sm:$0xf]  ;;  %3022 = vmatpush3.bf16.msra.mxu1 %v1003_v63 }
  0x5c   : > { %v1292_v60 = vor.u32 %v1291_v56, %v1288_v55  ;;  %v3728_v4 = vld [vmem:[#allocation2 + $0x20] sm:$0x1]  ;;  %v1310_v5 = vshrl.u32 %v1234_v0, 16  ;;  %v1313_v6 = vshll.u32 %v1234_v0, 16  ;;  %v1319_v7 = vshll.u32 %v3720_v2, 16  ;;  %v3752_v31 = vld [vmem:[#allocation2 + $0x48] sm:$0xff]  }
  0x5d   : > { %v1302_v61 = vor.u32 %v1301_v58, %v1297_v57  ;;  %v1323_v11 = vshrl.u32 %v3720_v2, 16  ;;  %v1329_v15 = vshll.u32 %v3728_v4, 16  ;;  %v1800_v19 = vsel %vm893_vm9, %v2827_v54, 0  ;;  %v1237_v20 = vld [vmem:[#allocation2 + $0x24] sm:$0xf]  ;;  %v3757_v35 = vld [vmem:[#allocation2 + $0x54] sm:$0xff]  }
  0x5e   : > { %v1293_v9 = vrot.slane %v1292_v60, 4  ;;  %v1312_v12 = vrot.slane %v1310_v5, 4  ;;  %v1315_v13 = vrot.slane %v1313_v6, 5  ;;  %v1321_v14 = vrot.slane %v1319_v7, 5  ;;  %v3744_v21 = vld [vmem:[#allocation2 + $0x28] sm:$0xf] }
  0x5f   : > { %v1303_v10 = vrot.slane %v1302_v61, 4  ;;  %v1325_v18 = vrot.slane %v1323_v11, 4  ;;  %v1331_v24 = vrot.slane %v1329_v15, 5  ;;  %v3748_v25 = vld [vmem:[#allocation2 + $0x2c] sm:$0x1]  ;;  %v1334_v26 = vshrl.u32 %v1237_v20, 16 }
  0x60   : > { %v1298_v16 = vsel %vm3724_vm13, %v1293_v9, %v1297_v57  ;;  %v1316_v23 = vor.u32 %v1315_v13, %v1312_v12  ;;  %v1337_v28 = vshll.u32 %v1237_v20, 16  ;;  %v1343_v29 = vshll.u32 %v3744_v21, 16  ;;  %v1240_v34 = vld [vmem:[#allocation2 + $0x30] sm:$0xf]  ;;  %v3759_v43 = vld [vmem:[#allocation2 + $0x34] sm:$0xf] }
  0x61   : > { %v1308_v17 = vsel %vm3724_vm13, %v1303_v10, %v1307_v62  ;;  %v1326_v27 = vor.u32 %v1325_v18, %v1321_v14  ;;  %v1347_v30 = vshrl.u32 %v3744_v21, 16  ;;  %v1336_v52 = vrot.slane %v1334_v26, 4  ;;  %v3763_v49 = vld [vmem:[#allocation2 + $0x38] sm:$0x1]  ;;  %v2845_v62 = vld [vmem:[%s4225_s3 + $0x8] sm:$0xf] }
  0x62   : > { %3010 = vmatmul.mubr.msk.bf16.gmra.mrb[4].mxu1 %vm868_vm10, %v3717_v59  ;;  %v3746_v22 = vcombine.low %v1298_v16, %v1308_v17  ;;  %v1317_v32 = vrot.slane %v1316_v23, 4  ;;  %v1353_v33 = vshll.u32 %v3748_v25, 16  ;;  %v1339_v37 = vrot.slane %v1337_v28, 5  ;;  %v1243_v13 = vld [vmem:[#allocation2 + $0x3c] sm:$0xf]  ;;  %v3788_v17 = vld [vmem:[#allocation2 + $0x60] sm:$0xff]  }
  0x63   : > { %3013 = vmatprep.mubr.msk.bf16.mxu1 %vm868_vm10, %v3731_v8  ;;  %v1327_v36 = vrot.slane %v1326_v27, 4  ;;  %v1345_v38 = vrot.slane %v1343_v29, 5  ;;  %v1349_v48 = vrot.slane %v1347_v30, 4  ;;  %v1358_v50 = vshrl.u32 %v1240_v34, 16  ;;  %v3790_v18 = vld [vmem:[#allocation2 + $0x40] sm:$0xf] }
  0x64   : > { %3077 = vmatprep.mubr.msk.bf16.mxu0 %vm868_vm10, %v3746_v22  ;;  %v1322_v44 = vsel %vm3724_vm13, %v1317_v32, %v1321_v14  ;;  %v1355_v47 = vrot.slane %v1353_v33, 5  ;;  %v1361_v51 = vshll.u32 %v1240_v34, 16  ;;  %v1340_v54 = vor.u32 %v1339_v37, %v1336_v52  ;;  %v2790_v27 = vld [vmem:[%s4225_s3 + $0x18] sm:$0xf]  ;;  %v1246_v32 = vld [vmem:[#allocation2 + $0x48] sm:$0xf] }
  0x65   : > { %v1332_v53 = vsel %vm3724_vm13, %v1327_v36, %v1331_v24  ;;  %v1350_v55 = vor.u32 %v1349_v48, %v1345_v38  ;;  %v1367_v56 = vshll.u32 %v3759_v43, 16  ;;  %v1360_v58 = vrot.slane %v1358_v50, 4  ;;  %3297 = vmatprep.subr.msk.bf16.mxu1 %vm893_vm9, %v2790_v27  ;;  %v3802_v52 = vld [vmem:[#allocation2 + $0x4c] sm:$0xf]  ;;  %v3804_v33 = vld [vmem:[#allocation2 + $0x44] sm:$0x1] }
  0x66   : > { %v3768_v57 = vcombine.low %v1322_v44, %v1332_v53  ;;  %v1363_v60 = vrot.slane %v1361_v51, 5  ;;  %v1371_v61 = vshrl.u32 %v3759_v43, 16  ;;  %v1341_v63 = vrot.slane %v1340_v54, 4  ;;  %v3812_v48 = vld [vmem:[#allocation2 + $0x50] sm:$0x1] }
  0x67   : > { %v1351_v0 = vrot.slane %v1350_v55, 4  ;;  %v1369_v5 = vrot.slane %v1367_v56, 5  ;;  %v1377_v6 = vshll.u32 %v3763_v49, 16  ;;  %v1382_v20 = vshrl.u32 %v1243_v13, 16  ;;  %v1249_v55 = vld [vmem:[#allocation2 + $0x54] sm:$0xf] }
  0x68   : > { %3078 = vmatmul.mubr.msk.bf16.vlgmr.msra.gmra.mrb[0].mxu0 %vm868_vm10, %v3768_v57  ;;  %v1364_v7 = vor.u32 %v1363_v60, %v1360_v58  ;;  %v1373_v9 = vrot.slane %v1371_v61, 4  ;;  %v1346_v10 = vsel %vm3724_vm13, %v1341_v63, %v1345_v38  ;;  %v1385_v23 = vshll.u32 %v1243_v13, 16  ;;  %v3822_v63 = vld [vmem:[#allocation2 + $0x58] sm:$0xf] }
  0x69   : > { %3094 = vmatpush3.bf16.msra.mxu0 %v1800_v19  ;;  %v1356_v11 = vsel %vm3724_vm13, %v1351_v0, %v1355_v47  ;;  %v1379_v12 = vrot.slane %v1377_v6, 5  ;;  %v3355_v19 = vld [vmem:[#allocation2] sm:$0xff]   ;;  %v1391_v24 = vshll.u32 %v3790_v18, 16  ;;  %v1395_v26 = vshrl.u32 %v3790_v18, 16 }
  0x6a   : > { %3014 = vmatmul.mubr.msk.bf16.gmra.mrb[8].mxu1 %vm868_vm10, %v3752_v31  ;;  %v3785_v14 = vcombine.low %v1346_v10, %v1356_v11  ;;  %v1365_v15 = vrot.slane %v1364_v7, 4  ;;  %v1374_v16 = vor.u32 %v1373_v9, %v1369_v5  ;;  %3302 = vmatprep.subr.msk.bf16.mxu0 %vm893_vm9, %v2845_v62  ;;  %v1384_v30 = vrot.slane %v1382_v20, 4 }
  0x6b   : > { %3017 = vmatprep.mubr.msk.bf16.mxu1 %vm868_vm10, %v3757_v35  ;;  %v1387_v34 = vrot.slane %v1385_v23, 5  ;;  %v3806_v36 = vrot.slane %v1391_v24, 5  ;;  %v1397_v37 = vrot.slane %v1395_v26, 4  ;;  %v1406_v44 = vshrl.u32 %v1246_v32, 16  ;;  %v3834_v26 = vld [vmem:[#allocation2 + $0x64] sm:$0xf] }
  0x6c   : > { %3081 = vmatprep.mubr.msk.bf16.mxu0 %vm868_vm10, %v3785_v14  ;;  %v1370_v28 = vsel %vm3724_vm13, %v1365_v15, %v1369_v5  ;;  %v1375_v29 = vrot.slane %v1374_v16, 4  ;;  %v1409_v47 = vshll.u32 %v1246_v32, 16  ;;  %v1415_v50 = vshll.u32 %v3802_v52, 16  ;;  %v1252_v16 = vld [vmem:[#allocation2 + $0x60] sm:$0xf] }
  0x6d   : > { %v1388_v53 = vor.u32 %v1387_v34, %v1384_v30  ;;  %v1419_v54 = vshrl.u32 %v3802_v52, 16  ;;  %v1401_v56 = vshll.u32 %v3804_v33, 16  ;;  %v1408_v58 = vrot.slane %v1406_v44, 4  ;;  %v3836_v30 = vld [vmem:[#allocation2 + $0x5c] sm:$0x1] }
  0x6e   : > { %v1380_v38 = vsel %vm3724_vm13, %v1375_v29, %v1379_v12  ;;  %v1411_v60 = vrot.slane %v1409_v47, 5  ;;  %v3820_v61 = vrot.slane %v1415_v50, 5  ;;  %v1398_v0 = vor.u32 %v1397_v37, %v3806_v36 }
  0x6f   : > { %v3815_v51 = vcombine.low %v1370_v28, %v1380_v38  ;;  %v1421_v5 = vrot.slane %v1419_v54, 4  ;;  %v1425_v6 = vshll.u32 %v3812_v48, 16  ;;  %v1430_v9 = vshrl.u32 %v1249_v55, 16  ;;  %v3843_v38 = vld [vmem:[#allocation2 + $0x68] sm:$0x1] }
  0x70   : > { %v1412_v7 = vor.u32 %v1411_v60, %v1408_v58  ;;  %v1433_v10 = vshll.u32 %v1249_v55, 16  ;;  %v2059_v11 = vsel %vm893_vm9, %v2845_v62, 0  ;;  %v1389_v12 = vrot.slane %v1388_v53, 4  ;;  %v1255_v54 = vld [vmem:[#allocation2 + $0x6c] sm:$0xf] }
  0x71   : > { %3082 = vmatmul.mubr.msk.bf16.gmra.mrb[4].mxu0 %vm868_vm10, %v3815_v51  ;;  %v1422_v13 = vor.u32 %v1421_v5, %v3820_v61  ;;  %v1439_v15 = vshll.u32 %v3822_v63, 16  ;;  %v1403_v20 = vrot.slane %v1401_v56, 5  ;;  %v1432_v23 = vrot.slane %v1430_v9, 4  ;;  %v3851_v55 = vld [vmem:[#allocation2 + $0x70] sm:$0xf] }
  0x72   : > { %3018 = vmatmul.mubr.msk.bf16.gmra.mrb[12].mxu1 %vm868_vm10, %v3788_v17  ;;  %3095 = vmatprep.mubr.msk.bf16.mxu0 %vm868_vm10, %v3768_v57  ;;  %v1435_v24 = vrot.slane %v1433_v10, 5  ;;  %v1399_v28 = vrot.slane %v1398_v0, 4  ;;  %v1427_v29 = vrot.slane %v1425_v6, 5  ;;  %v1443_v62 = vshrl.u32 %v3822_v63, 16  ;;  %v3857_v0 = vld [vmem:[%s4225_s3 + $0x14] sm:$0xf] }
  0x73   : > { %3023 = vmatprep.mubr.msk.bf16.mxu1 %vm868_vm10, %v3355_v19  ;;  %v1113_v19 = vsel %vm893_vm9, %v2790_v27, 0  ;;  %v3838_v32 = vrot.slane %v1439_v15, 5  ;;  %v1413_v34 = vrot.slane %v1412_v7, 4  ;;  %v1423_v37 = vrot.slane %v1422_v13, 4  ;;  %v3875_v15 = vld [vmem:[%s4225_s3 + $0x4] sm:$0xf] }
  0x74   : > { %v1620_v27 = vshrl.u32 %v1252_v16, 16  ;;  %v1623_v44 = vshll.u32 %v1252_v16, 16  ;;  %v1394_v47 = vsel %vm3724_vm13, %v1389_v12, %v3806_v36  ;;  %v1445_v50 = vrot.slane %v1443_v62, 4 }
  0x75   : > { %v1629_v53 = vshll.u32 %v3834_v26, 16  ;;  %v1449_v56 = vshll.u32 %v3836_v30, 16  ;;  %v1404_v36 = vsel %vm3724_vm13, %v1399_v28, %v1403_v20  ;;  %v1633_v7 = vshrl.u32 %v3834_v26, 16 }
  0x76   : > { %v1622_v58 = vrot.slane %v1620_v27, 4  ;;  %v1625_v60 = vrot.slane %v1623_v44, 5  ;;  %v1446_v5 = vor.u32 %v1445_v50, %v3838_v32  ;;  %v1418_v9 = vsel %vm3724_vm13, %v1413_v34, %v3820_v61 }
  0x77   : > { %v1631_v6 = vrot.slane %v1629_v53, 5  ;;  %v1428_v10 = vsel %vm3724_vm13, %v1423_v37, %v1427_v29  ;;  %v1768_v12 = vshrl.u32 %v1255_v54, 16  ;;  %v1771_v13 = vshll.u32 %v1255_v54, 16 }
  0x78   : > { %v1626_v16 = vor.u32 %v1625_v60, %v1622_v58  ;;  %v1635_v20 = vrot.slane %v1633_v7, 4  ;;  %v3883_v61 = vcombine.low %v1394_v47, %v1404_v36  ;;  %v1781_v28 = vshrl.u32 %v3851_v55, 16 }
  0x79   : > { %3096 = vmatmul.mubr.msk.bf16.vlgmr.msra.gmra.mrb[0].mxu0 %vm868_vm10, %v3785_v14  ;;  %v1447_v29 = vrot.slane %v1446_v5, 4  ;;  %v1770_v34 = vrot.slane %v1768_v12, 4  ;;  %v1773_v37 = vrot.slane %v1771_v13, 5  ;;  %v3886_v27 = vcombine.low %v1418_v9, %v1428_v10  ;;  %v3911_v13 = vld [vmem:[#allocation2 + $0x8] sm:$0x1] }
  0x7a   : > { %3024 = vmatmul.mubr.msk.bf16.vlgmr.msra.gmra.mrb[0].mxu1 %vm868_vm10, %v3676_v39  ;;  %v1436_v39 = vor.u32 %v1435_v24, %v1432_v23  ;;  %3112 = vmatpush3.bf16.msra.mxu0 %v2059_v11  ;;  %v1639_v11 = vshll.u32 %v3843_v38, 16  ;;  %v1451_v24 = vrot.slane %v1449_v56, 5  ;;  %v1636_v62 = vor.u32 %v1635_v20, %v1631_v6  ;;  %v3894_v56 = vld [vmem:[#allocation2 + $0x4] sm:$0xf] }
  0x7b   : > { %3027 = vmatprep.mubr.msk.bf16.mxu1 %vm868_vm10, %v3682_v1  ;;  %3040 = vmatpush3.bf16.msra.mxu1 %v1113_v19  ;;  %v1777_v19 = vshll.u32 %v3851_v55, 16  ;;  %v1783_v50 = vrot.slane %v1781_v28, 4  ;;  %v1627_v47 = vrot.slane %v1626_v16, 4  ;;  %v1774_v36 = vor.u32 %v1773_v37, %v1770_v34  ;;  %v1916_v34 = vld [vmem:[#allocation2 + $0xc] sm:$0xe] }
  0x7c   : > { %3099 = vmatprep.mubr.msk.bf16.mxu0 %vm868_vm10, %v3815_v51  ;;  %3303 = vmatprep.subr.msk.bf16.mxu0 %vm893_vm9, %v3857_v0  ;;  %v1437_v23 = vrot.slane %v1436_v39, 4  ;;  %v1637_v53 = vrot.slane %v1636_v62, 4  ;;  %v1641_v54 = vrot.slane %v1639_v11, 5  ;;  %v3892_v39 = vld [vmem:[#allocation2 + $0x74] sm:$0x1]  ;;  %v1452_v60 = vsel %vm3724_vm13, %v1447_v29, %v1451_v24 }
  0x7d   : > { %3298 = vmatprep.subr.msk.bf16.mxu1 %vm893_vm9, %v3875_v15  ;;  %v1779_v44 = vrot.slane %v1777_v19, 5  ;;  %v1787_v7 = vshll.u32 %v3892_v39, 16  ;;  %v1632_v9 = vsel %vm3724_vm13, %v1627_v47, %v1631_v6  ;;  %v1954_v12 = vrot.slane %v3894_v56, 5 }
  0x7e   : > { %v1442_v58 = vsel %vm3724_vm13, %v1437_v23, %v3838_v32  ;;  %v1642_v10 = vsel %vm3724_vm13, %v1637_v53, %v1641_v54  ;;  %v1915_v32 = vld [vmem:[#allocation2] sm:$0xe]  ;;  %vm1949_vm14 = vcmask 1042432   ;;  %vm1950_vm15 = vcmask 1046532   ;;  %v1917_v54 = vld [vmem:[#allocation2 + $0x18] sm:$0xe] }
  0x7f   : > { %v1784_v5 = vor.u32 %v1783_v50, %v1779_v44  ;;  %v3913_v16 = vcombine.low %v1442_v58, %v1452_v60  ;;  %v3915_v20 = vcombine.low %v1632_v9, %v1642_v10  ;;  %v1775_v11 = vrot.slane %v1774_v36, 4  ;;  %vm3922_vm0 = vmor %vm1949_vm14, %vm1950_vm15  ;;  %v1923_v58 = vld [vmem:[#allocation2 + $0x60] sm:$0xe] }
  0x80   : > { %v1789_v6 = vrot.slane %v1787_v7, 5  ;;  %v2837_v23 = vrot.slane %v1915_v32, 9  ;;  %v1956_v24 = vrot.slane %v1954_v12, 4  ;;  %v1957_v28 = vrot.slane %v3911_v13, 5 }
  0x81   : > { %3100 = vmatmul.mubr.msk.bf16.gmra.mrb[4].mxu0 %vm868_vm10, %v3883_v61  ;;  %v1785_v19 = vrot.slane %v1784_v5, 4  ;;  %v1961_v62 = vrot.slane %v3701_v45, 5  ;;  %v1780_v37 = vsel %vm3724_vm13, %v1775_v11, %v1779_v44  ;;  %v1968_v45 = vrot.slane %v3720_v2, 5  ;;  %v1924_v44 = vld [vmem:[#allocation2 + $0x6c] sm:$0xe] }
  0x82   : > { %3028 = vmatmul.mubr.msk.bf16.gmra.mrb[4].mxu1 %vm868_vm10, %v3695_v42  ;;  %3103 = vmatprep.mubr.msk.bf16.mxu0 %vm868_vm10, %v3886_v27  ;;  %v1955_v47 = vsel %vm3922_vm0, %v2837_v23, %v1954_v12  ;;  %v1958_v53 = vsel %vm3922_vm0, %v1956_v24, %v1957_v28  ;;  %v2838_v60 = vrot.slane %v1916_v34, 9  ;;  %v1964_v5 = vrot.slane %v3706_v46, 5 }
  0x83   : > { %3031 = vmatprep.mubr.msk.bf16.mxu1 %vm868_vm10, %v3717_v59  ;;  %v1790_v50 = vsel %vm3724_vm13, %v1785_v19, %v1789_v6  ;;  %v1963_v36 = vrot.slane %v1961_v62, 4  ;;  %v2846_v9 = vcombine.low %v1955_v47, %v1958_v53  ;;  %v2839_v10 = vrot.slane %v1917_v54, 9 }
  0x84   : > { %v2828_v7 = vcombine.low %v1780_v37, %v1790_v50  ;;  %v1970_v12 = vrot.slane %v1968_v45, 4  ;;  %v1971_v32 = vrot.slane %v3728_v4, 5  ;;  %v2862_v2 = vrot.slane %v1923_v58, 9  ;;  %v1919_v50 = vld [vmem:[#allocation2 + $0x30] sm:$0xe] }
  0x85   : > { %v2179_v11 = vrot.slane %v3834_v26, 5  ;;  %v1962_v19 = vsel %vm3922_vm0, %v2838_v60, %v1961_v62  ;;  %v1965_v46 = vsel %vm3922_vm0, %v1963_v36, %v1964_v5  ;;  %v2182_v6 = vrot.slane %v3843_v38, 5  ;;  %v1228_v58 = vld [vmem:[#allocation2] sm:$0xf] }
  0x86   : > { %v2873_v23 = vrot.slane %v1924_v44, 9  ;;  %v1975_v24 = vrot.slane %v3744_v21, 5  ;;  %v2313_v28 = vrot.slane %v3851_v55, 5  ;;  %v1969_v62 = vsel %vm3922_vm0, %v2839_v10, %v1968_v45 }
  0x87   : > { %v2180_v4 = vsel %vm3922_vm0, %v2862_v2, %v2179_v11  ;;  %v2181_v26 = vrot.slane %v2179_v11, 4  ;;  %v1972_v34 = vsel %vm3922_vm0, %v1970_v12, %v1971_v32  ;;  %v1982_v38 = vrot.slane %v3759_v43, 5  ;;  %v1920_v11 = vld [vmem:[#allocation2 + $0x3c] sm:$0xe] }
  0x88   : > { %v2316_v37 = vrot.slane %v3892_v39, 5  ;;  %v1504_v21 = vsel %vm893_vm9, %v3875_v15, 0  ;;  %v3970_v55 = vsel %vm3922_vm0, %v2873_v23, %v2313_v28  ;;  %v2315_v53 = vrot.slane %v2313_v28, 4 }
  0x89   : > { %3104 = vmatmul.mubr.msk.bf16.gmra.mrb[8].mxu0 %vm868_vm10, %v3913_v16  ;;  %v2183_v47 = vsel %vm3922_vm0, %v2181_v26, %v2182_v6  ;;  %v3972_v45 = vcombine.low %v1962_v19, %v1965_v46  ;;  %v2193_v54 = vsel %vm893_vm9, %v3857_v0, 0  ;;  %v3978_v60 = vcombine.low %v1969_v62, %v1972_v34  ;;  %v1921_v46 = vld [vmem:[#allocation2 + $0x48] sm:$0xe] }
  0x8a   : > { %3032 = vmatmul.mubr.msk.bf16.gmra.mrb[8].mxu1 %vm868_vm10, %v3731_v8  ;;  %3107 = vmatprep.mubr.msk.bf16.mxu0 %vm868_vm10, %v3915_v20  ;;  %v3976_v39 = vcombine.low %v2180_v4, %v2183_v47  ;;  %v1977_v15 = vrot.slane %v1975_v24, 4  ;;  %v1978_v36 = vrot.slane %v3748_v25, 5  ;;  %v3985_v5 = vsel %vm3922_vm0, %v2315_v53, %v2316_v37  ;;  %v1922_v47 = vld [vmem:[#allocation2 + $0x54] sm:$0xe] }
  0x8b   : > { %3035 = vmatprep.mubr.msk.bf16.mxu1 %vm868_vm10, %v3752_v31  ;;  %v2841_v0 = vrot.slane %v1919_v50, 9  ;;  %v2875_v44 = vcombine.low %v3970_v55, %v3985_v5  ;;  %v1262_v25 = vshrl.u32 %v1228_v58, 16  ;;  %v1265_v10 = vshll.u32 %v1228_v58, 16  ;;  %v4119_v55 = vld [vmem:[%s4226_s4] ss:$0 sm:$0xff] }
  0x8c   : > { %v1271_v12 = vshll.u32 %v3894_v56, 16  ;;  %v1275_v32 = vshrl.u32 %v3894_v56, 16  ;;  %v1989_v2 = vrot.slane %v3790_v18, 5  ;;  %v1996_v19 = vrot.slane %v3802_v52, 5 }
  0x8d   : > { %v1983_v56 = vsel %vm3922_vm0, %v2841_v0, %v1982_v38  ;;  %v1264_v6 = vrot.slane %v1262_v25, 4  ;;  %v1267_v23 = vrot.slane %v1265_v10, 5  ;;  %v2842_v26 = vrot.slane %v1920_v11, 9 }
  0x8e   : > { %v1991_v28 = vrot.slane %v1989_v2, 4  ;;  %v1992_v62 = vrot.slane %v3804_v33, 5  ;;  %v2843_v52 = vrot.slane %v1921_v46, 9  ;;  %v1998_v34 = vrot.slane %v1996_v19, 4 }
  0x8f   : > { %v1268_v37 = vor.u32 %v1267_v23, %v1264_v6  ;;  %v2003_v33 = vrot.slane %v3822_v63, 5  ;;  %vm2568_vm1 = vcmask 27648  }
  0x91   : > { %3108 = vmatmul.mubr.msk.bf16.gmra.mrb[12].mxu0 %vm868_vm10, %v2828_v7  ;;  %v1984_v7 = vrot.slane %v1982_v38, 4  ;;  %v1999_v38 = vrot.slane %v3812_v48, 5  ;;  %v1997_v48 = vsel %vm3922_vm0, %v2843_v52, %v1996_v19  ;;  %v1269_v53 = vrot.slane %v1268_v37, 4 }
  0x92   : > { %3036 = vmatmul.mubr.msk.bf16.gmra.mrb[12].mxu1 %vm868_vm10, %v3757_v35  ;;  %3113 = vmatprep.mubr.msk.bf16.mxu0 %vm868_vm10, %v2846_v9  ;;  %v1985_v9 = vrot.slane %v3763_v49, 5  ;;  %v1979_v49 = vsel %vm3922_vm0, %v1977_v15, %v1978_v36  ;;  %v2844_v36 = vrot.slane %v1922_v47, 9  ;;  %v2005_v0 = vrot.slane %v2003_v33, 4 }
  0x93   : > { %3041 = vmatprep.mubr.msk.bf16.mxu1 %vm868_vm10, %v3682_v1  ;;  %v1918_v1 = vld [vmem:[#allocation2 + $0x24] sm:$0xe] }
  0x94   : > { %v2840_v43 = vrot.slane %v1918_v1, 9  ;;  %v1273_v1 = vrot.slane %v1271_v12, 5 }
  0x96   : > { %v1274_v63 = vsel %vm3724_vm13, %v1269_v53, %v1273_v1 }
  0x99   : > { %3114 = vmatmul.mubr.msk.bf16.vlgmr.msra.gmra.mrb[0].mxu0 %vm868_vm10, %v3972_v45 }
  0x9a   : > { %3042 = vmatmul.mubr.msk.bf16.vlgmr.msra.gmra.mrb[0].mxu1 %vm868_vm10, %v3695_v42  ;;  %v3995_v42 = vld [vmem:[%s4225_s3 + $0x20] sm:$0xf]  ;;  %3130 = vmatpush3.bf16.msra.mxu0 %v2193_v54 }
  0x9b   : > { %3045 = vmatprep.mubr.msk.bf16.mxu1 %vm868_vm10, %v3717_v59  ;;  %3058 = vmatpush3.bf16.msra.mxu1 %v1504_v21  ;;  %v1976_v59 = vsel %vm3922_vm0, %v2840_v43, %v1975_v24  ;;  %v1277_v24 = vrot.slane %v1275_v32, 4  ;;  %v1281_v21 = vshll.u32 %v3911_v13, 16  ;;  %v2000_v13 = vsel %vm3922_vm0, %v1998_v34, %v1999_v38 }
  0x9c   : > { %3300 = vmatprep.subr.msk.bf16.mxu1 %vm893_vm9, %v3687_v40  ;;  %3117 = vmatprep.mubr.msk.bf16.mxu0 %vm868_vm10, %v3978_v60  ;;  %v1986_v40 = vsel %vm3922_vm0, %v1984_v7, %v1985_v9  ;;  %v4017_v4 = vcombine.low %v1976_v59, %v1979_v49  ;;  %v2852_v15 = vcombine.low %v1997_v48, %v2000_v13  ;;  %v2006_v7 = vrot.slane %v3836_v30, 5  ;;  %v3356_v30 = vld [vmem:[#allocation2 + $0x6c] sm:$0xff]  }
  0x9d   : > { %3304 = vmatprep.subr.msk.bf16.mxu0 %vm893_vm9, %v3995_v42  ;;  %v4019_v18 = vcombine.low %v1983_v56, %v1986_v40  ;;  %v1278_v50 = vor.u32 %v1277_v24, %v1273_v1  ;;  %v1283_v43 = vrot.slane %v1281_v21, 5  ;;  %v2327_v3 = vsel %vm893_vm9, %v3995_v42, 0 }
  0x9e   : > { %v2007_v25 = vsel %vm3922_vm0, %v2005_v0, %v2006_v7 }
  0x9f   : > { %v1279_v54 = vrot.slane %v1278_v50, 4 }
  0xa1   : > { %3118 = vmatmul.mubr.msk.bf16.gmra.mrb[4].mxu0 %vm868_vm10, %v4017_v4  ;;  %v1284_v9 = vsel %vm3724_vm13, %v1279_v54, %v1283_v43 }
  0xa2   : > { %3046 = vmatmul.mubr.msk.bf16.gmra.mrb[4].mxu1 %vm868_vm10, %v3731_v8  ;;  %3121 = vmatprep.mubr.msk.bf16.mxu0 %vm868_vm10, %v4019_v18  ;;  %v1990_v8 = vsel %vm3922_vm0, %v2842_v26, %v1989_v2  ;;  %v2801_v10 = vcombine.low %v1274_v63, %v1284_v9 }
  0xa3   : > { %3049 = vmatprep.mubr.msk.bf16.mxu1 %vm868_vm10, %v3752_v31  ;;  %v1993_v31 = vsel %vm3922_vm0, %v1991_v28, %v1992_v62 }
  0xa4   : > { %v2851_v58 = vcombine.low %v1990_v8, %v1993_v31 }
  0xa9   : > { %3122 = vmatmul.mubr.msk.bf16.gmra.mrb[8].mxu0 %vm868_vm10, %v2851_v58 }
  0xaa   : > { %3050 = vmatmul.mubr.msk.bf16.gmra.mrb[8].mxu1 %vm868_vm10, %v3757_v35  ;;  %3125 = vmatprep.mubr.msk.bf16.mxu0 %vm868_vm10, %v2852_v15  ;;  %v2004_v35 = vsel %vm3922_vm0, %v2844_v36, %v2003_v33 }
  0xab   : > { %3053 = vmatprep.mubr.msk.bf16.mxu1 %vm868_vm10, %v3788_v17  ;;  %v2853_v12 = vcombine.low %v2004_v35, %v2007_v25 }
  0xb1   : > { %3126 = vmatmul.mubr.msk.bf16.gmra.mrb[12].mxu0 %vm868_vm10, %v2853_v12 }
  0xb2   : > { %3054 = vmatmul.mubr.msk.bf16.gmra.mrb[12].mxu1 %vm868_vm10, %v3356_v30  ;;  %3131 = vmatprep.mubr.msk.bf16.mxu0 %vm868_vm10, %v3972_v45 }
  0xb3   : > { %3059 = vmatprep.mubr.msk.bf16.mxu1 %vm868_vm10, %v2801_v10 }
  0xb9   : > { %3132 = vmatmul.mubr.msk.bf16.vlgmr.msra.gmra.mrb[0].mxu0 %vm868_vm10, %v3978_v60 }
  0xba   : > { %3060 = vmatmul.mubr.msk.bf16.vlgmr.msra.gmra.mrb[0].mxu1 %vm868_vm10, %v3746_v22  ;;  %3148 = vmatpush3.bf16.msra.mxu0 %v2327_v3 }
  0xbb   : > { %3063 = vmatprep.mubr.msk.bf16.mxu1 %vm868_vm10, %v3768_v57  ;;  %3166 = vmatpush3.bf16.msra.mxu1 %v3693_v41 }
  0xbc   : > { %3135 = vmatprep.mubr.msk.bf16.mxu0 %vm868_vm10, %v4017_v4 }
  0xc1   : > { %3136 = vmatmul.mubr.msk.bf16.gmra.mrb[4].mxu0 %vm868_vm10, %v4019_v18 }
  0xc2   : > { %3064 = vmatmul.mubr.msk.bf16.gmra.mrb[4].mxu1 %vm868_vm10, %v3785_v14  ;;  %3139 = vmatprep.mubr.msk.bf16.mxu0 %vm868_vm10, %v2851_v58 }
  0xc3   : > { %3067 = vmatprep.mubr.msk.bf16.mxu1 %vm868_vm10, %v3815_v51 }
  0xc9   : > { %3140 = vmatmul.mubr.msk.bf16.gmra.mrb[8].mxu0 %vm868_vm10, %v2852_v15 }
  0xca   : > { %3068 = vmatmul.mubr.msk.bf16.gmra.mrb[8].mxu1 %vm868_vm10, %v3883_v61  ;;  %3143 = vmatprep.mubr.msk.bf16.mxu0 %vm868_vm10, %v2853_v12 }
  0xcb   : > { %3071 = vmatprep.mubr.msk.bf16.mxu1 %vm868_vm10, %v3886_v27 }
  0xd1   : > { %3144 = vmatmul.mubr.msk.bf16.gmra.mrb[12].mxu0 %vm868_vm10, %v3976_v39 }
  0xd2   : > { %3072 = vmatmul.mubr.msk.bf16.gmra.mrb[12].mxu1 %vm868_vm10, %v3913_v16  ;;  %3149 = vmatprep.mubr.msk.bf16.mxu0 %vm868_vm10, %v3978_v60 }
  0xd3   : > { %3085 = vmatprep.mubr.msk.bf16.mxu1 %vm868_vm10, %v3883_v61 }
  0xd9   : > { %3150 = vmatmul.mubr.msk.bf16.vlgmr.msra.gmra.mrb[0].mxu0 %vm868_vm10, %v4017_v4 }
  0xda   : > { %3086 = vmatmul.mubr.msk.bf16.vlgmr.msra.gmra.mrb[8].mxu1 %vm868_vm10, %v3886_v27  ;;  %3153 = vmatprep.mubr.msk.bf16.mxu0 %vm868_vm10, %v4019_v18 }
  0xdb   : > { %3089 = vmatprep.mubr.msk.bf16.mxu1 %vm868_vm10, %v3913_v16 }
  0xe1   : > { %3154 = vmatmul.mubr.msk.bf16.gmra.mrb[4].mxu0 %vm868_vm10, %v2851_v58 }
  0xe2   : > { %3090 = vmatmul.mubr.msk.bf16.gmra.mrb[12].mxu1 %vm868_vm10, %v3915_v20  ;;  %3157 = vmatprep.mubr.msk.bf16.mxu0 %vm868_vm10, %v2852_v15 }
  0xe9   : > { %3158 = vmatmul.mubr.msk.bf16.gmra.mrb[8].mxu0 %vm868_vm10, %v2853_v12 }
  0xea   : > { %3161 = vmatprep.mubr.msk.bf16.mxu0 %vm868_vm10, %v3976_v39 }
  0xf1   : > { %3162 = vmatmul.mubr.msk.bf16.gmra.mrb[12].mxu0 %vm868_vm10, %v2875_v44  ;;  %v4126_v44 = vld [vmem:[%s4227_s5] ss:$0 sm:$0xff] }
 0x18d   : > { %v3061_v41 = vpop.f32.mrb[0].mxu1 }
 0x18e   : > { %v1540_v22 = vpop.f32.mrb[1].mxu1 }
 0x18f   : > { %v3062_v57 = vpop.f32.mrb[2].mxu1 }
 0x190   : > { %v1543_v14 = vpop.f32.mrb[3].mxu1 }
 0x195   : > { %v3065_v17 = vpop.f32.mrb[4].mxu1 }
 0x196   : > { %v1556_v51 = vpop.f32.mrb[5].mxu1 }
 0x197   : > { %v3066_v61 = vpop.f32.mrb[6].mxu1 }
 0x198   : > { %v1559_v27 = vpop.f32.mrb[7].mxu1 }
 0x1ac   : > { %v3151_v45 = vpop.f32.mrb[0].mxu0 }
 0x1ad   : > { %v3087_v16 = vpop.f32.mrb[8].mxu1  ;;  %v3167_v60 = vadd.f32 %v3151_v45, %v3061_v41  ;;  %v2363_v5 = vpop.f32.mrb[1].mxu0 }
 0x1ae   : > { %v4112_v20 = vpop.f32.mrb[9].mxu1  ;;  %v3168_v42 = vadd.f32 %v2363_v5, %v1540_v22  ;;  %v3152_v32 = vpop.f32.mrb[2].mxu0 }
 0x1af   : > { %v4114_v29 = vpop.f32.mrb[10].mxu1  ;;  %v2451_v59 = vmul.f32 %v3167_v60, %v4119_v55  ;;  %v3169_v49 = vadd.f32 %v3152_v32, %v3062_v57  ;;  %v2366_v2 = vpop.f32.mrb[3].mxu0 }
 0x1b0   : > { %v4121_v39 = vpop.f32.mrb[11].mxu1  ;;  %v2449_v56 = vmul.f32 %v3168_v42, %v4119_v55  ;;  %v3170_v40 = vadd.f32 %v2366_v2, %v1543_v14 }
 0x1b1   : > { %v2474_v11 = vadd.f32 %v4126_v44, %v2451_v59  ;;  %v2452_v19 = vmul.f32 %v3169_v49, %v4119_v55 }
 0x1b2   : > { %v2472_v6 = vadd.f32 %v4126_v44, %v2449_v56  ;;  %v2450_v23 = vmul.f32 %v3170_v40, %v4119_v55 }
 0x1b3   : > { %v2490_v24 = vmax.f32 %v2474_v11, 0.0  ;;  %v2475_v4 = vadd.f32 %v4126_v44, %v2452_v19 }
 0x1b4   : > { %v2488_v26 = vmax.f32 %v2472_v6, 0.0  ;;  %v2473_v28 = vadd.f32 %v4126_v44, %v2450_v23  ;;  %v3155_v62 = vpop.f32.mrb[4].mxu0 }
 0x1b5   : > { %v4132_v46 = vpop.f32.mrb[12].mxu1  ;;  %v2908_v34 = vpack.c.bf16 %v2490_v24, %v2490_v24  ;;  %v2491_v38 = vmax.f32 %v2475_v4, 0.0  ;;  %v3171_v37 = vadd.f32 %v3155_v62, %v3065_v17  ;;  %v2379_v50 = vpop.f32.mrb[5].mxu0 }
 0x1b6   : > { %v4136_v1 = vpop.f32.mrb[13].mxu1  ;;  %v2906_v21 = vpack.c.bf16 %v2488_v26, %v2488_v26  ;;  %v2489_v8 = vmax.f32 %v2473_v28, 0.0  ;;  %v3172_v31 = vadd.f32 %v2379_v50, %v1556_v51  ;;  %v3156_v33 = vpop.f32.mrb[6].mxu0 }
 0x1b7   : > { %v4139_v18 = vpop.f32.mrb[14].mxu1  ;;  %2571 = vst.msk [vmem:[%s3567_s29 + $0x8] sm:$0xf] %vm2568_vm1, %v2908_v34  ;;  %v2909_v48 = vpack.c.bf16 %v2491_v38, %v2491_v38  ;;  %v2455_v13 = vmul.f32 %v3171_v37, %v4119_v55  ;;  %v3173_v47 = vadd.f32 %v3156_v33, %v3066_v61  ;;  %v2382_v53 = vpop.f32.mrb[7].mxu0 }
 0x1b8   : > { %v4142_v52 = vpop.f32.mrb[15].mxu1  ;;  %2569 = vst.msk [vmem:[%s3567_s29] sm:$0xf] %vm2568_vm1, %v2906_v21  ;;  %v2907_v54 = vpack.c.bf16 %v2489_v8, %v2489_v8  ;;  %v2453_v43 = vmul.f32 %v3172_v31, %v4119_v55  ;;  %v3174_v58 = vadd.f32 %v2382_v53, %v1559_v27 }
 0x1b9   : > { %2572 = vst.msk [vmem:[%s3567_s29 + $0xc] sm:$0xf] %vm2568_vm1, %v2909_v48  ;;  %v2478_v15 = vadd.f32 %v4126_v44, %v2455_v13  ;;  %v2456_v36 = vmul.f32 %v3173_v47, %v4119_v55 }
 0x1ba   : > { %2570 = vst.msk [vmem:[%s3567_s29 + $0x4] sm:$0xf] %vm2568_vm1, %v2907_v54  ;;  %v2476_v0 = vadd.f32 %v4126_v44, %v2453_v43  ;;  %v2454_v7 = vmul.f32 %v3174_v58, %v4119_v55 }
 0x1bb   : > { %v2494_v63 = vmax.f32 %v2478_v15, 0.0  ;;  %v2479_v9 = vadd.f32 %v4126_v44, %v2456_v36 }
 0x1bc   : > { %v2492_v35 = vmax.f32 %v2476_v0, 0.0  ;;  %v2477_v25 = vadd.f32 %v4126_v44, %v2454_v7  ;;  %v3159_v30 = vpop.f32.mrb[8].mxu0 }
 0x1bd   : > { %v2912_v10 = vpack.c.bf16 %v2494_v63, %v2494_v63  ;;  %v2495_v12 = vmax.f32 %v2479_v9, 0.0  ;;  %v3175_v3 = vadd.f32 %v3159_v30, %v3087_v16  ;;  %v2395_v41 = vpop.f32.mrb[9].mxu0 }
 0x1be   : > { %v2910_v22 = vpack.c.bf16 %v2492_v35, %v2492_v35  ;;  %v2493_v57 = vmax.f32 %v2477_v25, 0.0  ;;  %v3176_v14 = vadd.f32 %v2395_v41, %v4112_v20  ;;  %v3160_v17 = vpop.f32.mrb[10].mxu0 }
 0x1bf   : > { %2575 = vst.msk [vmem:[%s3567_s29 + $0x18] sm:$0xf] %vm2568_vm1, %v2912_v10  ;;  %v2913_v51 = vpack.c.bf16 %v2495_v12, %v2495_v12  ;;  %v2459_v61 = vmul.f32 %v3175_v3, %v4119_v55  ;;  %v3177_v27 = vadd.f32 %v3160_v17, %v4114_v29  ;;  %v2398_v45 = vpop.f32.mrb[11].mxu0 }
 0x1c0   : > { %2573 = vst.msk [vmem:[%s3567_s29 + $0x10] sm:$0xf] %vm2568_vm1, %v2910_v22  ;;  %v2911_v60 = vpack.c.bf16 %v2493_v57, %v2493_v57  ;;  %v2457_v16 = vmul.f32 %v3176_v14, %v4119_v55  ;;  %v3178_v5 = vadd.f32 %v2398_v45, %v4121_v39 }
 0x1c1   : > { %2576 = vst.msk [vmem:[%s3567_s29 + $0x1c] sm:$0xf] %vm2568_vm1, %v2913_v51  ;;  %v2482_v20 = vadd.f32 %v4126_v44, %v2459_v61  ;;  %v2460_v42 = vmul.f32 %v3177_v27, %v4119_v55 }
 0x1c2   : > { %2574 = vst.msk [vmem:[%s3567_s29 + $0x14] sm:$0xf] %vm2568_vm1, %v2911_v60  ;;  %v2480_v32 = vadd.f32 %v4126_v44, %v2457_v16  ;;  %v2458_v29 = vmul.f32 %v3178_v5, %v4119_v55 }
 0x1c3   : > { %v2498_v59 = vmax.f32 %v2482_v20, 0.0  ;;  %v2483_v49 = vadd.f32 %v4126_v44, %v2460_v42 }
 0x1c4   : > { %v2496_v2 = vmax.f32 %v2480_v32, 0.0  ;;  %v2481_v39 = vadd.f32 %v4126_v44, %v2458_v29  ;;  %v3163_v56 = vpop.f32.mrb[12].mxu0 }
 0x1c5   : > { %v2916_v40 = vpack.c.bf16 %v2498_v59, %v2498_v59  ;;  %v2499_v11 = vmax.f32 %v2483_v49, 0.0  ;;  %v3179_v19 = vadd.f32 %v3163_v56, %v4132_v46  ;;  %v2411_v6 = vpop.f32.mrb[13].mxu0 }
 0x1c6   : > { %v2914_v23 = vpack.c.bf16 %v2496_v2, %v2496_v2  ;;  %v2497_v24 = vmax.f32 %v2481_v39, 0.0  ;;  %v3180_v4 = vadd.f32 %v2411_v6, %v4136_v1  ;;  %v3164_v26 = vpop.f32.mrb[14].mxu0 }
 0x1c7   : > { %2579 = vst.msk [vmem:[%s3567_s29 + $0x28] sm:$0xf] %vm2568_vm1, %v2916_v40  ;;  %v2917_v28 = vpack.c.bf16 %v2499_v11, %v2499_v11  ;;  %v2463_v62 = vmul.f32 %v3179_v19, %v4119_v55  ;;  %v3181_v34 = vadd.f32 %v3164_v26, %v4139_v18  ;;  %v2414_v38 = vpop.f32.mrb[15].mxu0 }
 0x1c8   : > { %2577 = vst.msk [vmem:[%s3567_s29 + $0x20] sm:$0xf] %vm2568_vm1, %v2914_v23  ;;  %v2915_v37 = vpack.c.bf16 %v2497_v24, %v2497_v24  ;;  %v2461_v46 = vmul.f32 %v3180_v4, %v4119_v55  ;;  %v3182_v50 = vadd.f32 %v2414_v38, %v4142_v52 }
 0x1c9   : > { %2580 = vst.msk [vmem:[%s3567_s29 + $0x2c] sm:$0xf] %vm2568_vm1, %v2917_v28  ;;  %v2486_v1 = vadd.f32 %v4126_v44, %v2463_v62  ;;  %v2464_v21 = vmul.f32 %v3181_v34, %v4119_v55 }
 0x1ca   : > { %2578 = vst.msk [vmem:[%s3567_s29 + $0x24] sm:$0xf] %vm2568_vm1, %v2915_v37  ;;  %v2484_v18 = vadd.f32 %v4126_v44, %v2461_v46  ;;  %v2462_v8 = vmul.f32 %v3182_v50, %v4119_v55 }
 0x1cb   : > { %v2502_v31 = vmax.f32 %v2486_v1, 0.0  ;;  %v2487_v33 = vadd.f32 %v4126_v44, %v2464_v21 }
 0x1cc   : > { %v2500_v48 = vmax.f32 %v2484_v18, 0.0  ;;  %v2485_v52 = vadd.f32 %v4126_v44, %v2462_v8 }
 0x1cd   : > { %v2920_v13 = vpack.c.bf16 %v2502_v31, %v2502_v31  ;;  %v2503_v47 = vmax.f32 %v2487_v33, 0.0 }
 0x1ce   : > { %v2918_v53 = vpack.c.bf16 %v2500_v48, %v2500_v48  ;;  %v2501_v54 = vmax.f32 %v2485_v52, 0.0 }
 0x1cf   : > { %2583 = vst.msk [vmem:[%s3567_s29 + $0x38] sm:$0xf] %vm2568_vm1, %v2920_v13  ;;  %v2921_v43 = vpack.c.bf16 %v2503_v47, %v2503_v47 }
 0x1d0   : > { %2581 = vst.msk [vmem:[%s3567_s29 + $0x30] sm:$0xf] %vm2568_vm1, %v2918_v53  ;;  %v2919_v58 = vpack.c.bf16 %v2501_v54, %v2501_v54 }
 0x1d1   : > { %2584 = vst.msk [vmem:[%s3567_s29 + $0x3c] sm:$0xf] %vm2568_vm1, %v2921_v43 }
 0x1d2   : > { %2582 = vst.msk [vmem:[%s3567_s29 + $0x34] sm:$0xf] %vm2568_vm1, %v2919_v58 }
 0x1d3 PF: > { %s16_s25 = sadd.s32 1, %s3395_s25   ;;  %s4242_s21 = smov %s3387_s23 }
 0x1d4   : > { %p13_p12 = scmp.ge.s32.totalorder %s16_s25, 6   ;;  %s4243_s22 = smov %s3391_s24 }
 0x1d5   : > { %s4244_s23 = smov %s4247_s26  ;;  %s4245_s24 = smov %s4251_s27 }
 0x1d6   :  { %15 = sbr.rel (!%p13_p12) target bundleno = 3 (0x3), region = 98 }

</bundles_post_ra>
